<compile_context>
chip_gen: v5e
topology: v5e:2x2
jax: 0.10.0
libtpu: 0.0.40
codegen_flags: <defaults>
</compile_context>

<pallas_src>
import functools
import math

import jax
import jax.numpy as jnp
from jax.experimental import pallas as pl
from jax.experimental.pallas import tpu as pltpu


# ----------------------------- fused decoder-stack kernel ----------------------------

def _decoder_stack_kernel(
    emb_ref, pe_ref, enc_ref, srcbias_ref,
    wqkv_s_ref, bqkv_s_ref, wo_s_ref, bo_s_ref,
    wq_c_ref, bq_c_ref, wkv_c_ref, bkv_c_ref, wo_c_ref, bo_c_ref,
    w1_ref, b1_ref, w2_ref, b2_ref,
    lng_ref, lnb_ref,
    lnf_g_ref, lnf_b_ref, wout_ref,
    out_ref, xfin_ref,
    x_scr, ctx_scr, cbias_scr,
    *, num_heads):
  l = pl.program_id(1)
  nl = pl.num_programs(1)
  Bb, T, H = ctx_scr.shape
  hd = H // num_heads
  scale = 1.0 / math.sqrt(hd)
  bf16 = jnp.bfloat16

  @pl.when(l == 0)
  def _init():
    # PE add fused in-kernel (no x0 HBM materialization) and one-time (per batch
    # block) causal additive-bias construction -> no per-layer iota/compare work.
    x_scr[...] = (emb_ref[...] + pe_ref[...]).reshape(Bb * T, H)
    rows = jax.lax.broadcasted_iota(jnp.int32, (T, T), 0)
    cols = jax.lax.broadcasted_iota(jnp.int32, (T, T), 1)
    cbias_scr[...] = jnp.where(rows >= cols, 0.0, -1e30).astype(jnp.float32)

  x2 = x_scr[...]                                   # (Bb*T, H) f32 residual stream

  def layer_norm(v, g, b):
    mu = jnp.mean(v, axis=-1, keepdims=True)
    vc = v - mu
    var = jnp.mean(vc * vc, axis=-1, keepdims=True)
    return vc * jax.lax.rsqrt(var + 1e-6) * g + b

  def attend(q2, k2, v2, bias, wo_ref, bo_ref):
    # q2: (Bb*T, H) f32; k2/v2: (Bb*Tk, H) f32; bias broadcastable to (Bb, T, Tk).
    Tk = k2.shape[0] // Bb
    q3 = (q2 * scale).reshape(Bb, T, H).astype(bf16)     # reshape while f32 (clean)
    k3 = k2.reshape(Bb, Tk, H).astype(bf16)
    v3 = v2.reshape(Bb, Tk, H).astype(bf16)
    for h in range(num_heads):
      sl = slice(h * hd, (h + 1) * hd)
      s = jnp.einsum("bqd,bkd->bqk", q3[:, :, sl], k3[:, :, sl],
                     preferred_element_type=jnp.float32) + bias      # (Bb, T, Tk)
      s = s - jnp.max(s, axis=-1, keepdims=True)
      p = jnp.exp(s)
      p = p * pl.reciprocal(jnp.sum(p, axis=-1, keepdims=True), approx=True)
      # Per-head context goes straight into VMEM scratch: no lane concat, no
      # long-lived per-head vreg values.
      ctx_scr[:, :, sl] = jnp.einsum("bqk,bkd->bqd", p.astype(bf16), v3[:, :, sl],
                                     preferred_element_type=jnp.float32)
    ctx2 = ctx_scr[...].reshape(Bb * T, H)
    return jnp.dot(ctx2.astype(bf16), wo_ref[...],
                   preferred_element_type=jnp.float32) + bo_ref[...]

  # ---- self-attention block (pre-norm LN + residual fused) ----
  xn = layer_norm(x2, lng_ref[0:1, :], lnb_ref[0:1, :])
  qkv = jnp.dot(xn.astype(bf16), wqkv_s_ref[...],
                preferred_element_type=jnp.float32) + bqkv_s_ref[...]
  h1 = attend(qkv[:, :H], qkv[:, H:2 * H], qkv[:, 2 * H:], cbias_scr[...],
              wo_s_ref, bo_s_ref) + x2

  # ---- cross-attention block ----
  h1n = layer_norm(h1, lng_ref[1:2, :], lnb_ref[1:2, :])
  q_c = jnp.dot(h1n.astype(bf16), wq_c_ref[...],
                preferred_element_type=jnp.float32) + bq_c_ref[...]
  kv = jnp.dot(enc_ref[...], wkv_c_ref[...],          # enc already bf16 (pre-cast)
               preferred_element_type=jnp.float32) + bkv_c_ref[...]
  h2 = attend(q_c, kv[:, :H], kv[:, H:], srcbias_ref[...],
              wo_c_ref, bo_c_ref) + h1

  # ---- position-wise feed-forward block (its own pre-norm LN + residual) ----
  h2n = layer_norm(h2, lng_ref[2:3, :], lnb_ref[2:3, :])
  ff = jnp.maximum(jnp.dot(h2n.astype(bf16), w1_ref[...],
                           preferred_element_type=jnp.float32) + b1_ref[...], 0.0)
  x_new = jnp.dot(ff.astype(bf16), w2_ref[...],
                  preferred_element_type=jnp.float32) + b2_ref[...] + h2

  x_scr[...] = x_new                                   # carry to next layer

  # ---- final LayerNorm + output projection, only on the last layer step ----
  @pl.when(l == nl - 1)
  def _finalize():
    xf = layer_norm(x_new, lnf_g_ref[...], lnf_b_ref[...])
    xfin_ref[...] = xf.astype(xfin_ref.dtype)
    out_ref[...] = jnp.dot(xf.astype(bf16), wout_ref[...],
                           preferred_element_type=jnp.float32).astype(out_ref.dtype)


# ----------------------------- wrapper / pallas_call ---------------------------------

def positional_encoding(T, H):
  pos = jnp.arange(T, dtype=jnp.float32)[:, None]
  div = jnp.exp(jnp.arange(0, H, 2, dtype=jnp.float32) * -(math.log(10000.0) / H))
  pe = jnp.zeros((T, H), jnp.float32)
  pe = pe.at[:, 0::2].set(jnp.sin(pos * div))
  pe = pe.at[:, 1::2].set(jnp.cos(pos * div))
  return pe


def _round_up(x, m):
  return ((x + m - 1) // m) * m


def pallas_facs_decoder(trg_embed, encoder_output, src_mask, trg_mask, packed, *,
                        num_heads, b_block=None):
  assert trg_mask is not None, "trg_mask required for Transformer"
  B, T, H = trg_embed.shape
  S = encoder_output.shape[1]
  L = packed["wqkv_s"].shape[0]
  F = packed["w1"].shape[2]
  V = packed["wout"].shape[1]
  assert H % num_heads == 0

  # Batch block: amortizes per-layer weight DMA over B_blk rows while keeping >=2
  # parallel grid blocks (megacore / dual-TC) whenever B >= 2.
  if b_block is None:
    b_block = B // 2 if (B >= 2 and B % 2 == 0) else 1
  assert B % b_block == 0
  num_bb = B // b_block

  pe = positional_encoding(T, H)                                   # (T, H) f32
  enc2d = encoder_output.reshape(B * S, H).astype(jnp.bfloat16)    # pre-cast to bf16
  src_bias = (1.0 - src_mask.reshape(B, 1, S).astype(jnp.float32)) * -1e30

  Vp = _round_up(V, 128)                                           # lane-dense logits
  wout_p = jnp.pad(packed["wout"], ((0, 0), (0, Vp - V)))

  b_map3 = lambda bb, l: (bb, 0, 0)      # per-batch-block slabs
  b_map2 = lambda bb, l: (bb, 0)
  l_map3 = lambda bb, l: (l, 0, 0)       # per-layer stacked weights
  c_map2 = lambda bb, l: (0, 0)          # constants (PE, final LN, output projection)

  # (array, block_shape, index_map) — specs and the VMEM footprint derive from this.
  inputs = [
      (trg_embed.astype(jnp.float32), (b_block, T, H), b_map3),
      (pe, (T, H), c_map2),
      (enc2d, (b_block * S, H), b_map2),
      (src_bias, (b_block, 1, S), b_map3),
      (packed["wqkv_s"], (None, H, 3 * H), l_map3),
      (packed["bqkv_s"], (None, 1, 3 * H), l_map3),
      (packed["wo_s"], (None, H, H), l_map3),
      (packed["bo_s"], (None, 1, H), l_map3),
      (packed["wq_c"], (None, H, H), l_map3),
      (packed["bq_c"], (None, 1, H), l_map3),
      (packed["wkv_c"], (None, H, 2 * H), l_map3),
      (packed["bkv_c"], (None, 1, 2 * H), l_map3),
      (packed["wo_c"], (None, H, H), l_map3),
      (packed["bo_c"], (None, 1, H), l_map3),
      (packed["w1"], (None, H, F), l_map3),
      (packed["b1"], (None, 1, F), l_map3),
      (packed["w2"], (None, F, H), l_map3),
      (packed["b2"], (None, 1, H), l_map3),
      (packed["ln_g"], (None, 3, H), l_map3),
      (packed["ln_b"], (None, 3, H), l_map3),
      (packed["lnf_g"], (1, H), c_map2),
      (packed["lnf_b"], (1, H), c_map2),
      (wout_p, (H, Vp), c_map2),
  ]
  in_specs = [pl.BlockSpec(bs, im) for _, bs, im in inputs]
  args = [a for a, _, _ in inputs]

  out_specs = [
      pl.BlockSpec((b_block * T, Vp), b_map2),     # logits (lane-dense, padded V)
      pl.BlockSpec((b_block * T, H), b_map2),      # final hidden state x
  ]

  # VMEM budget: double-buffered pipelined blocks + scratch + compiler headroom.
  def blk_bytes(block_shape, itemsize):
    n = 1
    for d in block_shape:
      if d is not None:
        n *= d
    return n * itemsize
  pipelined = sum(blk_bytes(bs, a.dtype.itemsize) for a, bs, _ in inputs)
  pipelined += blk_bytes((b_block * T, Vp), 4) + blk_bytes((b_block * T, H), 4)
  scratch_b = (b_block * T * H + b_block * T * H + T * T) * 4
  vmem_limit = int(min(128 << 20, max(32 << 20, 2 * pipelined + scratch_b + (4 << 20))))

  kernel = functools.partial(_decoder_stack_kernel, num_heads=num_heads)
  out2d, xfin2d = pl.pallas_call(
      kernel,
      out_shape=(jax.ShapeDtypeStruct((B * T, Vp), jnp.float32),
                 jax.ShapeDtypeStruct((B * T, H), jnp.float32)),
      grid_spec=pltpu.PrefetchScalarGridSpec(
          num_scalar_prefetch=0,
          grid=(num_bb, L),                        # layers innermost: x carried in VMEM
          in_specs=in_specs,
          out_specs=out_specs,
          scratch_shapes=[pltpu.VMEM((b_block * T, H), jnp.float32),   # residual x
                          pltpu.VMEM((b_block, T, H), jnp.float32),    # attn context
                          pltpu.VMEM((T, T), jnp.float32)]),           # causal bias
      compiler_params=pltpu.CompilerParams(
          dimension_semantics=("parallel", "arbitrary"),
          vmem_limit_bytes=vmem_limit),
  )(*args)

  output = out2d.reshape(B, T, Vp)[:, :, :V]
  x_final = xfin2d.reshape(B, T, H)
  return output, x_final, None, None


# ----------------------------- parameter packing -------------------------------------

def pack_params(params, w_dtype=jnp.bfloat16):
  """Stack per-layer params to [L, ...], fuse QKV/KV weights, cast weights to bf16."""
  layers = params["layers"]

  def stack(fn, dtype=None):
    a = jnp.stack([fn(lp) for lp in layers], axis=0)
    return a.astype(dtype) if dtype is not None else a

  cat_cols = lambda *xs: jnp.concatenate(xs, axis=1)
  cat_vec = lambda *xs: jnp.concatenate(xs, axis=0)[None, :]

  return dict(
      wqkv_s=stack(lambda lp: cat_cols(lp["self"]["wq"], lp["self"]["wk"], lp["self"]["wv"]), w_dtype),
      bqkv_s=stack(lambda lp: cat_vec(lp["self"]["bq"], lp["self"]["bk"], lp["self"]["bv"])),
      wo_s=stack(lambda lp: lp["self"]["wo"], w_dtype),
      bo_s=stack(lambda lp: lp["self"]["bo"][None, :]),
      wq_c=stack(lambda lp: lp["cross"]["wq"], w_dtype),
      bq_c=stack(lambda lp: lp["cross"]["bq"][None, :]),
      wkv_c=stack(lambda lp: cat_cols(lp["cross"]["wk"], lp["cross"]["wv"]), w_dtype),
      bkv_c=stack(lambda lp: cat_vec(lp["cross"]["bk"], lp["cross"]["bv"])),
      wo_c=stack(lambda lp: lp["cross"]["wo"], w_dtype),
      bo_c=stack(lambda lp: lp["cross"]["bo"][None, :]),
      w1=stack(lambda lp: lp["w1"], w_dtype),
      b1=stack(lambda lp: lp["b1"][None, :]),
      w2=stack(lambda lp: lp["w2"], w_dtype),
      b2=stack(lambda lp: lp["b2"][None, :]),
      ln_g=stack(lambda lp: jnp.stack([lp["ln1_g"], lp["ln2_g"], lp["ln3_g"]], 0)),
      ln_b=stack(lambda lp: jnp.stack([lp["ln1_b"], lp["ln2_b"], lp["ln3_b"]], 0)),
      lnf_g=params["lnf_g"][None, :],
      lnf_b=params["lnf_b"][None, :],
      wout=params["wout"].astype(w_dtype),
  )


# ----------------------------- pure-JAX f32 reference (verification) -----------------

def reference_facs_decoder(trg_embed, encoder_output, src_mask, params, *, num_heads):
  B, T, H = trg_embed.shape
  S = encoder_output.shape[1]
  hd = H // num_heads

  def ln(x, g, b):
    mu = x.mean(-1, keepdims=True)
    xc = x - mu
    var = (xc * xc).mean(-1, keepdims=True)
    return xc * jax.lax.rsqrt(var + 1e-6) * g + b

  def attn(q_in, kv_in, mask, p):
    q = q_in @ p["wq"] + p["bq"]
    k = kv_in @ p["wk"] + p["bk"]
    v = kv_in @ p["wv"] + p["bv"]
    split = lambda t: t.reshape(t.shape[0], t.shape[1], num_heads, hd).transpose(0, 2, 1, 3)
    qh, kh, vh = split(q / math.sqrt(hd)), split(k), split(v)
    s = jnp.einsum("bhqd,bhkd->bhqk", qh, kh)
    s = jnp.where(mask[:, None] > 0, s, -1e30)
    a = jax.nn.softmax(s, axis=-1)
    ctx = jnp.einsum("bhqk,bhkd->bhqd", a, vh)
    ctx = ctx.transpose(0, 2, 1, 3).reshape(q_in.shape[0], q_in.shape[1], H)
    return ctx @ p["wo"] + p["bo"]

  x = trg_embed + positional_encoding(T, H)[None]
  sub = jnp.tril(jnp.ones((T, T), jnp.float32))
  self_mask = jnp.broadcast_to(sub[None], (B, T, T))
  cross_mask = jnp.broadcast_to(src_mask.astype(jnp.float32).reshape(B, 1, S), (B, T, S))

  for lp in params["layers"]:
    xn = ln(x, lp["ln1_g"], lp["ln1_b"])
    h1 = attn(xn, xn, self_mask, lp["self"]) + x
    h2 = attn(ln(h1, lp["ln2_g"], lp["ln2_b"]), encoder_output, cross_mask, lp["cross"]) + h1
    z = ln(h2, lp["ln3_g"], lp["ln3_b"])
    x = jnp.maximum(z @ lp["w1"] + lp["b1"], 0.0) @ lp["w2"] + lp["b2"] + h2

  x = ln(x, params["lnf_g"], params["lnf_b"])
  return x @ params["wout"], x


# ----------------------------- deterministic parameter init --------------------------

def init_params(key, num_layers, H, F, V):
  ks = iter(jax.random.split(key, num_layers * 20 + 1))

  def w(din, dout):
    return jax.random.normal(next(ks), (din, dout), jnp.float32) * 0.05

  def b(d):
    return jax.random.normal(next(ks), (d,), jnp.float32) * 0.02

  def attn_p():
    return dict(wq=w(H, H), bq=b(H), wk=w(H, H), bk=b(H),
                wv=w(H, H), bv=b(H), wo=w(H, H), bo=b(H))

  layers = []
  for _ in range(num_layers):
    layers.append(dict(
        ln1_g=jnp.ones((H,), jnp.float32), ln1_b=jnp.zeros((H,), jnp.float32),
        ln2_g=jnp.ones((H,), jnp.float32), ln2_b=jnp.zeros((H,), jnp.float32),
        ln3_g=jnp.ones((H,), jnp.float32), ln3_b=jnp.zeros((H,), jnp.float32),
        self=attn_p(), cross=attn_p(),
        w1=w(H, F), b1=b(F), w2=w(F, H), b2=b(H)))
  return dict(layers=layers,
              lnf_g=jnp.ones((H,), jnp.float32), lnf_b=jnp.zeros((H,), jnp.float32),
              wout=w(H, V))


# ----------------------------- main ---------------------------------------------------

if __name__ == "__main__":
  B, T_trg, T_src = 4, 8, 8
  H, F, V = 32, 64, 16              # hidden_size, ff_size, trg_size (small synthetic config)
  num_layers, num_heads = 2, 4

  key = jax.random.PRNGKey(0)
  k1, k2, k3 = jax.random.split(key, 3)
  trg_embed = jax.random.normal(k1, (B, T_trg, H), jnp.float32)
  encoder_output = jax.random.normal(k2, (B, T_src, H), jnp.float32)
  src_lens = jnp.array([T_src, T_src, T_src - 2, T_src - 3])
  src_mask = jnp.arange(T_src)[None, None, :] < src_lens[:, None, None]   # (B,1,S) bool
  trg_mask = jnp.ones((B, 1, T_trg), jnp.bool_)   # 3-D mask => padding_mask=None path
  params = init_params(k3, num_layers, H, F, V)
  packed = pack_params(params)

  output, x_final, _, _ = pallas_facs_decoder(
      trg_embed, encoder_output, src_mask, trg_mask, packed, num_heads=num_heads)
  output = jax.block_until_ready(output)
  x_final = jax.block_until_ready(x_final)

  ref_out, ref_x = reference_facs_decoder(
      trg_embed, encoder_output, src_mask, params, num_heads=num_heads)

  assert output.shape == (B, T_trg, V) and x_final.shape == (B, T_trg, H)
  assert bool(jnp.all(jnp.isfinite(output)))
  # bf16 matmul operands with f32 accumulation -> slightly looser tolerance than pure f32
  assert jnp.allclose(output, ref_out, atol=5e-2, rtol=5e-2), \
      float(jnp.max(jnp.abs(output - ref_out)))
  assert jnp.allclose(x_final, ref_x, atol=5e-2, rtol=5e-2), \
      float(jnp.max(jnp.abs(x_final - ref_x)))
  print("KERNEL_OK")
</pallas_src>

<mosaic_0001>
module attributes {stable_mosaic.version = 11 : i64} {
  func.func @_decoder_stack_kernel(%arg0: i32, %arg1: i32, %arg2: memref<2x8x32xf32, #tpu.memory_space<vmem>>, %arg3: memref<8x32xf32, #tpu.memory_space<vmem>>, %arg4: memref<16x32xbf16, #tpu.memory_space<vmem>>, %arg5: memref<2x1x8xf32, #tpu.memory_space<vmem>>, %arg6: memref<1x32x96xbf16, #tpu.memory_space<vmem>>, %arg7: memref<1x1x96xf32, #tpu.memory_space<vmem>>, %arg8: memref<1x32x32xbf16, #tpu.memory_space<vmem>>, %arg9: memref<1x1x32xf32, #tpu.memory_space<vmem>>, %arg10: memref<1x32x32xbf16, #tpu.memory_space<vmem>>, %arg11: memref<1x1x32xf32, #tpu.memory_space<vmem>>, %arg12: memref<1x32x64xbf16, #tpu.memory_space<vmem>>, %arg13: memref<1x1x64xf32, #tpu.memory_space<vmem>>, %arg14: memref<1x32x32xbf16, #tpu.memory_space<vmem>>, %arg15: memref<1x1x32xf32, #tpu.memory_space<vmem>>, %arg16: memref<1x32x64xbf16, #tpu.memory_space<vmem>>, %arg17: memref<1x1x64xf32, #tpu.memory_space<vmem>>, %arg18: memref<1x64x32xbf16, #tpu.memory_space<vmem>>, %arg19: memref<1x1x32xf32, #tpu.memory_space<vmem>>, %arg20: memref<1x3x32xf32, #tpu.memory_space<vmem>>, %arg21: memref<1x3x32xf32, #tpu.memory_space<vmem>>, %arg22: memref<1x32xf32, #tpu.memory_space<vmem>>, %arg23: memref<1x32xf32, #tpu.memory_space<vmem>>, %arg24: memref<32x128xbf16, #tpu.memory_space<vmem>>, %arg25: memref<16x128xf32, #tpu.memory_space<vmem>>, %arg26: memref<16x32xf32, #tpu.memory_space<vmem>>, %arg27: memref<16x32xf32, #tpu.memory_space<vmem>>, %arg28: memref<2x8x32xf32, #tpu.memory_space<vmem>>, %arg29: memref<8x8xf32, #tpu.memory_space<vmem>>) attributes {dimension_semantics = [#tpu.dimension_semantics<parallel>, #tpu.dimension_semantics<arbitrary>], iteration_bounds = array<i64: 2, 2>, scalar_prefetch = 0 : i64, scratch_operands = 3 : i64, tpu.core_type = #tpu.core_type<tc>, window_params = [{transform_indices = @transform_0, window_bounds = array<i64: 2, 8, 32>}, {pipeline_mode = #tpu.pipeline_mode<synchronous>, transform_indices = @transform_1, window_bounds = array<i64: 8, 32>}, {transform_indices = @transform_2, window_bounds = array<i64: 16, 32>}, {transform_indices = @transform_3, window_bounds = array<i64: 2, 1, 8>}, {transform_indices = @transform_4, window_bounds = array<i64: 1, 32, 96>}, {transform_indices = @transform_5, window_bounds = array<i64: 1, 1, 96>}, {transform_indices = @transform_6, window_bounds = array<i64: 1, 32, 32>}, {transform_indices = @transform_7, window_bounds = array<i64: 1, 1, 32>}, {transform_indices = @transform_8, window_bounds = array<i64: 1, 32, 32>}, {transform_indices = @transform_9, window_bounds = array<i64: 1, 1, 32>}, {transform_indices = @transform_10, window_bounds = array<i64: 1, 32, 64>}, {transform_indices = @transform_11, window_bounds = array<i64: 1, 1, 64>}, {transform_indices = @transform_12, window_bounds = array<i64: 1, 32, 32>}, {transform_indices = @transform_13, window_bounds = array<i64: 1, 1, 32>}, {transform_indices = @transform_14, window_bounds = array<i64: 1, 32, 64>}, {transform_indices = @transform_15, window_bounds = array<i64: 1, 1, 64>}, {transform_indices = @transform_16, window_bounds = array<i64: 1, 64, 32>}, {transform_indices = @transform_17, window_bounds = array<i64: 1, 1, 32>}, {transform_indices = @transform_18, window_bounds = array<i64: 1, 3, 32>}, {transform_indices = @transform_19, window_bounds = array<i64: 1, 3, 32>}, {pipeline_mode = #tpu.pipeline_mode<synchronous>, transform_indices = @transform_20, window_bounds = array<i64: 1, 32>}, {pipeline_mode = #tpu.pipeline_mode<synchronous>, transform_indices = @transform_21, window_bounds = array<i64: 1, 32>}, {pipeline_mode = #tpu.pipeline_mode<synchronous>, transform_indices = @transform_22, window_bounds = array<i64: 32, 128>}, {transform_indices = @transform_23, window_bounds = array<i64: 16, 128>}, {transform_indices = @transform_24, window_bounds = array<i64: 16, 32>}]} {
    %c0_i32 = arith.constant 0 : i32
    %0 = arith.cmpi eq, %arg1, %c0_i32 : i32
    %1 = arith.extui %0 : i1 to i32
    %c0_i32_0 = arith.constant 0 : i32
    %2 = arith.cmpi ne, %1, %c0_i32_0 : i32
    scf.if %2 {
      %c0_153 = arith.constant 0 : index
      %c0_154 = arith.constant 0 : index
      %c0_155 = arith.constant 0 : index
      %324 = vector.load %arg2[%c0_153, %c0_154, %c0_155] : memref<2x8x32xf32, #tpu.memory_space<vmem>>, vector<2x8x32xf32>
      %c0_156 = arith.constant 0 : index
      %c0_157 = arith.constant 0 : index
      %325 = vector.load %arg3[%c0_156, %c0_157] : memref<8x32xf32, #tpu.memory_space<vmem>>, vector<8x32xf32>
      %326 = vector.shape_cast %325 : vector<8x32xf32> to vector<1x8x32xf32>
      %327 = vector.broadcast %326 : vector<1x8x32xf32> to vector<2x8x32xf32>
      %328 = arith.addf %324, %327 : vector<2x8x32xf32>
      %329 = vector.shape_cast %328 : vector<2x8x32xf32> to vector<16x32xf32>
      %c0_158 = arith.constant 0 : index
      %c0_159 = arith.constant 0 : index
      %330 = vector.load %arg27[%c0_158, %c0_159] : memref<16x32xf32, #tpu.memory_space<vmem>>, vector<16x32xf32>
      tpu.vector_store %arg27[%c0_158, %c0_159], %329 {strides = array<i32>} : memref<16x32xf32, #tpu.memory_space<vmem>>, vector<16x32xf32>,
      %331 = tpu.iota {dimensions = array<i32: 0>} : vector<8x8xi32>
      %332 = tpu.iota {dimensions = array<i32: 1>} : vector<8x8xi32>
      %333 = arith.cmpi sge, %331, %332 : vector<8x8xi32>
      %cst_160 = arith.constant 0.000000e+00 : f32
      %cst_161 = arith.constant -1.000000e+30 : f32
      %334 = vector.broadcast %cst_160 : f32 to vector<8x8xf32>
      %335 = vector.broadcast %cst_161 : f32 to vector<8x8xf32>
      %336 = arith.select %333, %334, %335 : vector<8x8xi1>, vector<8x8xf32>
      %c0_162 = arith.constant 0 : index
      %c0_163 = arith.constant 0 : index
      %337 = vector.load %arg29[%c0_162, %c0_163] : memref<8x8xf32, #tpu.memory_space<vmem>>, vector<8x8xf32>
      tpu.vector_store %arg29[%c0_162, %c0_163], %336 {strides = array<i32>} : memref<8x8xf32, #tpu.memory_space<vmem>>, vector<8x8xf32>,
    } else {
    }
    %c0 = arith.constant 0 : index
    %c0_1 = arith.constant 0 : index
    %3 = vector.load %arg27[%c0, %c0_1] : memref<16x32xf32, #tpu.memory_space<vmem>>, vector<16x32xf32>
    %c0_2 = arith.constant 0 : index
    %c0_3 = arith.constant 0 : index
    %c0_4 = arith.constant 0 : index
    %4 = vector.load %arg20[%c0_2, %c0_3, %c0_4] : memref<1x3x32xf32, #tpu.memory_space<vmem>>, vector<1x1x32xf32>
    %5 = vector.shape_cast %4 : vector<1x1x32xf32> to vector<1x32xf32>
    %c0_5 = arith.constant 0 : index
    %c0_6 = arith.constant 0 : index
    %c0_7 = arith.constant 0 : index
    %6 = vector.load %arg21[%c0_5, %c0_6, %c0_7] : memref<1x3x32xf32, #tpu.memory_space<vmem>>, vector<1x1x32xf32>
    %7 = vector.shape_cast %6 : vector<1x1x32xf32> to vector<1x32xf32>
    %cst = arith.constant dense<0.000000e+00> : vector<16xf32>
    %8 = vector.multi_reduction <add>, %3, %cst [1] : vector<16x32xf32> to vector<16xf32>
    %9 = vector.shape_cast %8 : vector<16xf32> to vector<16x1xf32>
    %cst_8 = arith.constant 3.200000e+01 : f32
    %10 = vector.broadcast %cst_8 : f32 to vector<16x1xf32>
    %11 = arith.divf %9, %10 : vector<16x1xf32>
    %12 = vector.broadcast %11 : vector<16x1xf32> to vector<16x32xf32>
    %13 = arith.subf %3, %12 : vector<16x32xf32>
    %14 = arith.mulf %13, %13 : vector<16x32xf32>
    %cst_9 = arith.constant dense<0.000000e+00> : vector<16xf32>
    %15 = vector.multi_reduction <add>, %14, %cst_9 [1] : vector<16x32xf32> to vector<16xf32>
    %16 = vector.shape_cast %15 : vector<16xf32> to vector<16x1xf32>
    %cst_10 = arith.constant 3.200000e+01 : f32
    %17 = vector.broadcast %cst_10 : f32 to vector<16x1xf32>
    %18 = arith.divf %16, %17 : vector<16x1xf32>
    %cst_11 = arith.constant 9.99999997E-7 : f32
    %19 = vector.broadcast %cst_11 : f32 to vector<16x1xf32>
    %20 = arith.addf %18, %19 : vector<16x1xf32>
    %21 = math.rsqrt %20 : vector<16x1xf32>
    %22 = vector.broadcast %21 : vector<16x1xf32> to vector<16x32xf32>
    %23 = arith.mulf %13, %22 : vector<16x32xf32>
    %24 = vector.broadcast %5 : vector<1x32xf32> to vector<16x32xf32>
    %25 = arith.mulf %23, %24 : vector<16x32xf32>
    %26 = vector.broadcast %7 : vector<1x32xf32> to vector<16x32xf32>
    %27 = arith.addf %25, %26 : vector<16x32xf32>
    %28 = arith.truncf %27 : vector<16x32xf32> to vector<16x32xbf16>
    %c0_12 = arith.constant 0 : index
    %c0_13 = arith.constant 0 : index
    %c0_14 = arith.constant 0 : index
    %29 = vector.load %arg6[%c0_12, %c0_13, %c0_14] : memref<1x32x96xbf16, #tpu.memory_space<vmem>>, vector<1x32x96xbf16>
    %30 = vector.shape_cast %29 : vector<1x32x96xbf16> to vector<32x96xbf16>
    %cst_15 = arith.constant dense<0.000000e+00> : vector<16x96xf32>
    %31 = tpu.matmul %28, %30, %cst_15 {dimension_numbers = #tpu.dot_dimension_numbers<[1], [0], [0], [1], [0, 0, 1, 1], [], []>} : vector<16x32xbf16>, vector<32x96xbf16>, vector<16x96xf32> -> vector<16x96xf32>
    %c0_16 = arith.constant 0 : index
    %c0_17 = arith.constant 0 : index
    %c0_18 = arith.constant 0 : index
    %32 = vector.load %arg7[%c0_16, %c0_17, %c0_18] : memref<1x1x96xf32, #tpu.memory_space<vmem>>, vector<1x1x96xf32>
    %33 = vector.shape_cast %32 : vector<1x1x96xf32> to vector<1x96xf32>
    %34 = vector.broadcast %33 : vector<1x96xf32> to vector<16x96xf32>
    %35 = arith.addf %31, %34 : vector<16x96xf32>
    %36 = vector.extract_strided_slice %35 {offsets = [0, 0], sizes = [16, 32], strides = [1, 1]} : vector<16x96xf32> to vector<16x32xf32>
    %37 = vector.extract_strided_slice %35 {offsets = [0, 32], sizes = [16, 32], strides = [1, 1]} : vector<16x96xf32> to vector<16x32xf32>
    %38 = vector.extract_strided_slice %35 {offsets = [0, 64], sizes = [16, 32], strides = [1, 1]} : vector<16x96xf32> to vector<16x32xf32>
    %c0_19 = arith.constant 0 : index
    %c0_20 = arith.constant 0 : index
    %39 = vector.load %arg29[%c0_19, %c0_20] : memref<8x8xf32, #tpu.memory_space<vmem>>, vector<8x8xf32>
    %cst_21 = arith.constant 0.353553385 : f32
    %40 = vector.broadcast %cst_21 : f32 to vector<16x32xf32>
    %41 = arith.mulf %36, %40 : vector<16x32xf32>
    %42 = vector.shape_cast %41 : vector<16x32xf32> to vector<2x8x32xf32>
    %43 = arith.truncf %42 : vector<2x8x32xf32> to vector<2x8x32xbf16>
    %44 = vector.shape_cast %37 : vector<16x32xf32> to vector<2x8x32xf32>
    %45 = arith.truncf %44 : vector<2x8x32xf32> to vector<2x8x32xbf16>
    %46 = vector.shape_cast %38 : vector<16x32xf32> to vector<2x8x32xf32>
    %47 = arith.truncf %46 : vector<2x8x32xf32> to vector<2x8x32xbf16>
    %48 = vector.extract_strided_slice %43 {offsets = [0, 0, 0], sizes = [2, 8, 8], strides = [1, 1, 1]} : vector<2x8x32xbf16> to vector<2x8x8xbf16>
    %49 = vector.extract_strided_slice %45 {offsets = [0, 0, 0], sizes = [2, 8, 8], strides = [1, 1, 1]} : vector<2x8x32xbf16> to vector<2x8x8xbf16>
    "tpu.trace_start"() <{level = 10 : i32, message = "bqd,bkd->bqk"}> : () -> ()
    %cst_22 = arith.constant dense<0.000000e+00> : vector<2x8x8xf32>
    %50 = tpu.matmul %48, %49, %cst_22 {dimension_numbers = #tpu.dot_dimension_numbers<[2], [2], [1], [1], [0, 0, 0, 1, 1, 1], [0], [0]>} : vector<2x8x8xbf16>, vector<2x8x8xbf16>, vector<2x8x8xf32> -> vector<2x8x8xf32>
    "tpu.trace_stop"() : () -> ()
    %51 = vector.shape_cast %39 : vector<8x8xf32> to vector<1x8x8xf32>
    %52 = vector.broadcast %51 : vector<1x8x8xf32> to vector<2x8x8xf32>
    %53 = arith.addf %50, %52 : vector<2x8x8xf32>
    %cst_23 = arith.constant dense<0xFF800000> : vector<2x8xf32>
    %54 = vector.multi_reduction <maximumf>, %53, %cst_23 [2] : vector<2x8x8xf32> to vector<2x8xf32>
    %55 = vector.shape_cast %54 : vector<2x8xf32> to vector<2x8x1xf32>
    %56 = vector.broadcast %55 : vector<2x8x1xf32> to vector<2x8x8xf32>
    %57 = arith.subf %53, %56 : vector<2x8x8xf32>
    %58 = math.exp %57 : vector<2x8x8xf32>
    %cst_24 = arith.constant dense<0.000000e+00> : vector<2x8xf32>
    %59 = vector.multi_reduction <add>, %58, %cst_24 [2] : vector<2x8x8xf32> to vector<2x8xf32>
    %60 = vector.shape_cast %59 : vector<2x8xf32> to vector<2x8x1xf32>
    %61 = tpu.reciprocal %60 {approx = true} : vector<2x8x1xf32> -> vector<2x8x1xf32>
    %62 = vector.broadcast %61 : vector<2x8x1xf32> to vector<2x8x8xf32>
    %63 = arith.mulf %58, %62 : vector<2x8x8xf32>
    %64 = arith.truncf %63 : vector<2x8x8xf32> to vector<2x8x8xbf16>
    %65 = vector.extract_strided_slice %47 {offsets = [0, 0, 0], sizes = [2, 8, 8], strides = [1, 1, 1]} : vector<2x8x32xbf16> to vector<2x8x8xbf16>
    "tpu.trace_start"() <{level = 10 : i32, message = "bqk,bkd->bqd"}> : () -> ()
    %cst_25 = arith.constant dense<0.000000e+00> : vector<2x8x8xf32>
    %66 = tpu.matmul %64, %65, %cst_25 {dimension_numbers = #tpu.dot_dimension_numbers<[2], [1], [1], [2], [0, 0, 0, 1, 1, 2], [0], [0]>} : vector<2x8x8xbf16>, vector<2x8x8xbf16>, vector<2x8x8xf32> -> vector<2x8x8xf32>
    "tpu.trace_stop"() : () -> ()
    %c0_26 = arith.constant 0 : index
    %c0_27 = arith.constant 0 : index
    %c0_28 = arith.constant 0 : index
    %67 = vector.load %arg28[%c0_26, %c0_27, %c0_28] : memref<2x8x32xf32, #tpu.memory_space<vmem>>, vector<2x8x8xf32>
    tpu.vector_store %arg28[%c0_26, %c0_27, %c0_28], %66 {strides = array<i32>} : memref<2x8x32xf32, #tpu.memory_space<vmem>>, vector<2x8x8xf32>,
    %68 = vector.extract_strided_slice %43 {offsets = [0, 0, 8], sizes = [2, 8, 8], strides = [1, 1, 1]} : vector<2x8x32xbf16> to vector<2x8x8xbf16>
    %69 = vector.extract_strided_slice %45 {offsets = [0, 0, 8], sizes = [2, 8, 8], strides = [1, 1, 1]} : vector<2x8x32xbf16> to vector<2x8x8xbf16>
    "tpu.trace_start"() <{level = 10 : i32, message = "bqd,bkd->bqk"}> : () -> ()
    %cst_29 = arith.constant dense<0.000000e+00> : vector<2x8x8xf32>
    %70 = tpu.matmul %68, %69, %cst_29 {dimension_numbers = #tpu.dot_dimension_numbers<[2], [2], [1], [1], [0, 0, 0, 1, 1, 1], [0], [0]>} : vector<2x8x8xbf16>, vector<2x8x8xbf16>, vector<2x8x8xf32> -> vector<2x8x8xf32>
    "tpu.trace_stop"() : () -> ()
    %71 = vector.shape_cast %39 : vector<8x8xf32> to vector<1x8x8xf32>
    %72 = vector.broadcast %71 : vector<1x8x8xf32> to vector<2x8x8xf32>
    %73 = arith.addf %70, %72 : vector<2x8x8xf32>
    %cst_30 = arith.constant dense<0xFF800000> : vector<2x8xf32>
    %74 = vector.multi_reduction <maximumf>, %73, %cst_30 [2] : vector<2x8x8xf32> to vector<2x8xf32>
    %75 = vector.shape_cast %74 : vector<2x8xf32> to vector<2x8x1xf32>
    %76 = vector.broadcast %75 : vector<2x8x1xf32> to vector<2x8x8xf32>
    %77 = arith.subf %73, %76 : vector<2x8x8xf32>
    %78 = math.exp %77 : vector<2x8x8xf32>
    %cst_31 = arith.constant dense<0.000000e+00> : vector<2x8xf32>
    %79 = vector.multi_reduction <add>, %78, %cst_31 [2] : vector<2x8x8xf32> to vector<2x8xf32>
    %80 = vector.shape_cast %79 : vector<2x8xf32> to vector<2x8x1xf32>
    %81 = tpu.reciprocal %80 {approx = true} : vector<2x8x1xf32> -> vector<2x8x1xf32>
    %82 = vector.broadcast %81 : vector<2x8x1xf32> to vector<2x8x8xf32>
    %83 = arith.mulf %78, %82 : vector<2x8x8xf32>
    %84 = arith.truncf %83 : vector<2x8x8xf32> to vector<2x8x8xbf16>
    %85 = vector.extract_strided_slice %47 {offsets = [0, 0, 8], sizes = [2, 8, 8], strides = [1, 1, 1]} : vector<2x8x32xbf16> to vector<2x8x8xbf16>
    "tpu.trace_start"() <{level = 10 : i32, message = "bqk,bkd->bqd"}> : () -> ()
    %cst_32 = arith.constant dense<0.000000e+00> : vector<2x8x8xf32>
    %86 = tpu.matmul %84, %85, %cst_32 {dimension_numbers = #tpu.dot_dimension_numbers<[2], [1], [1], [2], [0, 0, 0, 1, 1, 2], [0], [0]>} : vector<2x8x8xbf16>, vector<2x8x8xbf16>, vector<2x8x8xf32> -> vector<2x8x8xf32>
    "tpu.trace_stop"() : () -> ()
    %c0_33 = arith.constant 0 : index
    %c0_34 = arith.constant 0 : index
    %c8 = arith.constant 8 : index
    %87 = vector.load %arg28[%c0_33, %c0_34, %c8] : memref<2x8x32xf32, #tpu.memory_space<vmem>>, vector<2x8x8xf32>
    tpu.vector_store %arg28[%c0_33, %c0_34, %c8], %86 {strides = array<i32>} : memref<2x8x32xf32, #tpu.memory_space<vmem>>, vector<2x8x8xf32>,
    %88 = vector.extract_strided_slice %43 {offsets = [0, 0, 16], sizes = [2, 8, 8], strides = [1, 1, 1]} : vector<2x8x32xbf16> to vector<2x8x8xbf16>
    %89 = vector.extract_strided_slice %45 {offsets = [0, 0, 16], sizes = [2, 8, 8], strides = [1, 1, 1]} : vector<2x8x32xbf16> to vector<2x8x8xbf16>
    "tpu.trace_start"() <{level = 10 : i32, message = "bqd,bkd->bqk"}> : () -> ()
    %cst_35 = arith.constant dense<0.000000e+00> : vector<2x8x8xf32>
    %90 = tpu.matmul %88, %89, %cst_35 {dimension_numbers = #tpu.dot_dimension_numbers<[2], [2], [1], [1], [0, 0, 0, 1, 1, 1], [0], [0]>} : vector<2x8x8xbf16>, vector<2x8x8xbf16>, vector<2x8x8xf32> -> vector<2x8x8xf32>
    "tpu.trace_stop"() : () -> ()
    %91 = vector.shape_cast %39 : vector<8x8xf32> to vector<1x8x8xf32>
    %92 = vector.broadcast %91 : vector<1x8x8xf32> to vector<2x8x8xf32>
    %93 = arith.addf %90, %92 : vector<2x8x8xf32>
    %cst_36 = arith.constant dense<0xFF800000> : vector<2x8xf32>
    %94 = vector.multi_reduction <maximumf>, %93, %cst_36 [2] : vector<2x8x8xf32> to vector<2x8xf32>
    %95 = vector.shape_cast %94 : vector<2x8xf32> to vector<2x8x1xf32>
    %96 = vector.broadcast %95 : vector<2x8x1xf32> to vector<2x8x8xf32>
    %97 = arith.subf %93, %96 : vector<2x8x8xf32>
    %98 = math.exp %97 : vector<2x8x8xf32>
    %cst_37 = arith.constant dense<0.000000e+00> : vector<2x8xf32>
    %99 = vector.multi_reduction <add>, %98, %cst_37 [2] : vector<2x8x8xf32> to vector<2x8xf32>
    %100 = vector.shape_cast %99 : vector<2x8xf32> to vector<2x8x1xf32>
    %101 = tpu.reciprocal %100 {approx = true} : vector<2x8x1xf32> -> vector<2x8x1xf32>
    %102 = vector.broadcast %101 : vector<2x8x1xf32> to vector<2x8x8xf32>
    %103 = arith.mulf %98, %102 : vector<2x8x8xf32>
    %104 = arith.truncf %103 : vector<2x8x8xf32> to vector<2x8x8xbf16>
    %105 = vector.extract_strided_slice %47 {offsets = [0, 0, 16], sizes = [2, 8, 8], strides = [1, 1, 1]} : vector<2x8x32xbf16> to vector<2x8x8xbf16>
    "tpu.trace_start"() <{level = 10 : i32, message = "bqk,bkd->bqd"}> : () -> ()
    %cst_38 = arith.constant dense<0.000000e+00> : vector<2x8x8xf32>
    %106 = tpu.matmul %104, %105, %cst_38 {dimension_numbers = #tpu.dot_dimension_numbers<[2], [1], [1], [2], [0, 0, 0, 1, 1, 2], [0], [0]>} : vector<2x8x8xbf16>, vector<2x8x8xbf16>, vector<2x8x8xf32> -> vector<2x8x8xf32>
    "tpu.trace_stop"() : () -> ()
    %c0_39 = arith.constant 0 : index
    %c0_40 = arith.constant 0 : index
    %c16 = arith.constant 16 : index
    %107 = vector.load %arg28[%c0_39, %c0_40, %c16] : memref<2x8x32xf32, #tpu.memory_space<vmem>>, vector<2x8x8xf32>
    tpu.vector_store %arg28[%c0_39, %c0_40, %c16], %106 {strides = array<i32>} : memref<2x8x32xf32, #tpu.memory_space<vmem>>, vector<2x8x8xf32>,
    %108 = vector.extract_strided_slice %43 {offsets = [0, 0, 24], sizes = [2, 8, 8], strides = [1, 1, 1]} : vector<2x8x32xbf16> to vector<2x8x8xbf16>
    %109 = vector.extract_strided_slice %45 {offsets = [0, 0, 24], sizes = [2, 8, 8], strides = [1, 1, 1]} : vector<2x8x32xbf16> to vector<2x8x8xbf16>
    "tpu.trace_start"() <{level = 10 : i32, message = "bqd,bkd->bqk"}> : () -> ()
    %cst_41 = arith.constant dense<0.000000e+00> : vector<2x8x8xf32>
    %110 = tpu.matmul %108, %109, %cst_41 {dimension_numbers = #tpu.dot_dimension_numbers<[2], [2], [1], [1], [0, 0, 0, 1, 1, 1], [0], [0]>} : vector<2x8x8xbf16>, vector<2x8x8xbf16>, vector<2x8x8xf32> -> vector<2x8x8xf32>
    "tpu.trace_stop"() : () -> ()
    %111 = vector.shape_cast %39 : vector<8x8xf32> to vector<1x8x8xf32>
    %112 = vector.broadcast %111 : vector<1x8x8xf32> to vector<2x8x8xf32>
    %113 = arith.addf %110, %112 : vector<2x8x8xf32>
    %cst_42 = arith.constant dense<0xFF800000> : vector<2x8xf32>
    %114 = vector.multi_reduction <maximumf>, %113, %cst_42 [2] : vector<2x8x8xf32> to vector<2x8xf32>
    %115 = vector.shape_cast %114 : vector<2x8xf32> to vector<2x8x1xf32>
    %116 = vector.broadcast %115 : vector<2x8x1xf32> to vector<2x8x8xf32>
    %117 = arith.subf %113, %116 : vector<2x8x8xf32>
    %118 = math.exp %117 : vector<2x8x8xf32>
    %cst_43 = arith.constant dense<0.000000e+00> : vector<2x8xf32>
    %119 = vector.multi_reduction <add>, %118, %cst_43 [2] : vector<2x8x8xf32> to vector<2x8xf32>
    %120 = vector.shape_cast %119 : vector<2x8xf32> to vector<2x8x1xf32>
    %121 = tpu.reciprocal %120 {approx = true} : vector<2x8x1xf32> -> vector<2x8x1xf32>
    %122 = vector.broadcast %121 : vector<2x8x1xf32> to vector<2x8x8xf32>
    %123 = arith.mulf %118, %122 : vector<2x8x8xf32>
    %124 = arith.truncf %123 : vector<2x8x8xf32> to vector<2x8x8xbf16>
    %125 = vector.extract_strided_slice %47 {offsets = [0, 0, 24], sizes = [2, 8, 8], strides = [1, 1, 1]} : vector<2x8x32xbf16> to vector<2x8x8xbf16>
    "tpu.trace_start"() <{level = 10 : i32, message = "bqk,bkd->bqd"}> : () -> ()
    %cst_44 = arith.constant dense<0.000000e+00> : vector<2x8x8xf32>
    %126 = tpu.matmul %124, %125, %cst_44 {dimension_numbers = #tpu.dot_dimension_numbers<[2], [1], [1], [2], [0, 0, 0, 1, 1, 2], [0], [0]>} : vector<2x8x8xbf16>, vector<2x8x8xbf16>, vector<2x8x8xf32> -> vector<2x8x8xf32>
    "tpu.trace_stop"() : () -> ()
    %c0_45 = arith.constant 0 : index
    %c0_46 = arith.constant 0 : index
    %c24 = arith.constant 24 : index
    %127 = vector.load %arg28[%c0_45, %c0_46, %c24] : memref<2x8x32xf32, #tpu.memory_space<vmem>>, vector<2x8x8xf32>
    tpu.vector_store %arg28[%c0_45, %c0_46, %c24], %126 {strides = array<i32>} : memref<2x8x32xf32, #tpu.memory_space<vmem>>, vector<2x8x8xf32>,
    %c0_47 = arith.constant 0 : index
    %c0_48 = arith.constant 0 : index
    %c0_49 = arith.constant 0 : index
    %128 = vector.load %arg28[%c0_47, %c0_48, %c0_49] : memref<2x8x32xf32, #tpu.memory_space<vmem>>, vector<2x8x32xf32>
    %129 = vector.shape_cast %128 : vector<2x8x32xf32> to vector<16x32xf32>
    %130 = arith.truncf %129 : vector<16x32xf32> to vector<16x32xbf16>
    %c0_50 = arith.constant 0 : index
    %c0_51 = arith.constant 0 : index
    %c0_52 = arith.constant 0 : index
    %131 = vector.load %arg8[%c0_50, %c0_51, %c0_52] : memref<1x32x32xbf16, #tpu.memory_space<vmem>>, vector<1x32x32xbf16>
    %132 = vector.shape_cast %131 : vector<1x32x32xbf16> to vector<32x32xbf16>
    %cst_53 = arith.constant dense<0.000000e+00> : vector<16x32xf32>
    %133 = tpu.matmul %130, %132, %cst_53 {dimension_numbers = #tpu.dot_dimension_numbers<[1], [0], [0], [1], [0, 0, 1, 1], [], []>} : vector<16x32xbf16>, vector<32x32xbf16>, vector<16x32xf32> -> vector<16x32xf32>
    %c0_54 = arith.constant 0 : index
    %c0_55 = arith.constant 0 : index
    %c0_56 = arith.constant 0 : index
    %134 = vector.load %arg9[%c0_54, %c0_55, %c0_56] : memref<1x1x32xf32, #tpu.memory_space<vmem>>, vector<1x1x32xf32>
    %135 = vector.shape_cast %134 : vector<1x1x32xf32> to vector<1x32xf32>
    %136 = vector.broadcast %135 : vector<1x32xf32> to vector<16x32xf32>
    %137 = arith.addf %133, %136 : vector<16x32xf32>
    %138 = arith.addf %137, %3 : vector<16x32xf32>
    %c0_57 = arith.constant 0 : index
    %c1 = arith.constant 1 : index
    %c0_58 = arith.constant 0 : index
    %139 = vector.load %arg20[%c0_57, %c1, %c0_58] : memref<1x3x32xf32, #tpu.memory_space<vmem>>, vector<1x1x32xf32>
    %140 = vector.shape_cast %139 : vector<1x1x32xf32> to vector<1x32xf32>
    %c0_59 = arith.constant 0 : index
    %c1_60 = arith.constant 1 : index
    %c0_61 = arith.constant 0 : index
    %141 = vector.load %arg21[%c0_59, %c1_60, %c0_61] : memref<1x3x32xf32, #tpu.memory_space<vmem>>, vector<1x1x32xf32>
    %142 = vector.shape_cast %141 : vector<1x1x32xf32> to vector<1x32xf32>
    %cst_62 = arith.constant dense<0.000000e+00> : vector<16xf32>
    %143 = vector.multi_reduction <add>, %138, %cst_62 [1] : vector<16x32xf32> to vector<16xf32>
    %144 = vector.shape_cast %143 : vector<16xf32> to vector<16x1xf32>
    %cst_63 = arith.constant 3.200000e+01 : f32
    %145 = vector.broadcast %cst_63 : f32 to vector<16x1xf32>
    %146 = arith.divf %144, %145 : vector<16x1xf32>
    %147 = vector.broadcast %146 : vector<16x1xf32> to vector<16x32xf32>
    %148 = arith.subf %138, %147 : vector<16x32xf32>
    %149 = arith.mulf %148, %148 : vector<16x32xf32>
    %cst_64 = arith.constant dense<0.000000e+00> : vector<16xf32>
    %150 = vector.multi_reduction <add>, %149, %cst_64 [1] : vector<16x32xf32> to vector<16xf32>
    %151 = vector.shape_cast %150 : vector<16xf32> to vector<16x1xf32>
    %cst_65 = arith.constant 3.200000e+01 : f32
    %152 = vector.broadcast %cst_65 : f32 to vector<16x1xf32>
    %153 = arith.divf %151, %152 : vector<16x1xf32>
    %cst_66 = arith.constant 9.99999997E-7 : f32
    %154 = vector.broadcast %cst_66 : f32 to vector<16x1xf32>
    %155 = arith.addf %153, %154 : vector<16x1xf32>
    %156 = math.rsqrt %155 : vector<16x1xf32>
    %157 = vector.broadcast %156 : vector<16x1xf32> to vector<16x32xf32>
    %158 = arith.mulf %148, %157 : vector<16x32xf32>
    %159 = vector.broadcast %140 : vector<1x32xf32> to vector<16x32xf32>
    %160 = arith.mulf %158, %159 : vector<16x32xf32>
    %161 = vector.broadcast %142 : vector<1x32xf32> to vector<16x32xf32>
    %162 = arith.addf %160, %161 : vector<16x32xf32>
    %163 = arith.truncf %162 : vector<16x32xf32> to vector<16x32xbf16>
    %c0_67 = arith.constant 0 : index
    %c0_68 = arith.constant 0 : index
    %c0_69 = arith.constant 0 : index
    %164 = vector.load %arg10[%c0_67, %c0_68, %c0_69] : memref<1x32x32xbf16, #tpu.memory_space<vmem>>, vector<1x32x32xbf16>
    %165 = vector.shape_cast %164 : vector<1x32x32xbf16> to vector<32x32xbf16>
    %cst_70 = arith.constant dense<0.000000e+00> : vector<16x32xf32>
    %166 = tpu.matmul %163, %165, %cst_70 {dimension_numbers = #tpu.dot_dimension_numbers<[1], [0], [0], [1], [0, 0, 1, 1], [], []>} : vector<16x32xbf16>, vector<32x32xbf16>, vector<16x32xf32> -> vector<16x32xf32>
    %c0_71 = arith.constant 0 : index
    %c0_72 = arith.constant 0 : index
    %c0_73 = arith.constant 0 : index
    %167 = vector.load %arg11[%c0_71, %c0_72, %c0_73] : memref<1x1x32xf32, #tpu.memory_space<vmem>>, vector<1x1x32xf32>
    %168 = vector.shape_cast %167 : vector<1x1x32xf32> to vector<1x32xf32>
    %169 = vector.broadcast %168 : vector<1x32xf32> to vector<16x32xf32>
    %170 = arith.addf %166, %169 : vector<16x32xf32>
    %c0_74 = arith.constant 0 : index
    %c0_75 = arith.constant 0 : index
    %171 = vector.load %arg4[%c0_74, %c0_75] : memref<16x32xbf16, #tpu.memory_space<vmem>>, vector<16x32xbf16>
    %c0_76 = arith.constant 0 : index
    %c0_77 = arith.constant 0 : index
    %c0_78 = arith.constant 0 : index
    %172 = vector.load %arg12[%c0_76, %c0_77, %c0_78] : memref<1x32x64xbf16, #tpu.memory_space<vmem>>, vector<1x32x64xbf16>
    %173 = vector.shape_cast %172 : vector<1x32x64xbf16> to vector<32x64xbf16>
    %cst_79 = arith.constant dense<0.000000e+00> : vector<16x64xf32>
    %174 = tpu.matmul %171, %173, %cst_79 {dimension_numbers = #tpu.dot_dimension_numbers<[1], [0], [0], [1], [0, 0, 1, 1], [], []>} : vector<16x32xbf16>, vector<32x64xbf16>, vector<16x64xf32> -> vector<16x64xf32>
    %c0_80 = arith.constant 0 : index
    %c0_81 = arith.constant 0 : index
    %c0_82 = arith.constant 0 : index
    %175 = vector.load %arg13[%c0_80, %c0_81, %c0_82] : memref<1x1x64xf32, #tpu.memory_space<vmem>>, vector<1x1x64xf32>
    %176 = vector.shape_cast %175 : vector<1x1x64xf32> to vector<1x64xf32>
    %177 = vector.broadcast %176 : vector<1x64xf32> to vector<16x64xf32>
    %178 = arith.addf %174, %177 : vector<16x64xf32>
    %179 = vector.extract_strided_slice %178 {offsets = [0, 0], sizes = [16, 32], strides = [1, 1]} : vector<16x64xf32> to vector<16x32xf32>
    %180 = vector.extract_strided_slice %178 {offsets = [0, 32], sizes = [16, 32], strides = [1, 1]} : vector<16x64xf32> to vector<16x32xf32>
    %c0_83 = arith.constant 0 : index
    %c0_84 = arith.constant 0 : index
    %c0_85 = arith.constant 0 : index
    %181 = vector.load %arg5[%c0_83, %c0_84, %c0_85] : memref<2x1x8xf32, #tpu.memory_space<vmem>>, vector<2x1x8xf32>
    %cst_86 = arith.constant 0.353553385 : f32
    %182 = vector.broadcast %cst_86 : f32 to vector<16x32xf32>
    %183 = arith.mulf %170, %182 : vector<16x32xf32>
    %184 = vector.shape_cast %183 : vector<16x32xf32> to vector<2x8x32xf32>
    %185 = arith.truncf %184 : vector<2x8x32xf32> to vector<2x8x32xbf16>
    %186 = vector.shape_cast %179 : vector<16x32xf32> to vector<2x8x32xf32>
    %187 = arith.truncf %186 : vector<2x8x32xf32> to vector<2x8x32xbf16>
    %188 = vector.shape_cast %180 : vector<16x32xf32> to vector<2x8x32xf32>
    %189 = arith.truncf %188 : vector<2x8x32xf32> to vector<2x8x32xbf16>
    %190 = vector.extract_strided_slice %185 {offsets = [0, 0, 0], sizes = [2, 8, 8], strides = [1, 1, 1]} : vector<2x8x32xbf16> to vector<2x8x8xbf16>
    %191 = vector.extract_strided_slice %187 {offsets = [0, 0, 0], sizes = [2, 8, 8], strides = [1, 1, 1]} : vector<2x8x32xbf16> to vector<2x8x8xbf16>
    "tpu.trace_start"() <{level = 10 : i32, message = "bqd,bkd->bqk"}> : () -> ()
    %cst_87 = arith.constant dense<0.000000e+00> : vector<2x8x8xf32>
    %192 = tpu.matmul %190, %191, %cst_87 {dimension_numbers = #tpu.dot_dimension_numbers<[2], [2], [1], [1], [0, 0, 0, 1, 1, 1], [0], [0]>} : vector<2x8x8xbf16>, vector<2x8x8xbf16>, vector<2x8x8xf32> -> vector<2x8x8xf32>
    "tpu.trace_stop"() : () -> ()
    %193 = vector.broadcast %181 : vector<2x1x8xf32> to vector<2x8x8xf32>
    %194 = arith.addf %192, %193 : vector<2x8x8xf32>
    %cst_88 = arith.constant dense<0xFF800000> : vector<2x8xf32>
    %195 = vector.multi_reduction <maximumf>, %194, %cst_88 [2] : vector<2x8x8xf32> to vector<2x8xf32>
    %196 = vector.shape_cast %195 : vector<2x8xf32> to vector<2x8x1xf32>
    %197 = vector.broadcast %196 : vector<2x8x1xf32> to vector<2x8x8xf32>
    %198 = arith.subf %194, %197 : vector<2x8x8xf32>
    %199 = math.exp %198 : vector<2x8x8xf32>
    %cst_89 = arith.constant dense<0.000000e+00> : vector<2x8xf32>
    %200 = vector.multi_reduction <add>, %199, %cst_89 [2] : vector<2x8x8xf32> to vector<2x8xf32>
    %201 = vector.shape_cast %200 : vector<2x8xf32> to vector<2x8x1xf32>
    %202 = tpu.reciprocal %201 {approx = true} : vector<2x8x1xf32> -> vector<2x8x1xf32>
    %203 = vector.broadcast %202 : vector<2x8x1xf32> to vector<2x8x8xf32>
    %204 = arith.mulf %199, %203 : vector<2x8x8xf32>
    %205 = arith.truncf %204 : vector<2x8x8xf32> to vector<2x8x8xbf16>
    %206 = vector.extract_strided_slice %189 {offsets = [0, 0, 0], sizes = [2, 8, 8], strides = [1, 1, 1]} : vector<2x8x32xbf16> to vector<2x8x8xbf16>
    "tpu.trace_start"() <{level = 10 : i32, message = "bqk,bkd->bqd"}> : () -> ()
    %cst_90 = arith.constant dense<0.000000e+00> : vector<2x8x8xf32>
    %207 = tpu.matmul %205, %206, %cst_90 {dimension_numbers = #tpu.dot_dimension_numbers<[2], [1], [1], [2], [0, 0, 0, 1, 1, 2], [0], [0]>} : vector<2x8x8xbf16>, vector<2x8x8xbf16>, vector<2x8x8xf32> -> vector<2x8x8xf32>
    "tpu.trace_stop"() : () -> ()
    %c0_91 = arith.constant 0 : index
    %c0_92 = arith.constant 0 : index
    %c0_93 = arith.constant 0 : index
    %208 = vector.load %arg28[%c0_91, %c0_92, %c0_93] : memref<2x8x32xf32, #tpu.memory_space<vmem>>, vector<2x8x8xf32>
    tpu.vector_store %arg28[%c0_91, %c0_92, %c0_93], %207 {strides = array<i32>} : memref<2x8x32xf32, #tpu.memory_space<vmem>>, vector<2x8x8xf32>,
    %209 = vector.extract_strided_slice %185 {offsets = [0, 0, 8], sizes = [2, 8, 8], strides = [1, 1, 1]} : vector<2x8x32xbf16> to vector<2x8x8xbf16>
    %210 = vector.extract_strided_slice %187 {offsets = [0, 0, 8], sizes = [2, 8, 8], strides = [1, 1, 1]} : vector<2x8x32xbf16> to vector<2x8x8xbf16>
    "tpu.trace_start"() <{level = 10 : i32, message = "bqd,bkd->bqk"}> : () -> ()
    %cst_94 = arith.constant dense<0.000000e+00> : vector<2x8x8xf32>
    %211 = tpu.matmul %209, %210, %cst_94 {dimension_numbers = #tpu.dot_dimension_numbers<[2], [2], [1], [1], [0, 0, 0, 1, 1, 1], [0], [0]>} : vector<2x8x8xbf16>, vector<2x8x8xbf16>, vector<2x8x8xf32> -> vector<2x8x8xf32>
    "tpu.trace_stop"() : () -> ()
    %212 = vector.broadcast %181 : vector<2x1x8xf32> to vector<2x8x8xf32>
    %213 = arith.addf %211, %212 : vector<2x8x8xf32>
    %cst_95 = arith.constant dense<0xFF800000> : vector<2x8xf32>
    %214 = vector.multi_reduction <maximumf>, %213, %cst_95 [2] : vector<2x8x8xf32> to vector<2x8xf32>
    %215 = vector.shape_cast %214 : vector<2x8xf32> to vector<2x8x1xf32>
    %216 = vector.broadcast %215 : vector<2x8x1xf32> to vector<2x8x8xf32>
    %217 = arith.subf %213, %216 : vector<2x8x8xf32>
    %218 = math.exp %217 : vector<2x8x8xf32>
    %cst_96 = arith.constant dense<0.000000e+00> : vector<2x8xf32>
    %219 = vector.multi_reduction <add>, %218, %cst_96 [2] : vector<2x8x8xf32> to vector<2x8xf32>
    %220 = vector.shape_cast %219 : vector<2x8xf32> to vector<2x8x1xf32>
    %221 = tpu.reciprocal %220 {approx = true} : vector<2x8x1xf32> -> vector<2x8x1xf32>
    %222 = vector.broadcast %221 : vector<2x8x1xf32> to vector<2x8x8xf32>
    %223 = arith.mulf %218, %222 : vector<2x8x8xf32>
    %224 = arith.truncf %223 : vector<2x8x8xf32> to vector<2x8x8xbf16>
    %225 = vector.extract_strided_slice %189 {offsets = [0, 0, 8], sizes = [2, 8, 8], strides = [1, 1, 1]} : vector<2x8x32xbf16> to vector<2x8x8xbf16>
    "tpu.trace_start"() <{level = 10 : i32, message = "bqk,bkd->bqd"}> : () -> ()
    %cst_97 = arith.constant dense<0.000000e+00> : vector<2x8x8xf32>
    %226 = tpu.matmul %224, %225, %cst_97 {dimension_numbers = #tpu.dot_dimension_numbers<[2], [1], [1], [2], [0, 0, 0, 1, 1, 2], [0], [0]>} : vector<2x8x8xbf16>, vector<2x8x8xbf16>, vector<2x8x8xf32> -> vector<2x8x8xf32>
    "tpu.trace_stop"() : () -> ()
    %c0_98 = arith.constant 0 : index
    %c0_99 = arith.constant 0 : index
    %c8_100 = arith.constant 8 : index
    %227 = vector.load %arg28[%c0_98, %c0_99, %c8_100] : memref<2x8x32xf32, #tpu.memory_space<vmem>>, vector<2x8x8xf32>
    tpu.vector_store %arg28[%c0_98, %c0_99, %c8_100], %226 {strides = array<i32>} : memref<2x8x32xf32, #tpu.memory_space<vmem>>, vector<2x8x8xf32>,
    %228 = vector.extract_strided_slice %185 {offsets = [0, 0, 16], sizes = [2, 8, 8], strides = [1, 1, 1]} : vector<2x8x32xbf16> to vector<2x8x8xbf16>
    %229 = vector.extract_strided_slice %187 {offsets = [0, 0, 16], sizes = [2, 8, 8], strides = [1, 1, 1]} : vector<2x8x32xbf16> to vector<2x8x8xbf16>
    "tpu.trace_start"() <{level = 10 : i32, message = "bqd,bkd->bqk"}> : () -> ()
    %cst_101 = arith.constant dense<0.000000e+00> : vector<2x8x8xf32>
    %230 = tpu.matmul %228, %229, %cst_101 {dimension_numbers = #tpu.dot_dimension_numbers<[2], [2], [1], [1], [0, 0, 0, 1, 1, 1], [0], [0]>} : vector<2x8x8xbf16>, vector<2x8x8xbf16>, vector<2x8x8xf32> -> vector<2x8x8xf32>
    "tpu.trace_stop"() : () -> ()
    %231 = vector.broadcast %181 : vector<2x1x8xf32> to vector<2x8x8xf32>
    %232 = arith.addf %230, %231 : vector<2x8x8xf32>
    %cst_102 = arith.constant dense<0xFF800000> : vector<2x8xf32>
    %233 = vector.multi_reduction <maximumf>, %232, %cst_102 [2] : vector<2x8x8xf32> to vector<2x8xf32>
    %234 = vector.shape_cast %233 : vector<2x8xf32> to vector<2x8x1xf32>
    %235 = vector.broadcast %234 : vector<2x8x1xf32> to vector<2x8x8xf32>
    %236 = arith.subf %232, %235 : vector<2x8x8xf32>
    %237 = math.exp %236 : vector<2x8x8xf32>
    %cst_103 = arith.constant dense<0.000000e+00> : vector<2x8xf32>
    %238 = vector.multi_reduction <add>, %237, %cst_103 [2] : vector<2x8x8xf32> to vector<2x8xf32>
    %239 = vector.shape_cast %238 : vector<2x8xf32> to vector<2x8x1xf32>
    %240 = tpu.reciprocal %239 {approx = true} : vector<2x8x1xf32> -> vector<2x8x1xf32>
    %241 = vector.broadcast %240 : vector<2x8x1xf32> to vector<2x8x8xf32>
    %242 = arith.mulf %237, %241 : vector<2x8x8xf32>
    %243 = arith.truncf %242 : vector<2x8x8xf32> to vector<2x8x8xbf16>
    %244 = vector.extract_strided_slice %189 {offsets = [0, 0, 16], sizes = [2, 8, 8], strides = [1, 1, 1]} : vector<2x8x32xbf16> to vector<2x8x8xbf16>
    "tpu.trace_start"() <{level = 10 : i32, message = "bqk,bkd->bqd"}> : () -> ()
    %cst_104 = arith.constant dense<0.000000e+00> : vector<2x8x8xf32>
    %245 = tpu.matmul %243, %244, %cst_104 {dimension_numbers = #tpu.dot_dimension_numbers<[2], [1], [1], [2], [0, 0, 0, 1, 1, 2], [0], [0]>} : vector<2x8x8xbf16>, vector<2x8x8xbf16>, vector<2x8x8xf32> -> vector<2x8x8xf32>
    "tpu.trace_stop"() : () -> ()
    %c0_105 = arith.constant 0 : index
    %c0_106 = arith.constant 0 : index
    %c16_107 = arith.constant 16 : index
    %246 = vector.load %arg28[%c0_105, %c0_106, %c16_107] : memref<2x8x32xf32, #tpu.memory_space<vmem>>, vector<2x8x8xf32>
    tpu.vector_store %arg28[%c0_105, %c0_106, %c16_107], %245 {strides = array<i32>} : memref<2x8x32xf32, #tpu.memory_space<vmem>>, vector<2x8x8xf32>,
    %247 = vector.extract_strided_slice %185 {offsets = [0, 0, 24], sizes = [2, 8, 8], strides = [1, 1, 1]} : vector<2x8x32xbf16> to vector<2x8x8xbf16>
    %248 = vector.extract_strided_slice %187 {offsets = [0, 0, 24], sizes = [2, 8, 8], strides = [1, 1, 1]} : vector<2x8x32xbf16> to vector<2x8x8xbf16>
    "tpu.trace_start"() <{level = 10 : i32, message = "bqd,bkd->bqk"}> : () -> ()
    %cst_108 = arith.constant dense<0.000000e+00> : vector<2x8x8xf32>
    %249 = tpu.matmul %247, %248, %cst_108 {dimension_numbers = #tpu.dot_dimension_numbers<[2], [2], [1], [1], [0, 0, 0, 1, 1, 1], [0], [0]>} : vector<2x8x8xbf16>, vector<2x8x8xbf16>, vector<2x8x8xf32> -> vector<2x8x8xf32>
    "tpu.trace_stop"() : () -> ()
    %250 = vector.broadcast %181 : vector<2x1x8xf32> to vector<2x8x8xf32>
    %251 = arith.addf %249, %250 : vector<2x8x8xf32>
    %cst_109 = arith.constant dense<0xFF800000> : vector<2x8xf32>
    %252 = vector.multi_reduction <maximumf>, %251, %cst_109 [2] : vector<2x8x8xf32> to vector<2x8xf32>
    %253 = vector.shape_cast %252 : vector<2x8xf32> to vector<2x8x1xf32>
    %254 = vector.broadcast %253 : vector<2x8x1xf32> to vector<2x8x8xf32>
    %255 = arith.subf %251, %254 : vector<2x8x8xf32>
    %256 = math.exp %255 : vector<2x8x8xf32>
    %cst_110 = arith.constant dense<0.000000e+00> : vector<2x8xf32>
    %257 = vector.multi_reduction <add>, %256, %cst_110 [2] : vector<2x8x8xf32> to vector<2x8xf32>
    %258 = vector.shape_cast %257 : vector<2x8xf32> to vector<2x8x1xf32>
    %259 = tpu.reciprocal %258 {approx = true} : vector<2x8x1xf32> -> vector<2x8x1xf32>
    %260 = vector.broadcast %259 : vector<2x8x1xf32> to vector<2x8x8xf32>
    %261 = arith.mulf %256, %260 : vector<2x8x8xf32>
    %262 = arith.truncf %261 : vector<2x8x8xf32> to vector<2x8x8xbf16>
    %263 = vector.extract_strided_slice %189 {offsets = [0, 0, 24], sizes = [2, 8, 8], strides = [1, 1, 1]} : vector<2x8x32xbf16> to vector<2x8x8xbf16>
    "tpu.trace_start"() <{level = 10 : i32, message = "bqk,bkd->bqd"}> : () -> ()
    %cst_111 = arith.constant dense<0.000000e+00> : vector<2x8x8xf32>
    %264 = tpu.matmul %262, %263, %cst_111 {dimension_numbers = #tpu.dot_dimension_numbers<[2], [1], [1], [2], [0, 0, 0, 1, 1, 2], [0], [0]>} : vector<2x8x8xbf16>, vector<2x8x8xbf16>, vector<2x8x8xf32> -> vector<2x8x8xf32>
    "tpu.trace_stop"() : () -> ()
    %c0_112 = arith.constant 0 : index
    %c0_113 = arith.constant 0 : index
    %c24_114 = arith.constant 24 : index
    %265 = vector.load %arg28[%c0_112, %c0_113, %c24_114] : memref<2x8x32xf32, #tpu.memory_space<vmem>>, vector<2x8x8xf32>
    tpu.vector_store %arg28[%c0_112, %c0_113, %c24_114], %264 {strides = array<i32>} : memref<2x8x32xf32, #tpu.memory_space<vmem>>, vector<2x8x8xf32>,
    %c0_115 = arith.constant 0 : index
    %c0_116 = arith.constant 0 : index
    %c0_117 = arith.constant 0 : index
    %266 = vector.load %arg28[%c0_115, %c0_116, %c0_117] : memref<2x8x32xf32, #tpu.memory_space<vmem>>, vector<2x8x32xf32>
    %267 = vector.shape_cast %266 : vector<2x8x32xf32> to vector<16x32xf32>
    %268 = arith.truncf %267 : vector<16x32xf32> to vector<16x32xbf16>
    %c0_118 = arith.constant 0 : index
    %c0_119 = arith.constant 0 : index
    %c0_120 = arith.constant 0 : index
    %269 = vector.load %arg14[%c0_118, %c0_119, %c0_120] : memref<1x32x32xbf16, #tpu.memory_space<vmem>>, vector<1x32x32xbf16>
    %270 = vector.shape_cast %269 : vector<1x32x32xbf16> to vector<32x32xbf16>
    %cst_121 = arith.constant dense<0.000000e+00> : vector<16x32xf32>
    %271 = tpu.matmul %268, %270, %cst_121 {dimension_numbers = #tpu.dot_dimension_numbers<[1], [0], [0], [1], [0, 0, 1, 1], [], []>} : vector<16x32xbf16>, vector<32x32xbf16>, vector<16x32xf32> -> vector<16x32xf32>
    %c0_122 = arith.constant 0 : index
    %c0_123 = arith.constant 0 : index
    %c0_124 = arith.constant 0 : index
    %272 = vector.load %arg15[%c0_122, %c0_123, %c0_124] : memref<1x1x32xf32, #tpu.memory_space<vmem>>, vector<1x1x32xf32>
    %273 = vector.shape_cast %272 : vector<1x1x32xf32> to vector<1x32xf32>
    %274 = vector.broadcast %273 : vector<1x32xf32> to vector<16x32xf32>
    %275 = arith.addf %271, %274 : vector<16x32xf32>
    %276 = arith.addf %275, %138 : vector<16x32xf32>
    %c0_125 = arith.constant 0 : index
    %c2 = arith.constant 2 : index
    %c0_126 = arith.constant 0 : index
    %277 = vector.load %arg20[%c0_125, %c2, %c0_126] : memref<1x3x32xf32, #tpu.memory_space<vmem>>, vector<1x1x32xf32>
    %278 = vector.shape_cast %277 : vector<1x1x32xf32> to vector<1x32xf32>
    %c0_127 = arith.constant 0 : index
    %c2_128 = arith.constant 2 : index
    %c0_129 = arith.constant 0 : index
    %279 = vector.load %arg21[%c0_127, %c2_128, %c0_129] : memref<1x3x32xf32, #tpu.memory_space<vmem>>, vector<1x1x32xf32>
    %280 = vector.shape_cast %279 : vector<1x1x32xf32> to vector<1x32xf32>
    %cst_130 = arith.constant dense<0.000000e+00> : vector<16xf32>
    %281 = vector.multi_reduction <add>, %276, %cst_130 [1] : vector<16x32xf32> to vector<16xf32>
    %282 = vector.shape_cast %281 : vector<16xf32> to vector<16x1xf32>
    %cst_131 = arith.constant 3.200000e+01 : f32
    %283 = vector.broadcast %cst_131 : f32 to vector<16x1xf32>
    %284 = arith.divf %282, %283 : vector<16x1xf32>
    %285 = vector.broadcast %284 : vector<16x1xf32> to vector<16x32xf32>
    %286 = arith.subf %276, %285 : vector<16x32xf32>
    %287 = arith.mulf %286, %286 : vector<16x32xf32>
    %cst_132 = arith.constant dense<0.000000e+00> : vector<16xf32>
    %288 = vector.multi_reduction <add>, %287, %cst_132 [1] : vector<16x32xf32> to vector<16xf32>
    %289 = vector.shape_cast %288 : vector<16xf32> to vector<16x1xf32>
    %cst_133 = arith.constant 3.200000e+01 : f32
    %290 = vector.broadcast %cst_133 : f32 to vector<16x1xf32>
    %291 = arith.divf %289, %290 : vector<16x1xf32>
    %cst_134 = arith.constant 9.99999997E-7 : f32
    %292 = vector.broadcast %cst_134 : f32 to vector<16x1xf32>
    %293 = arith.addf %291, %292 : vector<16x1xf32>
    %294 = math.rsqrt %293 : vector<16x1xf32>
    %295 = vector.broadcast %294 : vector<16x1xf32> to vector<16x32xf32>
    %296 = arith.mulf %286, %295 : vector<16x32xf32>
    %297 = vector.broadcast %278 : vector<1x32xf32> to vector<16x32xf32>
    %298 = arith.mulf %296, %297 : vector<16x32xf32>
    %299 = vector.broadcast %280 : vector<1x32xf32> to vector<16x32xf32>
    %300 = arith.addf %298, %299 : vector<16x32xf32>
    %301 = arith.truncf %300 : vector<16x32xf32> to vector<16x32xbf16>
    %c0_135 = arith.constant 0 : index
    %c0_136 = arith.constant 0 : index
    %c0_137 = arith.constant 0 : index
    %302 = vector.load %arg16[%c0_135, %c0_136, %c0_137] : memref<1x32x64xbf16, #tpu.memory_space<vmem>>, vector<1x32x64xbf16>
    %303 = vector.shape_cast %302 : vector<1x32x64xbf16> to vector<32x64xbf16>
    %cst_138 = arith.constant dense<0.000000e+00> : vector<16x64xf32>
    %304 = tpu.matmul %301, %303, %cst_138 {dimension_numbers = #tpu.dot_dimension_numbers<[1], [0], [0], [1], [0, 0, 1, 1], [], []>} : vector<16x32xbf16>, vector<32x64xbf16>, vector<16x64xf32> -> vector<16x64xf32>
    %c0_139 = arith.constant 0 : index
    %c0_140 = arith.constant 0 : index
    %c0_141 = arith.constant 0 : index
    %305 = vector.load %arg17[%c0_139, %c0_140, %c0_141] : memref<1x1x64xf32, #tpu.memory_space<vmem>>, vector<1x1x64xf32>
    %306 = vector.shape_cast %305 : vector<1x1x64xf32> to vector<1x64xf32>
    %307 = vector.broadcast %306 : vector<1x64xf32> to vector<16x64xf32>
    %308 = arith.addf %304, %307 : vector<16x64xf32>
    %cst_142 = arith.constant 0.000000e+00 : f32
    %309 = vector.broadcast %cst_142 : f32 to vector<16x64xf32>
    %310 = arith.maximumf %308, %309 : vector<16x64xf32>
    %311 = arith.truncf %310 : vector<16x64xf32> to vector<16x64xbf16>
    %c0_143 = arith.constant 0 : index
    %c0_144 = arith.constant 0 : index
    %c0_145 = arith.constant 0 : index
    %312 = vector.load %arg18[%c0_143, %c0_144, %c0_145] : memref<1x64x32xbf16, #tpu.memory_space<vmem>>, vector<1x64x32xbf16>
    %313 = vector.shape_cast %312 : vector<1x64x32xbf16> to vector<64x32xbf16>
    %cst_146 = arith.constant dense<0.000000e+00> : vector<16x32xf32>
    %314 = tpu.matmul %311, %313, %cst_146 {dimension_numbers = #tpu.dot_dimension_numbers<[1], [0], [0], [1], [0, 0, 1, 1], [], []>} : vector<16x64xbf16>, vector<64x32xbf16>, vector<16x32xf32> -> vector<16x32xf32>
    %c0_147 = arith.constant 0 : index
    %c0_148 = arith.constant 0 : index
    %c0_149 = arith.constant 0 : index
    %315 = vector.load %arg19[%c0_147, %c0_148, %c0_149] : memref<1x1x32xf32, #tpu.memory_space<vmem>>, vector<1x1x32xf32>
    %316 = vector.shape_cast %315 : vector<1x1x32xf32> to vector<1x32xf32>
    %317 = vector.broadcast %316 : vector<1x32xf32> to vector<16x32xf32>
    %318 = arith.addf %314, %317 : vector<16x32xf32>
    %319 = arith.addf %318, %276 : vector<16x32xf32>
    %c0_150 = arith.constant 0 : index
    %c0_151 = arith.constant 0 : index
    %320 = vector.load %arg27[%c0_150, %c0_151] : memref<16x32xf32, #tpu.memory_space<vmem>>, vector<16x32xf32>
    tpu.vector_store %arg27[%c0_150, %c0_151], %319 {strides = array<i32>} : memref<16x32xf32, #tpu.memory_space<vmem>>, vector<16x32xf32>,
    %c1_i32 = arith.constant 1 : i32
    %321 = arith.cmpi eq, %arg1, %c1_i32 : i32
    %322 = arith.extui %321 : i1 to i32
    %c0_i32_152 = arith.constant 0 : i32
    %323 = arith.cmpi ne, %322, %c0_i32_152 : i32
    scf.if %323 {
      %c0_153 = arith.constant 0 : index
      %c0_154 = arith.constant 0 : index
      %324 = vector.load %arg22[%c0_153, %c0_154] : memref<1x32xf32, #tpu.memory_space<vmem>>, vector<1x32xf32>
      %c0_155 = arith.constant 0 : index
      %c0_156 = arith.constant 0 : index
      %325 = vector.load %arg23[%c0_155, %c0_156] : memref<1x32xf32, #tpu.memory_space<vmem>>, vector<1x32xf32>
      %cst_157 = arith.constant dense<0.000000e+00> : vector<16xf32>
      %326 = vector.multi_reduction <add>, %319, %cst_157 [1] : vector<16x32xf32> to vector<16xf32>
      %327 = vector.shape_cast %326 : vector<16xf32> to vector<16x1xf32>
      %cst_158 = arith.constant 3.200000e+01 : f32
      %328 = vector.broadcast %cst_158 : f32 to vector<16x1xf32>
      %329 = arith.divf %327, %328 : vector<16x1xf32>
      %330 = vector.broadcast %329 : vector<16x1xf32> to vector<16x32xf32>
      %331 = arith.subf %319, %330 : vector<16x32xf32>
      %332 = arith.mulf %331, %331 : vector<16x32xf32>
      %cst_159 = arith.constant dense<0.000000e+00> : vector<16xf32>
      %333 = vector.multi_reduction <add>, %332, %cst_159 [1] : vector<16x32xf32> to vector<16xf32>
      %334 = vector.shape_cast %333 : vector<16xf32> to vector<16x1xf32>
      %cst_160 = arith.constant 3.200000e+01 : f32
      %335 = vector.broadcast %cst_160 : f32 to vector<16x1xf32>
      %336 = arith.divf %334, %335 : vector<16x1xf32>
      %cst_161 = arith.constant 9.99999997E-7 : f32
      %337 = vector.broadcast %cst_161 : f32 to vector<16x1xf32>
      %338 = arith.addf %336, %337 : vector<16x1xf32>
      %339 = math.rsqrt %338 : vector<16x1xf32>
      %340 = vector.broadcast %339 : vector<16x1xf32> to vector<16x32xf32>
      %341 = arith.mulf %331, %340 : vector<16x32xf32>
      %342 = vector.broadcast %324 : vector<1x32xf32> to vector<16x32xf32>
      %343 = arith.mulf %341, %342 : vector<16x32xf32>
      %344 = vector.broadcast %325 : vector<1x32xf32> to vector<16x32xf32>
      %345 = arith.addf %343, %344 : vector<16x32xf32>
      %c0_162 = arith.constant 0 : index
      %c0_163 = arith.constant 0 : index
      %346 = vector.load %arg26[%c0_162, %c0_163] : memref<16x32xf32, #tpu.memory_space<vmem>>, vector<16x32xf32>
      tpu.vector_store %arg26[%c0_162, %c0_163], %345 {strides = array<i32>} : memref<16x32xf32, #tpu.memory_space<vmem>>, vector<16x32xf32>,
      %347 = arith.truncf %345 : vector<16x32xf32> to vector<16x32xbf16>
      %c0_164 = arith.constant 0 : index
      %c0_165 = arith.constant 0 : index
      %348 = vector.load %arg24[%c0_164, %c0_165] : memref<32x128xbf16, #tpu.memory_space<vmem>>, vector<32x128xbf16>
      %cst_166 = arith.constant dense<0.000000e+00> : vector<16x128xf32>
      %349 = tpu.matmul %347, %348, %cst_166 {dimension_numbers = #tpu.dot_dimension_numbers<[1], [0], [0], [1], [0, 0, 1, 1], [], []>} : vector<16x32xbf16>, vector<32x128xbf16>, vector<16x128xf32> -> vector<16x128xf32>
      %c0_167 = arith.constant 0 : index
      %c0_168 = arith.constant 0 : index
      %350 = vector.load %arg25[%c0_167, %c0_168] : memref<16x128xf32, #tpu.memory_space<vmem>>, vector<16x128xf32>
      tpu.vector_store %arg25[%c0_167, %c0_168], %349 {strides = array<i32>} : memref<16x128xf32, #tpu.memory_space<vmem>>, vector<16x128xf32>,
    } else {
    }
    return
  }
  func.func @transform_0(%arg0: i32, %arg1: i32) -> (i32, i32, i32) {
    %c0_i32 = arith.constant 0 : i32
    %c0_i32_0 = arith.constant 0 : i32
    %c0_i32_1 = arith.constant 0 : i32
    return %arg0, %c0_i32, %c0_i32_0 : i32, i32, i32
  }
  func.func @transform_1(%arg0: i32, %arg1: i32) -> (i32, i32) {
    %c0_i32 = arith.constant 0 : i32
    %c0_i32_0 = arith.constant 0 : i32
    %c0_i32_1 = arith.constant 0 : i32
    return %c0_i32, %c0_i32_0 : i32, i32
  }
  func.func @transform_2(%arg0: i32, %arg1: i32) -> (i32, i32) {
    %c0_i32 = arith.constant 0 : i32
    %c0_i32_0 = arith.constant 0 : i32
    return %arg0, %c0_i32 : i32, i32
  }
  func.func @transform_3(%arg0: i32, %arg1: i32) -> (i32, i32, i32) {
    %c0_i32 = arith.constant 0 : i32
    %c0_i32_0 = arith.constant 0 : i32
    %c0_i32_1 = arith.constant 0 : i32
    return %arg0, %c0_i32, %c0_i32_0 : i32, i32, i32
  }
  func.func @transform_4(%arg0: i32, %arg1: i32) -> (i32, i32, i32) {
    %c0_i32 = arith.constant 0 : i32
    %c0_i32_0 = arith.constant 0 : i32
    %c0_i32_1 = arith.constant 0 : i32
    return %arg1, %c0_i32, %c0_i32_0 : i32, i32, i32
  }
  func.func @transform_5(%arg0: i32, %arg1: i32) -> (i32, i32, i32) {
    %c0_i32 = arith.constant 0 : i32
    %c0_i32_0 = arith.constant 0 : i32
    %c0_i32_1 = arith.constant 0 : i32
    return %arg1, %c0_i32, %c0_i32_0 : i32, i32, i32
  }
  func.func @transform_6(%arg0: i32, %arg1: i32) -> (i32, i32, i32) {
    %c0_i32 = arith.constant 0 : i32
    %c0_i32_0 = arith.constant 0 : i32
    %c0_i32_1 = arith.constant 0 : i32
    return %arg1, %c0_i32, %c0_i32_0 : i32, i32, i32
  }
  func.func @transform_7(%arg0: i32, %arg1: i32) -> (i32, i32, i32) {
    %c0_i32 = arith.constant 0 : i32
    %c0_i32_0 = arith.constant 0 : i32
    %c0_i32_1 = arith.constant 0 : i32
    return %arg1, %c0_i32, %c0_i32_0 : i32, i32, i32
  }
  func.func @transform_8(%arg0: i32, %arg1: i32) -> (i32, i32, i32) {
    %c0_i32 = arith.constant 0 : i32
    %c0_i32_0 = arith.constant 0 : i32
    %c0_i32_1 = arith.constant 0 : i32
    return %arg1, %c0_i32, %c0_i32_0 : i32, i32, i32
  }
  func.func @transform_9(%arg0: i32, %arg1: i32) -> (i32, i32, i32) {
    %c0_i32 = arith.constant 0 : i32
    %c0_i32_0 = arith.constant 0 : i32
    %c0_i32_1 = arith.constant 0 : i32
    return %arg1, %c0_i32, %c0_i32_0 : i32, i32, i32
  }
  func.func @transform_10(%arg0: i32, %arg1: i32) -> (i32, i32, i32) {
    %c0_i32 = arith.constant 0 : i32
    %c0_i32_0 = arith.constant 0 : i32
    %c0_i32_1 = arith.constant 0 : i32
    return %arg1, %c0_i32, %c0_i32_0 : i32, i32, i32
  }
  func.func @transform_11(%arg0: i32, %arg1: i32) -> (i32, i32, i32) {
    %c0_i32 = arith.constant 0 : i32
    %c0_i32_0 = arith.constant 0 : i32
    %c0_i32_1 = arith.constant 0 : i32
    return %arg1, %c0_i32, %c0_i32_0 : i32, i32, i32
  }
  func.func @transform_12(%arg0: i32, %arg1: i32) -> (i32, i32, i32) {
    %c0_i32 = arith.constant 0 : i32
    %c0_i32_0 = arith.constant 0 : i32
    %c0_i32_1 = arith.constant 0 : i32
    return %arg1, %c0_i32, %c0_i32_0 : i32, i32, i32
  }
  func.func @transform_13(%arg0: i32, %arg1: i32) -> (i32, i32, i32) {
    %c0_i32 = arith.constant 0 : i32
    %c0_i32_0 = arith.constant 0 : i32
    %c0_i32_1 = arith.constant 0 : i32
    return %arg1, %c0_i32, %c0_i32_0 : i32, i32, i32
  }
  func.func @transform_14(%arg0: i32, %arg1: i32) -> (i32, i32, i32) {
    %c0_i32 = arith.constant 0 : i32
    %c0_i32_0 = arith.constant 0 : i32
    %c0_i32_1 = arith.constant 0 : i32
    return %arg1, %c0_i32, %c0_i32_0 : i32, i32, i32
  }
  func.func @transform_15(%arg0: i32, %arg1: i32) -> (i32, i32, i32) {
    %c0_i32 = arith.constant 0 : i32
    %c0_i32_0 = arith.constant 0 : i32
    %c0_i32_1 = arith.constant 0 : i32
    return %arg1, %c0_i32, %c0_i32_0 : i32, i32, i32
  }
  func.func @transform_16(%arg0: i32, %arg1: i32) -> (i32, i32, i32) {
    %c0_i32 = arith.constant 0 : i32
    %c0_i32_0 = arith.constant 0 : i32
    %c0_i32_1 = arith.constant 0 : i32
    return %arg1, %c0_i32, %c0_i32_0 : i32, i32, i32
  }
  func.func @transform_17(%arg0: i32, %arg1: i32) -> (i32, i32, i32) {
    %c0_i32 = arith.constant 0 : i32
    %c0_i32_0 = arith.constant 0 : i32
    %c0_i32_1 = arith.constant 0 : i32
    return %arg1, %c0_i32, %c0_i32_0 : i32, i32, i32
  }
  func.func @transform_18(%arg0: i32, %arg1: i32) -> (i32, i32, i32) {
    %c0_i32 = arith.constant 0 : i32
    %c0_i32_0 = arith.constant 0 : i32
    %c0_i32_1 = arith.constant 0 : i32
    return %arg1, %c0_i32, %c0_i32_0 : i32, i32, i32
  }
  func.func @transform_19(%arg0: i32, %arg1: i32) -> (i32, i32, i32) {
    %c0_i32 = arith.constant 0 : i32
    %c0_i32_0 = arith.constant 0 : i32
    %c0_i32_1 = arith.constant 0 : i32
    return %arg1, %c0_i32, %c0_i32_0 : i32, i32, i32
  }
  func.func @transform_20(%arg0: i32, %arg1: i32) -> (i32, i32) {
    %c0_i32 = arith.constant 0 : i32
    %c0_i32_0 = arith.constant 0 : i32
    %c0_i32_1 = arith.constant 0 : i32
    return %c0_i32, %c0_i32_0 : i32, i32
  }
  func.func @transform_21(%arg0: i32, %arg1: i32) -> (i32, i32) {
    %c0_i32 = arith.constant 0 : i32
    %c0_i32_0 = arith.constant 0 : i32
    %c0_i32_1 = arith.constant 0 : i32
    return %c0_i32, %c0_i32_0 : i32, i32
  }
  func.func @transform_22(%arg0: i32, %arg1: i32) -> (i32, i32) {
    %c0_i32 = arith.constant 0 : i32
    %c0_i32_0 = arith.constant 0 : i32
    %c0_i32_1 = arith.constant 0 : i32
    return %c0_i32, %c0_i32_0 : i32, i32
  }
  func.func @transform_23(%arg0: i32, %arg1: i32) -> (i32, i32) {
    %c0_i32 = arith.constant 0 : i32
    %c0_i32_0 = arith.constant 0 : i32
    return %arg0, %c0_i32 : i32, i32
  }
  func.func @transform_24(%arg0: i32, %arg1: i32) -> (i32, i32) {
    %c0_i32 = arith.constant 0 : i32
    %c0_i32_0 = arith.constant 0 : i32
    return %arg0, %c0_i32 : i32, i32
  }
}

</mosaic_0001>

<bundles_post_ra>
// kernel: tpu_custom_call.1
= control target key start
LH: loop header
LB: loop body
LE: loop exit
PB: predicated region body
PF: predicated region fallthrough
CT: control target
= control target key end

     0   :  { %s5527_s0 = inlined_call_operand.vmem [shape: f32[4,8,32], index: 0, kind: input, shape index: {}]   ;;  %s5528_s1 = inlined_call_operand.hbm [shape: f32[8,32], index: 1, kind: input, shape index: {}]   ;;  %s5529_s2 = inlined_call_operand.hbm [shape: bf16[32,32], index: 2, kind: input, shape index: {}]   ;;  %s5530_s3 = inlined_call_operand.hbm [shape: f32[4,1,8], index: 3, kind: input, shape index: {}]   ;;  %s5531_s4 = inlined_call_operand.vmem [shape: bf16[2,32,96], index: 4, kind: input, shape index: {}]   ;;  %s5532_s5 = inlined_call_operand.hbm [shape: f32[2,1,96], index: 5, kind: input, shape index: {}]   ;;  %s5533_s6 = inlined_call_operand.vmem [shape: bf16[2,32,32], index: 6, kind: input, shape index: {}]   ;;  %s5534_s7 = inlined_call_operand.hbm [shape: f32[2,1,32], index: 7, kind: input, shape index: {}]   ;;  %s5535_s8 = inlined_call_operand.hbm [shape: bf16[2,32,32], index: 8, kind: input, shape index: {}]   ;;  %s5536_s9 = inlined_call_operand.hbm [shape: f32[2,1,32], index: 9, kind: input, shape index: {}]   ;;  %s5537_s10 = inlined_call_operand.hbm [shape: bf16[2,32,64], index: 10, kind: input, shape index: {}]   ;;  %s5538_s11 = inlined_call_operand.hbm [shape: f32[2,1,64], index: 11, kind: input, shape index: {}]   ;;  %s5539_s12 = inlined_call_operand.hbm [shape: bf16[2,32,32], index: 12, kind: input, shape index: {}]   ;;  %s5540_s13 = inlined_call_operand.hbm [shape: f32[2,1,32], index: 13, kind: input, shape index: {}]   ;;  %s5541_s14 = inlined_call_operand.hbm [shape: bf16[2,32,64], index: 14, kind: input, shape index: {}]   ;;  %s5542_s15 = inlined_call_operand.hbm [shape: f32[2,1,64], index: 15, kind: input, shape index: {}]   ;;  %s5543_s16 = inlined_call_operand.vmem [shape: bf16[2,64,32], index: 16, kind: input, shape index: {}]   ;;  %s5544_s17 = inlined_call_operand.hbm [shape: f32[2,1,32], index: 17, kind: input, shape index: {}]   ;;  %s5545_s18 = inlined_call_operand.vmem [shape: f32[2,3,32], index: 18, kind: input, shape index: {}]   ;;  %s5546_s19 = inlined_call_operand.vmem [shape: f32[2,3,32], index: 19, kind: input, shape index: {}]   ;;  %s5547_s20 = inlined_call_operand.vmem [shape: f32[1,32], index: 20, kind: input, shape index: {}]   ;;  %s5548_s21 = inlined_call_operand.vmem [shape: f32[1,32], index: 21, kind: input, shape index: {}]   ;;  %s5549_s22 = inlined_call_operand.hbm [shape: bf16[32,128], index: 22, kind: input, shape index: {}]   ;;  %s5550_s23 = inlined_call_operand.hbm [shape: f32[32,128], index: 23, kind: output, shape index: {0}]   ;;  %s5551_s24 = inlined_call_operand.hbm [shape: f32[32,32], index: 24, kind: output, shape index: {1}]  }
   0x1   :  { %5579 = sst [smem:[#allocation59_spill]] %s5527_s0 }
   0x2   :  { %5580 = sst [smem:[#allocation60_spill]] %s5528_s1 }
   0x3   :  { %5581 = sst [smem:[#allocation61_spill]] %s5529_s2 }
   0x4   :  { %5582 = sst [smem:[#allocation62_spill]] %s5530_s3 }
   0x5   :  { %5583 = sst [smem:[#allocation63_spill]] %s5531_s4 }
   0x6   :  { %5584 = sst [smem:[#allocation64_spill]] %s5532_s5 }
   0x7   :  { %5585 = sst [smem:[#allocation65_spill]] %s5533_s6 }
   0x8   :  { %5586 = sst [smem:[#allocation66_spill]] %s5534_s7 }
   0x9   :  { %5587 = sst [smem:[#allocation67_spill]] %s5535_s8 }
   0xa   :  { %5588 = sst [smem:[#allocation68_spill]] %s5536_s9 }
   0xb   :  { %5589 = sst [smem:[#allocation69_spill]] %s5537_s10 }
   0xc   :  { %5590 = sst [smem:[#allocation70_spill]] %s5538_s11 }
   0xd   :  { %5591 = sst [smem:[#allocation71_spill]] %s5539_s12 }
   0xe   :  { %5592 = sst [smem:[#allocation72_spill]] %s5540_s13 }
   0xf   :  { %5593 = sst [smem:[#allocation73_spill]] %s5541_s14 }
  0x10   :  { %5594 = sst [smem:[#allocation74_spill]] %s5542_s15 }
  0x11   :  { %5595 = sst [smem:[#allocation75_spill]] %s5543_s16 }
  0x12   :  { %5596 = sst [smem:[#allocation76_spill]] %s5544_s17 }
  0x13   :  { %5597 = sst [smem:[#allocation77_spill]] %s5545_s18 }
  0x14   :  { %5598 = sst [smem:[#allocation78_spill]] %s5546_s19 }
  0x15   :  { %5599 = sst [smem:[#allocation79_spill]] %s5547_s20 }
  0x16   :  { %5600 = sst [smem:[#allocation80_spill]] %s5548_s21 }
  0x17   :  { %5601 = sst [smem:[#allocation81_spill]] %s5549_s22 }
  0x18   :  { %5602 = sst [smem:[#allocation82_spill]] %s5550_s23 }
  0x19   :  { %5603 = sst [smem:[#allocation83_spill]] %s5551_s24 }
  0x1a   :  { %30 = vsyncpa [#allocation6], 0 }
  0x1b   :  { %31 = vsyncpa [#allocation9], 0 }
  0x1c   :  { %33 = vsyncpa [#allocation9 + $0x1], 0 }
  0x1d   :  { %34 = vsyncpa [#allocation12], 0 }
  0x1e   :  { %36 = vsyncpa [#allocation12 + $0x1], 0 }
  0x1f   :  { %37 = vsyncpa [#allocation15], 0 }
  0x20   :  { %39 = vsyncpa [#allocation15 + $0x1], 0 }
  0x21   :  { %40 = vsyncpa [#allocation18], 0 }
  0x22   :  { %42 = vsyncpa [#allocation18 + $0x1], 0 }
  0x23   :  { %43 = vsyncpa [#allocation21], 0 }
  0x24   :  { %45 = vsyncpa [#allocation21 + $0x1], 0 }
  0x25   :  { %46 = vsyncpa [#allocation24], 0 }
  0x26   :  { %48 = vsyncpa [#allocation24 + $0x1], 0 }
  0x27   :  { %49 = vsyncpa [#allocation27], 0 }
  0x28   :  { %51 = vsyncpa [#allocation27 + $0x1], 0 }
  0x29   :  { %52 = vsyncpa [#allocation7], 0 }
  0x2a   :  { %54 = vsyncpa [#allocation7 + $0x1], 0 }
  0x2b   :  { %55 = vsyncpa [#allocation31], 0 }
  0x2c   :  { %57 = vsyncpa [#allocation31 + $0x1], 0  ;;  %s4662_s5 = smov 0   ;;  %s4664_s26 = smov 0  }
  0x2d   :  { %s4666_s27 = smov 0   ;;  %s4668_s28 = smov 0  }
  0x2e   :  { %s4670_s6 = smov 0   ;;  %s4672_s2 = smov 0  }
  0x2f   :  { %s4674_s29 = smov 0   ;;  %s4676_s0 = smov 0  }
  0x30   :  { %s4678_s7 = smov 0   ;;  %s4680_s30 = smov 0  }
  0x31   :  { %s4682_s3 = smov 0  }
  0x32 LB: > { %5604 = sst [smem:[#allocation43_spill]] %s4474_s26  ;;  %s4718_s25 = sadd.s32 4294967295, %s4510_s3   ;;  %s4510_s3 = sphi %s4682_s3, %s63_s3   ;;  %s4506_s30 = sphi %s4680_s30, %s5699_s30   ;;  %s4502_s7 = sphi %s4678_s7, %s5698_s7   ;;  %s4498_s0 = sphi %s4676_s0, %s5697_s0   ;;  %s4494_s29 = sphi %s4674_s29, %s5696_s29   ;;  %s4490_s2 = sphi %s4672_s2, %s5693_s2   ;;  %s4486_s6 = sphi %s4670_s6, %s5692_s6   ;;  %s4482_s28 = sphi %s4668_s28, %s5691_s28   ;;  %s4478_s27 = sphi %s4666_s27, %s5690_s27   ;;  %s4474_s26 = sphi %s4664_s26, %s5689_s26   ;;  %s4470_s5 = sphi %s4662_s5, %s5688_s5  }
  0x33   : > { %5605 = sst [smem:[#allocation44_spill]] %s4478_s27  ;;  %s3433_s8 = sadd.s32 4294967294, %s4510_s3  }
  0x34   : > { %5606 = sst [smem:[#allocation45_spill]] %s4482_s28  ;;  %s72_s4 = sadd.s32 1, %s4502_s7 }
  0x35   : > { %5607 = sst [smem:[#allocation46_spill]] %s4486_s6  ;;  %s75_s1 = sadd.s32 1, %s4506_s30 }
  0x36   : > { %5608 = sst [smem:[#allocation47_spill]] %s4490_s2  ;;  %p73_p0 = scmp.ge.s32.totalorder %s72_s4, 2 }
  0x37   : > { %5609 = sst [smem:[#allocation48_spill]] %s4494_s29  ;;  %s129_s24 = sadd.s32 1, %s4490_s2 }
  0x38   : > { %5610 = sst [smem:[#allocation49_spill]] %s4498_s0  ;;  %p5557_p1 = scmp.ne.s32.totalorder %s4490_s2, %s4486_s6 }
  0x39   : > { %5611 = sst [smem:[#allocation50_spill]] %s4510_s3  ;;  %p137_p2 = scmp.eq.s32.totalorder %s4510_s3, 0 }
  0x3a   : > { %s5701_s4 = smov (%p73_p0, %s72_s4), 0  ;;  %s5703_s1 = smov (!%p73_p0, %s75_s1), %s4506_s30 }
  0x3b   : > { %5612 = sst [smem:[#allocation51_spill]] %s5701_s4  ;;  %p4735_p3 = por %p137_p2, %p5557_p1 }
  0x3c   : > { %p5556_p4 = scmp.ne.s32.totalorder %s4486_s6, %s4482_s28  ;;  %p77_p5 = scmp.ge.s32.totalorder %s5703_s1, 2 }
  0x3d   : > { %p143_p6 = scmp.eq.s32.totalorder %s4718_s25, 0  ;;  %s204_s21 = ssub.s32 %s4502_s7, %s5701_s4 }
  0x3e   : > { %s207_s20 = sadd.s32 1, %s4478_s27  ;;  %s5705_s1 = smov (%p77_p5, %s5703_s1), 0 }
  0x3f   : > { %5614 = sst [smem:[#allocation52_spill]] %s5705_s1  ;;  %p4752_p7 = por %p143_p6, %p5556_p4 }
  0x40   : > { %p205_p8 = scmp.eq.s32.totalorder %s204_s21, 0  ;;  %s126_s18 = ssub.s32 %s4506_s30, %s5705_s1 }
  0x41   : > { %s5615_s19 = scalar_select %p4752_p7, 1, 0 }
  0x42   : > { %p214_p9 = scmp.ne.s32.totalorder %s4478_s27, %s4474_s26  ;;  %p127_p10 = scmp.eq.s32.totalorder %s126_s18, 0 }
  0x43   : > { %5616 = sst [smem:[#allocation53_spill]] %s5615_s19  ;;  %p220_p11 = scmp.ne.s32.totalorder %s4474_s26, %s4470_s5 }
  0x44   : > { %s4763_s4 = scalar_select %p205_p8, %s4478_s27, %s207_s20  }
  0x45   : > { %s4766_s16 = scalar_select %p127_p10, %s4490_s2, %s129_s24  }
  0x46   : > { %5617 = sst [smem:[#allocation54_spill]] %s4763_s4  ;;  %p4770_p12 = por %p214_p9, %p137_p2 }
  0x47   : > { %5618 = sst [smem:[#allocation55_spill]] %s4766_s16  ;;  %p4776_p13 = por %p220_p11, %p143_p6 }
  0x48   : > { %p671_p0 = scmp.eq.s32.totalorder %s4718_s25, 3  ;;  %p677_p5 = scmp.eq.s32.totalorder %s3433_s8, 3 }
  0x49   : > { %s5620_s0 = scalar_select %p4776_p13, 1, 0 }
  0x4a   : > { %p3434_p4 = scmp.ge.s32.totalorder %s4510_s3, 1  ;;  %p710_p1 = scmp.lt.s32.totalorder %s4510_s3, 5 }
  0x4b   : > { %5621 = sst [smem:[#allocation56_spill]] %s5620_s0  ;;  %p5622_p7 = scmp.ne.s32.totalorder %s4490_s2, %s4486_s6 }
  0x4c   : > { %p5625_p10 = scmp.ne.s32.totalorder %s4486_s6, %s4482_s28  ;;  %p4797_p9 = pnand %p3434_p4, %p710_p1 }
  0x4d   : > { %p4786_p8 = por %p671_p0, %p5622_p7  ;;  %s5629_s1 = sld [smem:[#allocation60_spill]] }
  0x4e   : > { %p4793_p2 = por %p677_p5, %p5625_p10  ;;  %p3669_p11 = pneg %p4797_p9 }
  0x4f   : > { %s5623_s18 = scalar_select %p4786_p8, 1, 0 }
  0x50   : > { %s5626_s20 = scalar_select %p4793_p2, 1, 0 }
  0x51   : > { %5624 = sst [smem:[#allocation57_spill]] %s5623_s18  ;;  %s4512_s16 = smov [#allocation5]  }
  0x52   : > { %5627 = sst [smem:[#allocation58_spill]] %s5626_s20  ;;  %s724_s4 = sshll.u32 %s4512_s16, 4  ;;  %s725_s4 = int_to_ptr.vmem [resolvable:$true] %s724_s4 }
  0x53   : > { %s722_s8 = sshll.u32 %s5629_s1, 4  ;;  %s5630_s22 = sld [smem:[#allocation81_spill]]  ;;  %s723_s8 = int_to_ptr.hbm [resolvable:$true] %s722_s8 }
  0x54   : > { %p3670_p1 = pnand %p3669_p11, %p143_p6  ;;  %s4513_s20 = smov [#allocation28]  }
  0x55   : > { %s741_s26 = sshll.u32 %s4513_s20, 4  ;;  %s4514_s24 = smov 64   ;;  %s742_s26 = int_to_ptr.vmem [resolvable:$true] %s741_s26 }
  0x56   : > { %3672 = dma.hbm_to_vmem [thread:$0]  (!%p3670_p1), %s723_s8, 128, %s725_s4, [#allocation6]  }
  0x57   : > { %s4515_s5 = smov 4   ;;  %p3437_p4 = scmp.ge.s32.totalorder %s4510_s3, 4 }
  0x58   : > { %s4813_s16 = sand.u32 (!%p3437_p4), 1, %s4510_s3   ;;  %s766_s28 = sand.u32 (!%p3437_p4), 1, %s4490_s2  }
  0x59   : > { %s739_s0 = sshll.u32 %s5630_s22, 4  ;;  %751 = sbr.rel (%p3437_p4) target bundleno = 149 (0x95), region = 32  ;;  %s740_s0 = int_to_ptr.hbm [resolvable:$true] %s739_s0 }
  0x5a   : > { %3675 = dma.hbm_to_vmem [thread:$0]  (!%p3670_p1), %s740_s0, 256, %s742_s26, [#allocation27], %s4514_s24, %s4514_s24, %s4515_s5  }
  0x5b   : > { %s3438_s1 = sshll.u32 (!%p3437_p4), %s766_s28, 3  ;;  %s3602_s4 = sshll.u32 (!%p3437_p4), %s4506_s30, 3 }
  0x5c   : > { %s5631_s8 = sld [smem:[#allocation61_spill]] (!%p3437_p4)  ;;  %s768_s0 = scalar_lea.vmem (!%p3437_p4), [#allocation8], %s3438_s1 }
  0x5d   : > { %s776_s24 = sshll.u32 (!%p3437_p4), %s768_s0, 4  ;;  %s4820_s22 = sshll.u32 (!%p3437_p4), %s766_s28, 1  ;;  %s777_s24 = int_to_ptr.vmem [resolvable:$true] %s776_s24 }
  0x5e   : > { %s5573_s3 = scalar_lea.sflag [#allocation9], %s4813_s16  ;;  %s4516_s19 = smov 64  }
  0x5f   : > { %s4517_s2 = smov 4   ;;  %s4831_s1 = sand.u32 1, %s4478_s27  }
  0x60   : > { %s5632_s20 = sld [smem:[#allocation64_spill]]  ;;  %s5574_s6 = scalar_lea.sflag [#allocation12], %s4813_s16 }
  0x61   : > { %s5634_s10 = sld [smem:[#allocation69_spill]]  ;;  %s5577_s27 = scalar_lea.sflag [#allocation18], %s4813_s16 }
  0x62   : > { %s773_s26 = scalar_lea.hbm %s5631_s8, %s3602_s4  ;;  %s5635_s12 = sld [smem:[#allocation71_spill]] }
  0x63   : > { %s774_s5 = sshll.u32 %s773_s26, 4  ;;  %s818_s26 = scalar_lea.vmem [#allocation11], %s4831_s1  ;;  %s775_s5 = int_to_ptr.hbm [resolvable:$true] %s774_s5 }
  0x64   : > { %3635 = dma.hbm_to_vmem [thread:$0]  (%p4735_p3), %s775_s5, 128, %s777_s24, %s5573_s3, %s4516_s19, %s4516_s19, %s4517_s2  }
  0x65   : > { %s825_s0 = sshll.u32 %s818_s26, 4  ;;  %s4844_s24 = sshll.u32 %s4831_s1, 4  ;;  %s826_s0 = int_to_ptr.vmem [resolvable:$true] %s825_s0 }
  0x66   : > { %s821_s8 = scalar_lea.hbm %s5632_s20, %s4502_s7  ;;  %s4847_s5 = sshll.u32 %s4502_s7, 4 }
  0x67   : > { %s823_s28 = sshll.u32 %s821_s8, 4  ;;  %s5633_s20 = sld [smem:[#allocation67_spill]]  ;;  %s824_s28 = int_to_ptr.hbm [resolvable:$true] %s823_s28 }
  0x68   : > { %3637 = dma.hbm_to_vmem [thread:$0]  (%p4770_p12), %s824_s28, 16, %s826_s0, %s5574_s6  }
  0x69   : > { %s861_s3 = scalar_lea.vmem [#allocation14], %s4844_s24  ;;  %s5576_s0 = scalar_lea.sflag [#allocation15], %s4813_s16 }
  0x6a   : > { %s869_s28 = sshll.u32 %s861_s3, 4  ;;  %s944_s4 = scalar_lea.hbm %s5635_s12, %s4847_s5  ;;  %s870_s28 = int_to_ptr.vmem [resolvable:$true] %s869_s28 }
  0x6b   : > { %s945_s18 = sshll.u32 %s944_s4, 4  ;;  %s5636_s14 = sld [smem:[#allocation73_spill]]  ;;  %s946_s18 = int_to_ptr.hbm [resolvable:$true] %s945_s18 }
  0x6c   : > { %s5638_s12 = scalar_lea.sflag [#allocation9], %s4813_s16  ;;  %s5641_s9 = sld [smem:[#allocation68_spill]] }
  0x6d   : > { %s866_s8 = scalar_lea.hbm %s5633_s20, %s4847_s5  ;;  %s905_s20 = scalar_lea.hbm %s5634_s10, %s4847_s5 }
  0x6e   : > { %s867_s26 = sshll.u32 %s866_s8, 4  ;;  %s900_s8 = scalar_lea.vmem [#allocation17], %s4844_s24  ;;  %s868_s26 = int_to_ptr.hbm [resolvable:$true] %s867_s26 }
  0x6f   : > { %3639 = dma.hbm_to_vmem [thread:$0]  (%p4770_p12), %s868_s26, 256, %s870_s28, %s5576_s0, %s4516_s19, %s4516_s19, %s4517_s2  }
  0x70   : > { %s908_s3 = sshll.u32 %s900_s8, 4  ;;  %s906_s6 = sshll.u32 %s905_s20, 4  ;;  %s909_s3 = int_to_ptr.vmem [resolvable:$true] %s908_s3  ;;  %s907_s6 = int_to_ptr.hbm [resolvable:$true] %s906_s6 }
  0x71   : > { %3641 = dma.hbm_to_vmem [thread:$0]  (%p4770_p12), %s907_s6, 256, %s909_s3, %s5577_s27, %s4516_s19, %s4516_s19, %s4517_s2  }
  0x72   : > { %s939_s8 = scalar_lea.vmem [#allocation20], %s4844_s24  ;;  %s5578_s0 = scalar_lea.sflag [#allocation21], %s4813_s16 }
  0x73   : > { %s947_s20 = sshll.u32 %s939_s8, 4  ;;  %s983_s26 = scalar_lea.hbm %s5636_s14, %s4847_s5  ;;  %s948_s20 = int_to_ptr.vmem [resolvable:$true] %s947_s20 }
  0x74   : > { %3643 = dma.hbm_to_vmem [thread:$0]  (%p4770_p12), %s946_s18, 256, %s948_s20, %s5578_s0, %s4516_s19, %s4516_s19, %s4517_s2  }
  0x75   : > { %s978_s28 = scalar_lea.vmem [#allocation23], %s4844_s24  ;;  %s984_s27 = sshll.u32 %s983_s26, 4  ;;  %s985_s27 = int_to_ptr.hbm [resolvable:$true] %s984_s27 }
  0x76   : > { %s986_s4 = sshll.u32 %s978_s28, 4  ;;  %s3442_s8 = sshll.u32 %s4506_s30, 1  ;;  %s987_s4 = int_to_ptr.vmem [resolvable:$true] %s986_s4 }
  0x77   : > { %s975_s10 = scalar_lea.sflag [#allocation24], %s4813_s16  ;;  %s5637_s5 = sld [smem:[#allocation62_spill]] }
  0x78   : > { %3645 = dma.hbm_to_vmem [thread:$0]  (%p4770_p12), %s985_s27, 256, %s987_s4, %s975_s10, %s4516_s19, %s4516_s19, %s4517_s2  }
  0x79   : > { %s790_s6 = scalar_lea.vmem [#allocation10], %s4820_s22  ;;  %s4518_s28 = smov 16  }
  0x7a   : > { %s797_s3 = sshll.u32 %s790_s6, 4  ;;  %s4519_s0 = smov 1   ;;  %s798_s3 = int_to_ptr.vmem [resolvable:$true] %s797_s3 }
  0x7b   : > { %s5639_s2 = sld [smem:[#allocation66_spill]]  ;;  %s5640_s20 = scalar_lea.sflag [#allocation12], %s4813_s16 }
  0x7c   : > { %s5643_s11 = sld [smem:[#allocation70_spill]]  ;;  %s921_s27 = scalar_lea.vmem [#allocation19], %s4831_s1 }
  0x7d   : > { %s794_s24 = scalar_lea.hbm %s5637_s5, %s3442_s8  ;;  %s843_s8 = scalar_lea.vmem [#allocation13], %s4831_s1 }
  0x7e   : > { %s795_s26 = sshll.u32 %s794_s24, 4  ;;  %s850_s22 = sshll.u32 %s843_s8, 4  ;;  %s796_s26 = int_to_ptr.hbm [resolvable:$true] %s795_s26  ;;  %s851_s22 = int_to_ptr.vmem [resolvable:$true] %s850_s22 }
  0x7f   : > { %3636 = dma.hbm_to_vmem [thread:$0]  (%p4735_p3), %s796_s26, 32, %s798_s3, %s5638_s12, %s4518_s28, %s4518_s28, %s4519_s0  }
  0x80   : > { %s885_s12 = scalar_lea.hbm %s5641_s9, %s4502_s7  ;;  %s882_s0 = scalar_lea.vmem [#allocation16], %s4831_s1 }
  0x81   : > { %s846_s4 = scalar_lea.hbm %s5639_s2, %s4502_s7  ;;  %s889_s24 = sshll.u32 %s882_s0, 4  ;;  %s890_s24 = int_to_ptr.vmem [resolvable:$true] %s889_s24 }
  0x82   : > { %s848_s18 = sshll.u32 %s846_s4, 4  ;;  %s887_s6 = sshll.u32 %s885_s12, 4  ;;  %s849_s18 = int_to_ptr.hbm [resolvable:$true] %s848_s18  ;;  %s888_s6 = int_to_ptr.hbm [resolvable:$true] %s887_s6 }
  0x83   : > { %3638 = dma.hbm_to_vmem [thread:$0]  (%p4770_p12), %s849_s18, 16, %s851_s22, %s5640_s20  }
  0x84   : > { %s5642_s3 = scalar_lea.sflag [#allocation15], %s4813_s16  ;;  %s924_s19 = scalar_lea.hbm %s5643_s11, %s4502_s7 }
  0x85   : > { %3640 = dma.hbm_to_vmem [thread:$0]  (%p4770_p12), %s888_s6, 16, %s890_s24, %s5642_s3  }
  0x86   : > { %s928_s2 = sshll.u32 %s921_s27, 4  ;;  %s926_s4 = sshll.u32 %s924_s19, 4  ;;  %s929_s2 = int_to_ptr.vmem [resolvable:$true] %s928_s2  ;;  %s927_s4 = int_to_ptr.hbm [resolvable:$true] %s926_s4 }
  0x87   : > { %s5644_s8 = scalar_lea.sflag [#allocation18], %s4813_s16  ;;  %s5645_s13 = sld [smem:[#allocation72_spill]] }
  0x88   : > { %3642 = dma.hbm_to_vmem [thread:$0]  (%p4770_p12), %s927_s4, 16, %s929_s2, %s5644_s8  }
  0x89   : > { %s960_s23 = scalar_lea.vmem [#allocation22], %s4831_s1  ;;  %s5646_s0 = scalar_lea.sflag [#allocation21], %s4813_s16 }
  0x8a   : > { %s967_s5 = sshll.u32 %s960_s23, 4  ;;  %s5647_s15 = sld [smem:[#allocation74_spill]]  ;;  %s968_s5 = int_to_ptr.vmem [resolvable:$true] %s967_s5 }
  0x8b   : > { %s999_s26 = scalar_lea.vmem [#allocation25], %s4831_s1  ;;  %s5648_s17 = sld [smem:[#allocation76_spill]] }
  0x8c   : > { %s1006_s28 = sshll.u32 %s999_s26, 4  ;;  %s1024_s22 = scalar_lea.vmem [#allocation26], %s4831_s1  ;;  %s1007_s28 = int_to_ptr.vmem [resolvable:$true] %s1006_s28 }
  0x8d   : > { %s963_s20 = scalar_lea.hbm %s5645_s13, %s4502_s7  ;;  %s1031_s18 = sshll.u32 %s1024_s22, 4  ;;  %s1032_s18 = int_to_ptr.vmem [resolvable:$true] %s1031_s18 }
  0x8e   : > { %s965_s12 = sshll.u32 %s963_s20, 4  ;;  %s1022_s20 = scalar_lea.sflag [#allocation27], %s4813_s16  ;;  %s966_s12 = int_to_ptr.hbm [resolvable:$true] %s965_s12 }
  0x8f   : > { %3644 = dma.hbm_to_vmem [thread:$0]  (%p4770_p12), %s966_s12, 16, %s968_s5, %s5646_s0  }
  0x90   : > { %s1002_s3 = scalar_lea.hbm %s5647_s15, %s4502_s7 }
  0x91   : > { %s1004_s19 = sshll.u32 %s1002_s3, 4  ;;  %s1027_s4 = scalar_lea.hbm %s5648_s17, %s4502_s7  ;;  %s1005_s19 = int_to_ptr.hbm [resolvable:$true] %s1004_s19 }
  0x92   : > { %3646 = dma.hbm_to_vmem [thread:$0]  (%p4770_p12), %s1005_s19, 16, %s1007_s28, %s975_s10  }
  0x93   : > { %s1029_s8 = sshll.u32 %s1027_s4, 4  ;;  %s1030_s8 = int_to_ptr.hbm [resolvable:$true] %s1029_s8 }
  0x94   : > { %3647 = dma.hbm_to_vmem [thread:$0]  (%p4770_p12), %s1030_s8, 16, %s1032_s18, %s1022_s20  }
  0x95 PF: > { %1054 = sbr.rel (%p4797_p9) target bundleno = 4022 (0xfb6), region = 112 }
  0x9a   : > { %4425 = dma.done.wait (%p143_p6), [#allocation6], 128  }
  0x9b   : > { %4427 = vsyncadd (%p143_p6), [#allocation6], 4294967168  ;;  %s5649_s10 = sld [smem:[#allocation46_spill]]  ;;  %s4970_s1 = sand.u32 1, %s4718_s25  }
  0x9c   : > { %s5650_s23 = sld [smem:[#allocation53_spill]]  ;;  %s1062_s16 = scalar_lea.sflag [#allocation9], %s4970_s1 }
  0xa1   : > { %s4973_s5 = sand.u32 1, %s5649_s10  }
  0xa2   : > { %s3457_s29 = sshll.u32 %s4973_s5, 3  ;;  %p5651_p3 = scmp.ne.s32.totalorder %s5650_s23, 0 }
  0xa3   : > { %s4977_s12 = scalar_lea.vmem [#allocation8], %s3457_s29 }
  0xa4   : > { %4429 = dma.done.wait (%p5651_p3), %s1062_s16, 160  }
  0xa5   : > { %4431 = vsyncadd (%p5651_p3), %s1062_s16, 4294967136  ;;  %s5652_s21 = sld [smem:[#allocation43_spill]]  ;;  %s3458_s24 = sshll.u32 %s4973_s5, 1 }
  0xa6   : > { %s4987_s3 = scalar_lea.vmem [#allocation10], %s3458_s24  ;;  %s1082_s26 = scalar_lea.sflag [#allocation12], %s4970_s1 }
  0xab   : > { %s4985_s6 = sand.u32 1, %s5652_s21  }
  0xac   : > { %4433 = dma.done.wait (%p4776_p13), %s1082_s26, 32  }
  0xad   : > { %4435 = vsyncadd (%p4776_p13), %s1082_s26, 4294967264  ;;  %s4996_s19 = sshll.u32 %s4985_s6, 4  ;;  %s1100_s2 = scalar_lea.sflag [#allocation15], %s4970_s1 }
  0xae   : > { %4437 = dma.done.wait (%p4776_p13), %s1100_s2, 272  }
  0xaf   : > { %4439 = vsyncadd (%p4776_p13), %s1100_s2, 4294967024  ;;  %s1119_s22 = scalar_lea.sflag [#allocation18], %s4970_s1 }
  0xb0   : > { %4441 = dma.done.wait (%p4776_p13), %s1119_s22, 272  }
  0xb1   : > { %4443 = vsyncadd (%p4776_p13), %s1119_s22, 4294967024  ;;  %s1138_s10 = scalar_lea.sflag [#allocation21], %s4970_s1 }
  0xb2   : > { %4445 = dma.done.wait (%p4776_p13), %s1138_s10, 272  }
  0xb3   : > { %4447 = vsyncadd (%p4776_p13), %s1138_s10, 4294967024  ;;  %s1157_s16 = scalar_lea.sflag [#allocation24], %s4970_s1 }
  0xb4   : > { %4449 = dma.done.wait (%p4776_p13), %s1157_s16, 272  }
  0xb5   : > { %4451 = vsyncadd (%p4776_p13), %s1157_s16, 4294967024  ;;  %s1176_s26 = scalar_lea.sflag [#allocation27], %s4970_s1 }
  0xb6   : > { %4453 = dma.done.wait (%p4776_p13), %s1176_s26, 16  }
  0xb7   : > { %4455 = vsyncadd (%p4776_p13), %s1176_s26, 4294967280 }
  0xb8   : > { %4457 = dma.done.wait (%p143_p6), [#allocation27], 256  }
  0xb9   : > { %4459 = vsyncadd (%p143_p6), [#allocation27], 4294967040  ;;  %s5654_s22 = sld [smem:[#allocation49_spill]]  ;;  %s3464_s16 = sshll.u32 %s4973_s5, 4 }
  0xba   : > { %s5655_s10 = sld [smem:[#allocation48_spill]]  ;;  %s5069_s27 = scalar_lea.vmem [#allocation29], %s3464_s16 }
  0xbb   : > { %s5656_s26 = sld [smem:[#allocation59_spill]] }
  0xbc   : > { %s5657_s25 = sld [smem:[#allocation63_spill]] }
  0xbd   : > { %s5658_s28 = sld [smem:[#allocation65_spill]] }
  0xbe   : > { %s5660_s0 = sld [smem:[#allocation77_spill]] }
  0xbf   : > { %s3466_s21 = sshll.u32 %s5654_s22, 1 }
  0xc0   : > { %p1336_p7 = scmp.lt.s32.totalorder %s3466_s21, 3  ;;  %p1343_p12 = scmp.lt.s32.totalorder %s5655_s10, 1 }
  0xc1   : > { %p3476_p6 = scmp.ne.s32.totalorder %s5655_s10, 0 }
  0xc2   : > { %s5707_s21 = smov (!%p1336_p7, %s3466_s21), 3 }
  0xc3   : > { %s1344_s1 = scalar_select %p1343_p12, %s5655_s10, 1 }
  0xc4   : > { %s3467_s2 = sshll.u32 %s5707_s21, 3  ;;  %s5659_s21 = sld [smem:[#allocation75_spill]] }
  0xc5   : > { %s1339_s29 = scalar_lea.vmem %s5656_s26, %s3467_s2  ;;  %s3607_s23 = sshll.u32 %s1344_s1, 4 }
  0xc6   : > { %s5047_s4 = scalar_lea.vmem %s5657_s25, %s3607_s23  ;;  %s5052_s9 = scalar_lea.vmem %s5658_s28, %s3607_s23 }
  0xc7   : > { %s3609_s22 = sshll.u32 %s1344_s1, 5  ;;  %s3474_s11 = sshll.u32 %s1344_s1, 2 }
  0xc8   : > { %s5062_s26 = scalar_lea.vmem %s5660_s0, %s3474_s11  ;;  %s5661_s25 = sld [smem:[#allocation78_spill]] }
  0xc9   : > { %s5071_s28 = scalar_lea.vmem [#allocation30], %s3464_s16 }
  0xca   : > { %s5057_s15 = scalar_lea.vmem %s5659_s21, %s3609_s22  ;;  %1372 = sbr.rel (%p3476_p6) target bundleno = 214 (0xd6), region = 176 }
  0xce   : > { %s5067_s17 = scalar_lea.vmem %s5661_s25, %s3474_s11 }
  0xcf   : > { %v1373_v0 = vld [vmem:[%s1339_s29] sm:$0xff]  ;;  %v1375_v1 = vld [vmem:[#allocation5] sm:$0xff]  ;;  %vm1378_vm0 = vcmask 261120   ;;  %v1381_v3 = vlaneseq  ;;  %vm1387_vm1 = vcmask 64512   ;;  %v4520_v8 = vmov -1e+30  }
  0xd0   : > { %v1374_v2 = vld [vmem:[%s1339_s29 + $0x8] sm:$0xff]  ;;  %v1376_v4 = vadd.f32 %v1375_v1, %v1373_v0 }
  0xd1   : > { %v1377_v5 = vadd.f32 %v1375_v1, %v1374_v2  ;;  %v1382_v6 = vshrl.u32 %v1381_v3, 7  ;;  %v1384_v7 = vand.u32 127, %v1381_v3 }
  0xd2   : > { %1379 = vst.msk [vmem:[#allocation2] sm:$0xff] %vm1378_vm0, %v1376_v4 }
  0xd3   : > { %1380 = vst.msk [vmem:[#allocation2 + $0x8] sm:$0xff] %vm1378_vm0, %v1377_v5  ;;  %vm1385_vm2 = vcmp.ge.s32.totalorder %v1382_v6, %v1384_v7 }
  0xd4   : > { %v1386_v9 = vsel %vm1385_vm2, 0.0, %v4520_v8 }
  0xd5   : > { %1388 = vst.msk [vmem:[#allocation4] sm:$0xff] %vm1387_vm1, %v1386_v9 }
  0xd6 PF: > { %vm1393_vm3 = vcmask 261120   ;;  %v4521_v14 = vmov 32.0   ;;  %v3611_v31 = vld [vmem:[%s5047_s4 + $0x8] sm:$0xff]  ;;  %v3610_v33 = vld [vmem:[%s5047_s4] sm:$0xff]  ;;  %s5662_s11 = scalar_lea.vmem [#allocation11], %s4985_s6  ;;  %s4522_s13 = smov 88  }
  0xd7   : > { %3816 = vrcp.f32 %v4521_v14  ;;  %1481 = vmatpush.bf16.msra.mxu0 %v3611_v31  ;;  %v3801_v52 = vld [vmem:[%s5062_s26] ss:$0 sm:$0xff]  ;;  %s4523_s14 = smov 96   ;;  %s4524_s4 = smov 80   ;;  %vm1501_vm11 = vcmask 64512   ;;  %vm1574_vm12 = vcmask 1043456  }
  0xd8   : > { %v3802_v57 = vld [vmem:[%s5067_s17] ss:$0 sm:$0xff]  ;;  %s4525_s18 = smov 112   ;;  %s4526_s23 = smov 72   ;;  %vm1740_vm13 = vcmask 130112   ;;  %vm1863_vm14 = vcmask 195712  }
  0xd9   : > { %v5074_v10 = vld [vmem:[#allocation2] sm:$0xff]  ;;  %s4527_s29 = smov 120   ;;  %s4528_s10 = smov 104   ;;  %vm1986_vm15 = vcmask 261312  }
  0xda   : > { %v1394_v11 = vsel %vm1393_vm3, %v5074_v10, 0.0  ;;  %v5078_v12 = vld [vmem:[#allocation2 + $0x8] sm:$0xff]  ;;  %v3803_v62 = vld [vmem:[%s5662_s11] ss:$0 sm:$0xff]  ;;  %s4529_s16 = smov 64   ;;  %s4530_s1 = smov 56  }
  0xdb   : > { %1395 = vadd.xlane.f32.xlu0 %v1394_v11  ;;  %v1397_v13 = vsel %vm1393_vm3, %v5078_v12, 0.0  ;;  %1482 = vmatpush.bf16.msra.mxu0 %v3610_v33  ;;  %s4531_s22 = smov 48   ;;  %s4532_s21 = smov 40  }
  0xdc   : > { %s4533_s24 = smov 8   ;;  %s4534_s2 = smov 16  }
  0xdd   : > { %v3817_v15 = vpop.eup %3816  ;;  %s4535_s0 = smov 24   ;;  %s5663_s8 = scalar_lea.vmem [#allocation13], %s4985_s6 }
  0xde   : > { %v1401_v16 = vmul.f32 32.0, %v3817_v15  ;;  %vm1405_vm4 = vweird.f32 %v3817_v15  ;;  %s5668_s11 = scalar_lea.vmem [#allocation19], %s4985_s6 }
  0xe0   : > { %v1402_v17 = vsub.f32 1.0, %v1401_v16 }
  0xe2   : > { %v1403_v18 = vmul.f32 %v3817_v15, %v1402_v17 }
  0xe3   : > { %1398 = vadd.xlane.f32.xlu0 %v1397_v13 }
  0xe4   : > { %v1404_v19 = vadd.f32 %v3817_v15, %v1403_v18 }
  0xe6   : > { %v5082_v20 = vsel %vm1405_vm4, %v3817_v15, %v1404_v19 }
 0x14e   : > { %v1396_v21 = vpop.xlane.xlu0 %1395 }
 0x14f   : > { %v1407_v22 = vmul.f32 %v5082_v20, %v1396_v21 }
 0x151   : > { %v1409_v23 = vsub.f32 %v5074_v10, %v1407_v22 }
 0x153   : > { %v1411_v24 = vmul.f32 %v1409_v23, %v1409_v23 }
 0x155   : > { %v1413_v25 = vsel %vm1393_vm3, %v1411_v24, 0.0 }
 0x156   : > { %1414 = vadd.xlane.f32.xlu1 %v1413_v25  ;;  %v1399_v26 = vpop.xlane.xlu0 %1398 }
 0x157   : > { %v1408_v27 = vmul.f32 %v5082_v20, %v1399_v26 }
 0x159   : > { %v1410_v28 = vsub.f32 %v5078_v12, %v1408_v27 }
 0x15b   : > { %v1412_v29 = vmul.f32 %v1410_v28, %v1410_v28 }
 0x15d   : > { %v1416_v30 = vsel %vm1393_vm3, %v1412_v29, 0.0 }
 0x15e   : > { %1417 = vadd.xlane.f32.xlu1 %v1416_v30 }
 0x1c9   : > { %v1415_v32 = vpop.xlane.xlu1 %1414 }
 0x1ca   : > { %v1419_v34 = vmul.f32 %v1415_v32, %v5082_v20 }
 0x1cc   : > { %v1421_v35 = vadd.f32 1e-06, %v1419_v34 }
 0x1ce   : > { %3818 = vrsqrt.f32 %v1421_v35  ;;  %vm1429_vm6 = vweird.f32 %v1421_v35 }
 0x1d1   : > { %v1418_v36 = vpop.xlane.xlu1 %1417 }
 0x1d2   : > { %v1420_v37 = vmul.f32 %v1418_v36, %v5082_v20 }
 0x1d4   : > { %v3819_v38 = vpop.eup %3818  ;;  %v1422_v39 = vadd.f32 1e-06, %v1420_v37 }
 0x1d5   : > { %v1424_v40 = vmul.f32 %v3819_v38, %v1421_v35  ;;  %vm1430_vm5 = vweird.f32 %v3819_v38 }
 0x1d6   : > { %3820 = vrsqrt.f32 %v1422_v39  ;;  %vm1431_vm7 = vmor %vm1429_vm6, %vm1430_vm5  ;;  %vm1439_vm9 = vweird.f32 %v1422_v39 }
 0x1d7   : > { %v1425_v41 = vmul.f32 %v3819_v38, %v1424_v40 }
 0x1d9   : > { %v1426_v42 = vmul.f32 0.5, %v1425_v41 }
 0x1db   : > { %v1427_v43 = vsub.f32 1.5, %v1426_v42  ;;  %v1489_v42 = vld [vmem:[#allocation4] sm:$0xff] }
 0x1dc   : > { %v3821_v44 = vpop.eup %3820 }
 0x1dd   : > { %v1428_v45 = vmul.f32 %v3819_v38, %v1427_v43  ;;  %v1434_v46 = vmul.f32 %v3821_v44, %v1422_v39  ;;  %vm1440_vm8 = vweird.f32 %v3821_v44 }
 0x1de   : > { %vm1441_vm10 = vmor %vm1439_vm9, %vm1440_vm8 }
 0x1df   : > { %v1435_v47 = vmul.f32 %v3821_v44, %v1434_v46  ;;  %v1432_v48 = vsel %vm1431_vm7, %v3819_v38, %v1428_v45 }
 0x1e0   : > { %v1443_v51 = vmul.f32 %v1432_v48, %v1409_v23 }
 0x1e1   : > { %v1436_v49 = vmul.f32 0.5, %v1435_v47 }
 0x1e2   : > { %v1446_v56 = vmul.f32 %v3801_v52, %v1443_v51 }
 0x1e3   : > { %v1437_v50 = vsub.f32 1.5, %v1436_v49 }
 0x1e4   : > { %v1449_v59 = vadd.f32 %v3802_v57, %v1446_v56 }
 0x1e5   : > { %v1438_v53 = vmul.f32 %v3821_v44, %v1437_v50 }
 0x1e7   : > { %v1442_v54 = vsel %vm1441_vm10, %v3821_v44, %v1438_v53 }
 0x1e8   : > { %v1444_v55 = vmul.f32 %v1442_v54, %v1410_v28 }
 0x1ea   : > { %v1447_v58 = vmul.f32 %v3801_v52, %v1444_v55 }
 0x1ec   : > { %v1450_v60 = vadd.f32 %v3802_v57, %v1447_v58 }
 0x1ee   : > { %v1451_v61 = vpack.c.bf16 %v1450_v60, %v1449_v59 }
 0x1f0   : > { %3485 = vmatmul.msk.bf16.vlgmr.msra.gmra.mxu0 %vm1393_vm3, %v1451_v61 }
 0x26d   : > { %v1484_v63 = vpop.f32.mrf.mxu0 }
 0x26e   : > { %v1485_v0 = vadd.f32 %v3803_v62, %v1484_v63 }
 0x270   : > { %v1494_v1 = vpack.c.bf16 %v1485_v0, %v1485_v0  ;;  %v1490_v8 = vmul.f32 0.35355338, %v1485_v0 }
 0x272   : > { %v1497_v2 = vunpack.c.l.b16 %v1494_v1  ;;  %v1492_v14 = vpack.c.bf16 %v1490_v8, %v1490_v8 }
 0x274   : > { %v5099_v3 = vpack.c.b16 %v1497_v2, %v1497_v2  ;;  %v1615_v16 = vunpack.c.l.b16 %v1492_v14 }
 0x275   : > { %v1486_v4 = vpop.f32.mrf.mxu0 }
 0x276   : > { %v1487_v5 = vadd.f32 %v3803_v62, %v1486_v4  ;;  %1619 = vrot.lane.b32.xlu0 %v5099_v3, %s4522_s13  ;;  %1499 = vrot.lane.b32.xlu2 %v5099_v3, %s4523_s14  ;;  %v1616_v18 = vpack.c.b16 %v1615_v16, %v1615_v16 }
 0x278   : > { %v1491_v6 = vmul.f32 0.35355338, %v1487_v5  ;;  %v1495_v7 = vpack.c.bf16 %v1487_v5, %v1487_v5 }
 0x27a   : > { %v1522_v9 = vunpack.c.l.b16 %v1495_v7  ;;  %v1493_v11 = vpack.c.bf16 %v1491_v6, %v1491_v6 }
 0x27c   : > { %v5105_v13 = vpack.c.b16 %v1522_v9, %v1522_v9  ;;  %v1641_v15 = vunpack.c.l.b16 %v1493_v11 }
 0x27e   : > { %1645 = vrot.lane.b32.xlu1 %v5105_v13, %s4522_s13  ;;  %1768 = vrot.lane.b32.xlu0 %v5105_v13, %s4524_s4  ;;  %v1642_v17 = vpack.c.b16 %v1641_v15, %v1641_v15 }
 0x27f   : > { %1524 = vrot.lane.b32.xlu2 %v5105_v13, %s4523_s14 }
 0x286   : > { %1766 = vrot.lane.b32.xlu1 %v1642_v17, %s4525_s18  ;;  %1868 = vrot.lane.b32.xlu0 %v5099_v3, %s4526_s23 }
 0x287   : > { %1617 = vrot.lane.b32.xlu2 %v1616_v18, %s4527_s29 }
 0x28e   : > { %1889 = vrot.lane.b32.xlu0 %v1642_v17, %s4528_s10  ;;  %1866 = vrot.lane.b32.xlu1 %v1616_v18, %s4528_s10 }
 0x28f   : > { %1643 = vrot.lane.b32.xlu2 %v1642_v17, %s4527_s29 }
 0x297   : > { %1745 = vrot.lane.b32.xlu2 %v5099_v3, %s4524_s4 }
 0x29f   : > { %1743 = vrot.lane.b32.xlu2 %v1616_v18, %s4525_s18 }
 0x2a7   : > { %1891 = vrot.lane.b32.xlu2 %v5105_v13, %s4526_s23 }
 0x2d0   : > { %v1500_v19 = vpop.permute.xlu2 %1499 }
 0x2d1   : > { %v1506_v21 = vsel %vm1501_vm11, %v1500_v19, 0 }
 0x2d2   : > { %1515 = vmatpush.bf16.xpose.msra.mxu1 %v1506_v21 }
 0x2d9   : > { %v1525_v22 = vpop.permute.xlu2 %1524  ;;  %3486 = vmatmul.msk.bf16.vlgmr.msra.gmra.mxu1 %vm1501_vm11, %v1492_v14 }
 0x2da   : > { %v1530_v23 = vsel %vm1501_vm11, %v1525_v22, 0 }
 0x2db   : > { %1539 = vmatpush.bf16.xpose.msra.mxu2 %v1530_v23 }
 0x2e1   : > { %v1618_v24 = vpop.permute.xlu2 %1617 }
 0x2e2   : > { %3487 = vmatmul.msk.bf16.vlgmr.msra.gmra.mxu2 %vm1501_vm11, %v1493_v11 }
 0x2e8   : > { %v1620_v25 = vpop.permute.xlu0 %1619 }
 0x2e9   : > { %v1644_v26 = vpop.permute.xlu2 %1643  ;;  %v1625_v27 = vsel %vm1501_vm11, %v1620_v25, 0 }
 0x2ea   : > { %1634 = vmatpush.bf16.xpose.msrb.mxu0 %v1625_v27 }
 0x2f0   : > { %v1646_v28 = vpop.permute.xlu1 %1645  ;;  %v1769_v29 = vpop.permute.xlu0 %1768 }
 0x2f1   : > { %v1774_v30 = vsel %vm1501_vm11, %v1769_v29, 0  ;;  %v1746_v31 = vpop.permute.xlu2 %1745  ;;  %3490 = vmatmul.msk.bf16.vlgmr.msrb.gmra.mxu0 %vm1501_vm11, %v1618_v24  ;;  %v1651_v32 = vsel %vm1501_vm11, %v1646_v28, 0 }
 0x2f2   : > { %v1751_v33 = vsel %vm1501_vm11, %v1746_v31, 0  ;;  %1660 = vmatpush.bf16.xpose.msrb.mxu1 %v1651_v32 }
 0x2f3   : > { %1760 = vmatpush.bf16.xpose.msra.mxu0 %v1751_v33 }
 0x2f8   : > { %v1869_v34 = vpop.permute.xlu0 %1868  ;;  %v1767_v39 = vpop.permute.xlu1 %1766 }
 0x2f9   : > { %v1874_v35 = vsel %vm1501_vm11, %v1869_v34, 0  ;;  %v1744_v36 = vpop.permute.xlu2 %1743  ;;  %3491 = vmatmul.msk.bf16.vlgmr.msrb.gmra.mxu1 %vm1501_vm11, %v1644_v26 }
 0x2fa   : > { %1783 = vmatpush.bf16.xpose.msra.mxu1 %v1774_v30 }
 0x2fb   : > { %1883 = vmatpush.bf16.xpose.msrb.mxu0 %v1874_v35 }
 0x300   : > { %v1867_v40 = vpop.permute.xlu1 %1866  ;;  %v1890_v41 = vpop.permute.xlu0 %1889 }
 0x301   : > { %v1892_v37 = vpop.permute.xlu2 %1891  ;;  %3494 = vmatmul.msk.bf16.vlgmr.msra.gmra.mxu0 %vm1501_vm11, %v1744_v36 }
 0x302   : > { %v1897_v38 = vsel %vm1501_vm11, %v1892_v37, 0 }
 0x303   : > { %1906 = vmatpush.bf16.xpose.msrb.mxu1 %v1897_v38 }
 0x309   : > { %3495 = vmatmul.msk.bf16.vlgmr.msra.gmra.mxu1 %vm1501_vm11, %v1767_v39 }
 0x311   : > { %3498 = vmatmul.msk.bf16.vlgmr.msrb.gmra.mxu0 %vm1501_vm11, %v1867_v40 }
 0x319   : > { %3499 = vmatmul.msk.bf16.vlgmr.msrb.gmra.mxu1 %vm1501_vm11, %v1890_v41 }
 0x356   : > { %v1517_v43 = vpop.f32.mrf.mxu1 }
 0x357   : > { %v1518_v44 = vadd.f32 %v1517_v43, %v1489_v42 }
 0x359   : > { %v1545_v45 = vsel %vm1501_vm11, %v1518_v44, -inf }
 0x35a   : > { %1546 = vmax.xlane.f32.xlu2 %v1545_v45 }
 0x35e   : > { %v1519_v46 = vpop.f32.mrf.mxu1 }
 0x365   : > { %v1541_v47 = vpop.f32.mrf.mxu2 }
 0x366   : > { %v1542_v48 = vadd.f32 %v1541_v47, %v1489_v42 }
 0x368   : > { %v1548_v49 = vsel %vm1501_vm11, %v1542_v48, -inf }
 0x369   : > { %1549 = vmax.xlane.f32.xlu1 %v1548_v49 }
 0x36d   : > { %v1543_v50 = vpop.f32.mrf.mxu2 }
 0x36e   : > { %v1636_v51 = vpop.f32.mrf.mxu0 }
 0x36f   : > { %v1637_v52 = vadd.f32 %v1636_v51, %v1489_v42 }
 0x371   : > { %v1666_v53 = vsel %vm1501_vm11, %v1637_v52, -inf }
 0x372   : > { %1667 = vmax.xlane.f32.xlu0 %v1666_v53  ;;  %1591 = vrot.lane.b32.xlu2 %v5105_v13, %s4529_s16 }
 0x376   : > { %v1638_v54 = vpop.f32.mrf.mxu0  ;;  %v1662_v55 = vpop.f32.mrf.mxu1 }
 0x377   : > { %v1663_v0 = vadd.f32 %v1662_v55, %v1489_v42 }
 0x379   : > { %v1669_v2 = vsel %vm1501_vm11, %v1663_v0, -inf }
 0x37a   : > { %1711 = vrot.lane.b32.xlu2 %v5105_v13, %s4530_s1 }
 0x37e   : > { %v1664_v56 = vpop.f32.mrf.mxu1  ;;  %v1762_v57 = vpop.f32.mrf.mxu0 }
 0x37f   : > { %v1763_v5 = vadd.f32 %v1762_v57, %v1489_v42 }
 0x381   : > { %v1789_v8 = vsel %vm1501_vm11, %v1763_v5, -inf }
 0x382   : > { %1569 = vrot.lane.b32.xlu1 %v5099_v3, %s4529_s16  ;;  %s5669_s16 = scalar_lea.vmem [#allocation16], %s4985_s6 }
 0x386   : > { %1690 = vrot.lane.b32.xlu0 %v5099_v3, %s4530_s1  ;;  %v1764_v58 = vpop.f32.mrf.mxu0  ;;  %v1785_v59 = vpop.f32.mrf.mxu1 }
 0x387   : > { %v1786_v7 = vadd.f32 %v1785_v59, %v1489_v42 }
 0x389   : > { %v1792_v9 = vsel %vm1501_vm11, %v1786_v7, -inf }
 0x38e   : > { %v1787_v60 = vpop.f32.mrf.mxu1  ;;  %v1885_v61 = vpop.f32.mrf.mxu0 }
 0x38f   : > { %v1886_v11 = vadd.f32 %v1885_v61, %v1489_v42 }
 0x391   : > { %v1912_v14 = vsel %vm1501_vm11, %v1886_v11, -inf }
 0x396   : > { %v1887_v62 = vpop.f32.mrf.mxu0  ;;  %v1908_v63 = vpop.f32.mrf.mxu1 }
 0x397   : > { %v5149_v4 = vadd.f32 %v1908_v63, %v1489_v42 }
 0x399   : > { %v1915_v6 = vsel %vm1501_vm11, %v5149_v4, -inf }
 0x39e   : > { %v1910_v1 = vpop.f32.mrf.mxu1 }
 0x3a3   : > { %1670 = vmax.xlane.f32.xlu2 %v1669_v2 }
 0x3ab   : > { %1916 = vmax.xlane.f32.xlu2 %v1915_v6 }
 0x3ac   : > { %1790 = vmax.xlane.f32.xlu1 %v1789_v8 }
 0x3b0   : > { %1793 = vmax.xlane.f32.xlu0 %v1792_v9 }
 0x3b8   : > { %1913 = vmax.xlane.f32.xlu0 %v1912_v14 }
 0x3cd   : > { %v1547_v15 = vpop.xlane.xlu2 %1546 }
 0x3ce   : > { %v1551_v16 = vsub.f32 %v1518_v44, %v1547_v15 }
 0x3d0   : > { %v1553_v17 = vmul.f32 1.442695, %v1551_v16 }
 0x3d2   : > { %3822 = vpow2.f32 %v1553_v17 }
 0x3d5   : > { %v1592_v29 = vpop.permute.xlu2 %1591 }
 0x3d6   : > { %v1597_v33 = vsel %vm1574_vm12, %v1592_v29, 0 }
 0x3d8   : > { %v5156_v18 = vpop.eup %3822 }
 0x3d9   : > { %v1557_v19 = vsel %vm1501_vm11, %v5156_v18, 0.0 }
 0x3da   : > { %1558 = vadd.xlane.f32.xlu2 %v1557_v19 }
 0x3dc   : > { %v1550_v21 = vpop.xlane.xlu1 %1549 }
 0x3dd   : > { %v1552_v24 = vsub.f32 %v1542_v48, %v1550_v21  ;;  %v1712_v37 = vpop.permute.xlu2 %1711 }
 0x3de   : > { %v1717_v1 = vsel %vm1574_vm12, %v1712_v37, 0 }
 0x3df   : > { %v1555_v26 = vmul.f32 1.442695, %v1552_v24 }
 0x3e5   : > { %v1668_v22 = vpop.xlane.xlu0 %1667 }
 0x3e6   : > { %v1672_v23 = vsub.f32 %v1637_v52, %v1668_v22 }
 0x3e8   : > { %v1674_v25 = vmul.f32 1.442695, %v1672_v23 }
 0x3ea   : > { %3824 = vpow2.f32 %v1674_v25 }
 0x3eb   : > { %3826 = vpow2.f32 %v1555_v26 }
 0x3f0   : > { %v5160_v27 = vpop.eup %3824 }
 0x3f1   : > { %v1678_v28 = vsel %vm1501_vm11, %v5160_v27, 0.0  ;;  %v5167_v32 = vpop.eup %3826 }
 0x3f2   : > { %1679 = vadd.xlane.f32.xlu0 %v1678_v28  ;;  %1834 = vrot.lane.b32.xlu2 %v5105_v13, %s4531_s22  ;;  %v1560_v36 = vsel %vm1501_vm11, %v5167_v32, 0.0 }
 0x3f4   : > { %v1570_v30 = vpop.permute.xlu1 %1569 }
 0x3f5   : > { %v1576_v31 = vsel %vm1574_vm12, %v1570_v30, 0 }
 0x3f6   : > { %1585 = vmatpush.bf16.msra.mxu3 %v1576_v31 }
 0x3f8   : > { %v1691_v34 = vpop.permute.xlu0 %1690 }
 0x3f9   : > { %v1696_v35 = vsel %vm1574_vm12, %v1691_v34, 0 }
 0x3fa   : > { %1606 = vmatpush.bf16.msrb.mxu3 %v1597_v33  ;;  %1705 = vmatpush.bf16.msrb.mxu2 %v1696_v35 }
 0x3fb   : > { %1561 = vadd.xlane.f32.xlu0 %v1560_v36 }
 0x416   : > { %v1671_v38 = vpop.xlane.xlu2 %1670 }
 0x417   : > { %v1673_v39 = vsub.f32 %v1663_v0, %v1671_v38 }
 0x419   : > { %v1676_v40 = vmul.f32 1.442695, %v1673_v39 }
 0x41b   : > { %3828 = vpow2.f32 %v1676_v40 }
 0x41e   : > { %v1917_v58 = vpop.xlane.xlu2 %1916 }
 0x41f   : > { %v1791_v41 = vpop.xlane.xlu1 %1790  ;;  %v1919_v61 = vsub.f32 %v5149_v4, %v1917_v58 }
 0x420   : > { %v1795_v42 = vsub.f32 %v1763_v5, %v1791_v41 }
 0x421   : > { %v3829_v43 = vpop.eup %3828  ;;  %v1922_v0 = vmul.f32 1.442695, %v1919_v61 }
 0x422   : > { %v1797_v44 = vmul.f32 1.442695, %v1795_v42  ;;  %v1681_v45 = vsel %vm1501_vm11, %v3829_v43, 0.0 }
 0x423   : > { %v1794_v46 = vpop.xlane.xlu0 %1793  ;;  %1682 = vadd.xlane.f32.xlu1 %v1681_v45 }
 0x424   : > { %3830 = vpow2.f32 %v1797_v44  ;;  %v1796_v47 = vsub.f32 %v1786_v7, %v1794_v46 }
 0x426   : > { %v1799_v48 = vmul.f32 1.442695, %v1796_v47 }
 0x428   : > { %3832 = vpow2.f32 %v1799_v48 }
 0x42a   : > { %v5174_v49 = vpop.eup %3830 }
 0x42b   : > { %v1914_v50 = vpop.xlane.xlu0 %1913  ;;  %v1801_v51 = vsel %vm1501_vm11, %v5174_v49, 0.0 }
 0x42c   : > { %v1918_v52 = vsub.f32 %v1886_v11, %v1914_v50  ;;  %1802 = vadd.xlane.f32.xlu2 %v1801_v51 }
 0x42e   : > { %v3833_v53 = vpop.eup %3832  ;;  %v1920_v54 = vmul.f32 1.442695, %v1918_v52 }
 0x42f   : > { %v1804_v55 = vsel %vm1501_vm11, %v3833_v53, 0.0 }
 0x430   : > { %3834 = vpow2.f32 %v1920_v54  ;;  %1805 = vadd.xlane.f32.xlu0 %v1804_v55 }
 0x436   : > { %v5179_v56 = vpop.eup %3834 }
 0x437   : > { %v1924_v57 = vsel %vm1501_vm11, %v5179_v56, 0.0 }
 0x438   : > { %1925 = vadd.xlane.f32.xlu0 %v1924_v57 }
 0x43c   : > { %1813 = vrot.lane.b32.xlu1 %v5099_v3, %s4531_s22 }
 0x444   : > { %1957 = vrot.lane.b32.xlu2 %v5105_v13, %s4532_s21 }
 0x44c   : > { %1936 = vrot.lane.b32.xlu0 %v5099_v3, %s4532_s21 }
 0x44d   : > { %v1559_v59 = vpop.xlane.xlu2 %1558 }
 0x44e   : > { %3836 = vrcp.f32 %v1559_v59 }
 0x44f   : > { %3838 = vpow2.f32 %v1922_v0 }
 0x454   : > { %v3837_v60 = vpop.eup %3836 }
 0x455   : > { %v1565_v62 = vmul.f32 %v3837_v60, %v5156_v18  ;;  %v3839_v2 = vpop.eup %3838  ;;  %v1835_v11 = vpop.permute.xlu2 %1834 }
 0x456   : > { %v1927_v5 = vsel %vm1501_vm11, %v3839_v2, 0.0  ;;  %v1840_v15 = vsel %vm1574_vm12, %v1835_v11, 0 }
 0x457   : > { %v1567_v63 = vpack.c.bf16 %v1565_v62, %v1565_v62  ;;  %v3613_v62 = vld [vmem:[%s5052_s9 + $0x8] sm:$0xff] }
 0x458   : > { %2021 = vmatpush.bf16.msra.mxu0 %v3613_v62  ;;  %v3805_v62 = vld [vmem:[%s5062_s26 + $0x1] ss:$0 sm:$0xff] }
 0x459   : > { %3488 = vmatmul.msk.bf16.vlgmr.msra.gmra.mxu3 %vm1501_vm11, %v1567_v63 }
 0x45a   : > { %1726 = vmatpush.bf16.msra.mxu3 %v1717_v1  ;;  %v3612_v1 = vld [vmem:[%s5052_s9] sm:$0xff]  ;;  %s5664_s9 = scalar_lea.vmem [#allocation17], %s4996_s19 }
 0x45b   : > { %s5665_s20 = smov %s5664_s9 }
 0x45c   : > { %2022 = vmatpush.bf16.msra.mxu0 %v3612_v1 }
 0x465   : > { %v1680_v13 = vpop.xlane.xlu0 %1679 }
 0x466   : > { %3840 = vrcp.f32 %v1680_v13  ;;  %1928 = vadd.xlane.f32.xlu1 %v1927_v5 }
 0x46c   : > { %v3841_v3 = vpop.eup %3840 }
 0x46d   : > { %v1686_v6 = vmul.f32 %v3841_v3, %v5160_v27 }
 0x46e   : > { %v1562_v4 = vpop.xlane.xlu0 %1561 }
 0x46f   : > { %3842 = vrcp.f32 %v1562_v4  ;;  %v1688_v7 = vpack.c.bf16 %v1686_v6, %v1686_v6  ;;  %v3804_v6 = vld [vmem:[%s5663_s8] ss:$0 sm:$0xff] }
 0x471   : > { %3492 = vmatmul.msk.bf16.vlgmr.msrb.gmra.mxu2 %vm1501_vm11, %v1688_v7 }
 0x475   : > { %v3843_v8 = vpop.eup %3842 }
 0x476   : > { %v1566_v9 = vmul.f32 %v3843_v8, %v5167_v32 }
 0x478   : > { %v1568_v14 = vpack.c.bf16 %v1566_v9, %v1566_v9 }
 0x47a   : > { %3489 = vmatmul.msk.bf16.vlgmr.msrb.gmra.mxu3 %vm1501_vm11, %v1568_v14 }
 0x47b   : > { %1849 = vmatpush.bf16.msrb.mxu3 %v1840_v15 }
 0x496   : > { %v1683_v16 = vpop.xlane.xlu1 %1682 }
 0x497   : > { %3844 = vrcp.f32 %v1683_v16 }
 0x49d   : > { %v3845_v17 = vpop.eup %3844 }
 0x49e   : > { %v1687_v18 = vmul.f32 %v3845_v17, %v3829_v43  ;;  %v3618_v17 = vld [vmem:[%s5664_s9 + $0x8] sm:$0xff] }
 0x49f   : > { %v1803_v19 = vpop.xlane.xlu2 %1802 }
 0x4a0   : > { %v1689_v21 = vpack.c.bf16 %v1687_v18, %v1687_v18  ;;  %3846 = vrcp.f32 %v1803_v19  ;;  %v3617_v18 = vld [vmem:[%s5665_s20] sm:$0xff] }
 0x4a2   : > { %3493 = vmatmul.msk.bf16.vlgmr.msra.gmra.mxu3 %vm1501_vm11, %v1689_v21 }
 0x4a3   : > { %v1806_v22 = vpop.xlane.xlu0 %1805 }
 0x4a4   : > { %3848 = vrcp.f32 %v1806_v22 }
 0x4a6   : > { %v3847_v25 = vpop.eup %3846 }
 0x4a7   : > { %v1958_v23 = vpop.permute.xlu2 %1957  ;;  %v1809_v28 = vmul.f32 %v3847_v25, %v5174_v49 }
 0x4a8   : > { %v1963_v24 = vsel %vm1574_vm12, %v1958_v23, 0 }
 0x4a9   : > { %1972 = vmatpush.bf16.msra.mxu3 %v1963_v24  ;;  %v1811_v32 = vpack.c.bf16 %v1809_v28, %v1809_v28 }
 0x4aa   : > { %v3849_v26 = vpop.eup %3848 }
 0x4ab   : > { %v1810_v27 = vmul.f32 %v3849_v26, %v3833_v53  ;;  %v1926_v33 = vpop.xlane.xlu0 %1925 }
 0x4ac   : > { %3850 = vrcp.f32 %v1926_v33 }
 0x4ad   : > { %v1812_v31 = vpack.c.bf16 %v1810_v27, %v1810_v27 }
 0x4ae   : > { %v1814_v29 = vpop.permute.xlu1 %1813 }
 0x4af   : > { %v1819_v30 = vsel %vm1574_vm12, %v1814_v29, 0 }
 0x4b0   : > { %1828 = vmatpush.bf16.msra.mxu2 %v1819_v30 }
 0x4b2   : > { %3497 = vmatmul.msk.bf16.vlgmr.msrb.gmra.mxu3 %vm1501_vm11, %v1812_v31  ;;  %v3851_v34 = vpop.eup %3850 }
 0x4b3   : > { %3496 = vmatmul.msk.bf16.vlgmr.msra.gmra.mxu2 %vm1501_vm11, %v1811_v32  ;;  %v1932_v35 = vmul.f32 %v3851_v34, %v5179_v56  ;;  %v3807_v34 = vld [vmem:[%s5668_s11] ss:$0 sm:$0xff] }
 0x4b5   : > { %v1934_v38 = vpack.c.bf16 %v1932_v35, %v1932_v35 }
 0x4be   : > { %v1937_v36 = vpop.permute.xlu0 %1936 }
 0x4bf   : > { %v1942_v37 = vsel %vm1574_vm12, %v1937_v36, 0 }
 0x4c0   : > { %1951 = vmatpush.bf16.msrb.mxu2 %v1942_v37 }
 0x4c3   : > { %3500 = vmatmul.msk.bf16.vlgmr.msrb.gmra.mxu2 %vm1501_vm11, %v1934_v38 }
 0x4c4   : > { %2157 = vmatpush.bf16.msra.mxu2 %v3618_v17 }
 0x4c8   : > { %2158 = vmatpush.bf16.msra.mxu2 %v3617_v18 }
 0x4d9   : > { %v1929_v39 = vpop.xlane.xlu1 %1928 }
 0x4da   : > { %3852 = vrcp.f32 %v1929_v39 }
 0x4dc   : > { %v1587_v40 = vpop.f32.mrf.mxu3 }
 0x4dd   : > { %1612 = vst.msk [vmem:[#allocation3] sm:$0xff] %vm1501_vm11, %v1587_v40 }
 0x4e0   : > { %v3853_v41 = vpop.eup %3852 }
 0x4e1   : > { %v1933_v42 = vmul.f32 %v3853_v41, %v3839_v2 }
 0x4e3   : > { %v1935_v43 = vpack.c.bf16 %v1933_v42, %v1933_v42 }
 0x4e4   : > { %v1589_v44 = vpop.f32.mrf.mxu3 }
 0x4e5   : > { %3501 = vmatmul.msk.bf16.vlgmr.msra.gmra.mxu3 %vm1501_vm11, %v1935_v43 }
 0x4f4   : > { %v1707_v45 = vpop.f32.mrf.mxu2 }
 0x4f5   : > { %1734 = vrot.lane.b32.xlu0 %v1707_v45, %s4533_s24 }
 0x4fc   : > { %v1709_v47 = vpop.f32.mrf.mxu2 }
 0x4fd   : > { %v1608_v46 = vpop.f32.mrf.mxu3 }
 0x4fe   : > { %1613 = vst.msk [vmem:[#allocation3 + $0x8] sm:$0xff] %vm1501_vm11, %v1608_v46 }
 0x505   : > { %v1610_v48 = vpop.f32.mrf.mxu3 }
 0x525   : > { %v1728_v49 = vpop.f32.mrf.mxu3 }
 0x526   : > { %1736 = vrot.lane.b32.xlu2 %v1728_v49, %s4533_s24 }
 0x52d   : > { %v1730_v50 = vpop.f32.mrf.mxu3 }
 0x535   : > { %v1851_v51 = vpop.f32.mrf.mxu3 }
 0x536   : > { %1859 = vrot.lane.b32.xlu2 %v1851_v51, %s4534_s2  ;;  %v1830_v52 = vpop.f32.mrf.mxu2 }
 0x537   : > { %1857 = vrot.lane.b32.xlu0 %v1830_v52, %s4534_s2 }
 0x53d   : > { %v1853_v53 = vpop.f32.mrf.mxu3 }
 0x53e   : > { %v1832_v54 = vpop.f32.mrf.mxu2 }
 0x546   : > { %v1953_v55 = vpop.f32.mrf.mxu2 }
 0x547   : > { %1980 = vrot.lane.b32.xlu0 %v1953_v55, %s4535_s0 }
 0x54e   : > { %v1955_v56 = vpop.f32.mrf.mxu2 }
 0x567   : > { %v1735_v57 = vpop.permute.xlu0 %1734 }
 0x568   : > { %1741 = vst.msk [vmem:[#allocation3] sm:$0xff] %vm1740_vm13, %v1735_v57  ;;  %v1974_v58 = vpop.f32.mrf.mxu3 }
 0x569   : > { %1982 = vrot.lane.b32.xlu1 %v1974_v58, %s4535_s0 }
 0x570   : > { %v1976_v59 = vpop.f32.mrf.mxu3 }
 0x580   : > { %v1737_v60 = vpop.permute.xlu2 %1736 }
 0x581   : > { %1742 = vst.msk [vmem:[#allocation3 + $0x8] sm:$0xff] %vm1740_vm13, %v1737_v60 }
 0x590   : > { %v1860_v61 = vpop.permute.xlu2 %1859 }
 0x591   : > { %1865 = vst.msk [vmem:[#allocation3 + $0x8] sm:$0xff] %vm1863_vm14, %v1860_v61 }
 0x5a9   : > { %v1858_v63 = vpop.permute.xlu0 %1857 }
 0x5aa   : > { %1864 = vst.msk [vmem:[#allocation3] sm:$0xff] %vm1863_vm14, %v1858_v63 }
 0x5b9   : > { %v1981_v0 = vpop.permute.xlu0 %1980 }
 0x5ba   : > { %1987 = vst.msk [vmem:[#allocation3] sm:$0xff] %vm1986_vm15, %v1981_v0 }
 0x5c1   : > { %v1989_v13 = vld [vmem:[#allocation3] sm:$0xff] }
 0x5db   : > { %v1983_v2 = vpop.permute.xlu1 %1982 }
 0x5dc   : > { %1988 = vst.msk [vmem:[#allocation3 + $0x8] sm:$0xff] %vm1986_vm15, %v1983_v2  ;;  %v3806_v2 = vld [vmem:[%s5067_s17 + $0x1] ss:$0 sm:$0xff] }
 0x5e3   : > { %v1990_v5 = vld [vmem:[#allocation3 + $0x8] sm:$0xff] }
 0x5e4   : > { %v1991_v3 = vpack.c.bf16 %v1990_v5, %v1989_v13 }
 0x5e6   : > { %3510 = vmatmul.msk.bf16.vlgmr.msra.gmra.mxu0 %vm1393_vm3, %v1991_v3 }
 0x663   : > { %v2024_v4 = vpop.f32.mrf.mxu0 }
 0x664   : > { %v2025_v7 = vadd.f32 %v3804_v6, %v2024_v4 }
 0x666   : > { %v5227_v8 = vadd.f32 %v2025_v7, %v5074_v10  ;;  %v3616_v10 = vld [vmem:[%s4977_s12] sm:$0xff]  ;;  %s5666_s12 = scalar_lea.vmem [#allocation14], %s4996_s19 }
 0x667   : > { %3532 = vmatmul.msk.bf16.vlgmr.msra.gmra.mxu2 %vm1393_vm3, %v3616_v10  ;;  %v3615_v29 = vld [vmem:[%s5666_s12 + $0x8] sm:$0xff]  ;;  %s5667_s25 = smov %s5666_s12 }
 0x668   : > { %v2033_v9 = vsel %vm1393_vm3, %v5227_v8, 0.0  ;;  %2113 = vmatpush.bf16.msra.mxu1 %v3615_v29  ;;  %v3614_v33 = vld [vmem:[%s5667_s25] sm:$0xff] }
 0x669   : > { %2034 = vadd.xlane.f32.xlu2 %v2033_v9  ;;  %v3808_v9 = vld [vmem:[%s5669_s16] ss:$0 sm:$0xff] }
 0x66b   : > { %v2026_v11 = vpop.f32.mrf.mxu0 }
 0x66c   : > { %v2027_v14 = vadd.f32 %v3804_v6, %v2026_v11  ;;  %2114 = vmatpush.bf16.msra.mxu1 %v3614_v33 }
 0x66e   : > { %v5232_v15 = vadd.f32 %v2027_v14, %v5078_v12 }
 0x670   : > { %v2036_v16 = vsel %vm1393_vm3, %v5232_v15, 0.0 }
 0x671   : > { %2037 = vadd.xlane.f32.xlu0 %v2036_v16 }
 0x6dc   : > { %v2035_v19 = vpop.xlane.xlu2 %2034 }
 0x6dd   : > { %v2039_v21 = vmul.f32 %v2035_v19, %v5082_v20 }
 0x6df   : > { %v2041_v12 = vsub.f32 %v5227_v8, %v2039_v21 }
 0x6e1   : > { %v2043_v22 = vmul.f32 %v2041_v12, %v2041_v12 }
 0x6e3   : > { %v2045_v23 = vsel %vm1393_vm3, %v2043_v22, 0.0 }
 0x6e4   : > { %v2038_v24 = vpop.xlane.xlu0 %2037  ;;  %2046 = vadd.xlane.f32.xlu1 %v2045_v23 }
 0x6e5   : > { %v2040_v25 = vmul.f32 %v2038_v24, %v5082_v20 }
 0x6e7   : > { %v2042_v26 = vsub.f32 %v5232_v15, %v2040_v25 }
 0x6e9   : > { %v2044_v27 = vmul.f32 %v2042_v26, %v2042_v26 }
 0x6ea   : > { %v2160_v35 = vpop.f32.mrf.mxu2 }
 0x6eb   : > { %v2048_v28 = vsel %vm1393_vm3, %v2044_v27, 0.0  ;;  %v2161_v38 = vadd.f32 %v3807_v34, %v2160_v35 }
 0x6ec   : > { %2049 = vadd.xlane.f32.xlu2 %v2048_v28 }
 0x6ed   : > { %v2171_v41 = vpack.c.bf16 %v2161_v38, %v2161_v38 }
 0x6ef   : > { %v2183_v43 = vsel %vm1501_vm11, %v2171_v41, 0  ;;  %v2242_v44 = vunpack.c.l.b16 %v2171_v41 }
 0x6f0   : > { %2192 = vmatpush.bf16.xpose.msrb.mxu3 %v2183_v43 }
 0x6f1   : > { %v5257_v46 = vpack.c.b16 %v2242_v44, %v2242_v44 }
 0x6f2   : > { %v2162_v47 = vpop.f32.mrf.mxu2 }
 0x6f3   : > { %v2163_v49 = vadd.f32 %v3807_v34, %v2162_v47  ;;  %2296 = vrot.lane.b32.xlu0 %v5257_v46, %s4527_s29 }
 0x6f5   : > { %v2172_v51 = vpack.c.bf16 %v2163_v49, %v2163_v49 }
 0x6f7   : > { %v2202_v55 = vsel %vm1501_vm11, %v2172_v51, 0  ;;  %v2266_v56 = vunpack.c.l.b16 %v2172_v51 }
 0x6f8   : > { %2211 = vmatpush.bf16.xpose.msrb.mxu0 %v2202_v55 }
 0x6f9   : > { %v5262_v58 = vpack.c.b16 %v2266_v56, %v2266_v56 }
 0x704   : > { %2322 = vrot.lane.b32.xlu2 %v5262_v58, %s4527_s29 }
 0x70c   : > { %2421 = vrot.lane.b32.xlu2 %v5257_v46, %s4525_s18 }
 0x757   : > { %v2047_v30 = vpop.xlane.xlu1 %2046 }
 0x758   : > { %v2051_v31 = vmul.f32 %v2047_v30, %v5082_v20 }
 0x75a   : > { %v2053_v32 = vadd.f32 1e-06, %v2051_v31 }
 0x75c   : > { %3854 = vrsqrt.f32 %v2053_v32  ;;  %vm2061_vm1 = vweird.f32 %v2053_v32 }
 0x75f   : > { %v2050_v36 = vpop.xlane.xlu2 %2049 }
 0x760   : > { %v2052_v37 = vmul.f32 %v2050_v36, %v5082_v20  ;;  %v5296_v36 = vld [vmem:[%s4987_s3] ss:$0 sm:$0xff] }
 0x762   : > { %v3855_v39 = vpop.eup %3854  ;;  %v2054_v40 = vadd.f32 1e-06, %v2052_v37  ;;  %v5299_v37 = vld [vmem:[%s4987_s3 + $0x1] ss:$0 sm:$0xff]  ;;  %s5670_s3 = scalar_lea.vmem [#allocation20], %s4996_s19 }
 0x763   : > { %v2056_v42 = vmul.f32 %v3855_v39, %v2053_v32  ;;  %vm2062_vm0 = vweird.f32 %v3855_v39 }
 0x764   : > { %3856 = vrsqrt.f32 %v2054_v40  ;;  %vm2063_vm2 = vmor %vm2061_vm1, %vm2062_vm0  ;;  %vm2071_vm5 = vweird.f32 %v2054_v40 }
 0x765   : > { %v2057_v45 = vmul.f32 %v3855_v39, %v2056_v42 }
 0x767   : > { %v2058_v48 = vmul.f32 0.5, %v2057_v45  ;;  %v2323_v25 = vpop.permute.xlu2 %2322 }
 0x768   : > { %v2328_v27 = vsel %vm1501_vm11, %v2323_v25, 0 }
 0x769   : > { %v2059_v50 = vsub.f32 1.5, %v2058_v48  ;;  %2337 = vmatpush.bf16.xpose.msra.mxu0 %v2328_v27 }
 0x76a   : > { %v3857_v52 = vpop.eup %3856 }
 0x76b   : > { %v2060_v53 = vmul.f32 %v3855_v39, %v2059_v50  ;;  %v2066_v54 = vmul.f32 %v3857_v52, %v2054_v40  ;;  %vm2072_vm4 = vweird.f32 %v3857_v52 }
 0x76c   : > { %vm2073_vm6 = vmor %vm2071_vm5, %vm2072_vm4 }
 0x76d   : > { %v2067_v57 = vmul.f32 %v3857_v52, %v2066_v54  ;;  %v2064_v59 = vsel %vm2063_vm2, %v3855_v39, %v2060_v53 }
 0x76e   : > { %v2075_v63 = vmul.f32 %v2064_v59, %v2041_v12 }
 0x76f   : > { %v2068_v60 = vmul.f32 0.5, %v2067_v57  ;;  %v2422_v29 = vpop.permute.xlu2 %2421 }
 0x770   : > { %v2078_v13 = vmul.f32 %v3805_v62, %v2075_v63  ;;  %v2427_v30 = vsel %vm1501_vm11, %v2422_v29, 0 }
 0x771   : > { %v2069_v61 = vsub.f32 1.5, %v2068_v60 }
 0x772   : > { %v2081_v6 = vadd.f32 %v3806_v2, %v2078_v13 }
 0x773   : > { %v2070_v0 = vmul.f32 %v3857_v52, %v2069_v61 }
 0x775   : > { %v2074_v1 = vsel %vm2073_vm6, %v3857_v52, %v2070_v0 }
 0x776   : > { %v2076_v5 = vmul.f32 %v2074_v1, %v2042_v26  ;;  %v2297_v26 = vpop.permute.xlu0 %2296 }
 0x777   : > { %v2302_v28 = vsel %vm1501_vm11, %v2297_v26, 0 }
 0x778   : > { %v2079_v3 = vmul.f32 %v3805_v62, %v2076_v5  ;;  %2311 = vmatpush.bf16.xpose.msra.mxu3 %v2302_v28 }
 0x77a   : > { %v2082_v4 = vadd.f32 %v3806_v2, %v2079_v3 }
 0x77c   : > { %v2083_v7 = vpack.c.bf16 %v2082_v4, %v2081_v6 }
 0x77e   : > { %3519 = vmatmul.msk.bf16.vlgmr.msra.gmra.mxu1 %vm1393_vm3, %v2083_v7 }
 0x7fb   : > { %v2116_v11 = vpop.f32.mrf.mxu1 }
 0x7fc   : > { %v2117_v14 = vadd.f32 %v3808_v9, %v2116_v11 }
 0x7fe   : > { %v2167_v16 = vmul.f32 0.35355338, %v2117_v14 }
 0x800   : > { %v2169_v17 = vpack.c.bf16 %v2167_v16, %v2167_v16 }
 0x802   : > { %v2292_v18 = vunpack.c.l.b16 %v2169_v17  ;;  %3533 = vmatmul.msk.bf16.vlgmr.msrb.gmra.mxu3 %vm1501_vm11, %v2169_v17 }
 0x803   : > { %v2118_v10 = vpop.f32.mrf.mxu1  ;;  %2436 = vmatpush.bf16.xpose.msrb.mxu3 %v2427_v30 }
 0x804   : > { %v2119_v19 = vadd.f32 %v3808_v9, %v2118_v10  ;;  %v2293_v21 = vpack.c.b16 %v2292_v18, %v2292_v18 }
 0x806   : > { %v2168_v12 = vmul.f32 0.35355338, %v2119_v19  ;;  %2419 = vrot.lane.b32.xlu2 %v2293_v21, %s4525_s18  ;;  %2294 = vrot.lane.b32.xlu1 %v2293_v21, %s4527_s29 }
 0x808   : > { %v2170_v22 = vpack.c.bf16 %v2168_v12, %v2168_v12 }
 0x80a   : > { %v2318_v23 = vunpack.c.l.b16 %v2170_v22  ;;  %3534 = vmatmul.msk.bf16.vlgmr.msrb.gmra.mxu0 %vm1501_vm11, %v2170_v22 }
 0x80c   : > { %v2319_v24 = vpack.c.b16 %v2318_v23, %v2318_v23 }
 0x80e   : > { %2320 = vrot.lane.b32.xlu0 %v2319_v24, %s4527_s29  ;;  %2543 = vrot.lane.b32.xlu2 %v5257_v46, %s4528_s10 }
 0x80f   : > { %2566 = vrot.lane.b32.xlu1 %v5262_v58, %s4528_s10 }
 0x816   : > { %2444 = vrot.lane.b32.xlu0 %v5262_v58, %s4525_s18  ;;  %2564 = vrot.lane.b32.xlu2 %v2319_v24, %s4528_s10 }
 0x81e   : > { %2442 = vrot.lane.b32.xlu0 %v2319_v24, %s4525_s18 }
 0x826   : > { %2541 = vrot.lane.b32.xlu0 %v2293_v21, %s4528_s10 }
 0x82e   : > { %2268 = vrot.lane.b32.xlu0 %v5262_v58, %s4523_s14 }
 0x860   : > { %v2420_v31 = vpop.permute.xlu2 %2419 }
 0x868   : > { %v2544_v32 = vpop.permute.xlu2 %2543 }
 0x869   : > { %v2549_v34 = vsel %vm1501_vm11, %v2544_v32, 0 }
 0x870   : > { %v2565_v53 = vpop.permute.xlu2 %2564 }
 0x878   : > { %v2295_v33 = vpop.permute.xlu1 %2294 }
 0x879   : > { %3537 = vmatmul.msk.bf16.vlgmr.msra.gmra.mxu3 %vm1501_vm11, %v2295_v33 }
 0x87a   : > { %2558 = vmatpush.bf16.xpose.msra.mxu3 %v2549_v34 }
 0x880   : > { %v2321_v35 = vpop.permute.xlu0 %2320 }
 0x881   : > { %3538 = vmatmul.msk.bf16.vlgmr.msra.gmra.mxu0 %vm1501_vm11, %v2321_v35  ;;  %v2567_v40 = vpop.permute.xlu1 %2566 }
 0x882   : > { %v2572_v47 = vsel %vm1501_vm11, %v2567_v40, 0 }
 0x885   : > { %v2194_v38 = vpop.f32.mrf.mxu3 }
 0x886   : > { %v2195_v39 = vadd.f32 %v5296_v36, %v2194_v38 }
 0x887   : > { %v2213_v41 = vpop.f32.mrf.mxu0 }
 0x888   : > { %v2214_v42 = vadd.f32 %v5299_v37, %v2213_v41  ;;  %v2445_v43 = vpop.permute.xlu0 %2444  ;;  %v2217_v44 = vsel %vm1501_vm11, %v2195_v39, -inf }
 0x889   : > { %v2450_v45 = vsel %vm1501_vm11, %v2445_v43, 0  ;;  %2218 = vmax.xlane.f32.xlu0 %v2217_v44  ;;  %3541 = vmatmul.msk.bf16.vlgmr.msrb.gmra.mxu3 %vm1501_vm11, %v2420_v31 }
 0x88a   : > { %2459 = vmatpush.bf16.xpose.msrb.mxu0 %v2450_v45  ;;  %v2220_v48 = vsel %vm1501_vm11, %v2214_v42, -inf }
 0x88b   : > { %2221 = vmax.xlane.f32.xlu1 %v2220_v48 }
 0x88d   : > { %v2196_v49 = vpop.f32.mrf.mxu3 }
 0x88f   : > { %v2215_v50 = vpop.f32.mrf.mxu0 }
 0x890   : > { %v2443_v51 = vpop.permute.xlu0 %2442 }
 0x891   : > { %3542 = vmatmul.msk.bf16.vlgmr.msrb.gmra.mxu0 %vm1501_vm11, %v2443_v51 }
 0x892   : > { %2581 = vmatpush.bf16.xpose.msra.mxu0 %v2572_v47 }
 0x898   : > { %v2542_v52 = vpop.permute.xlu0 %2541 }
 0x899   : > { %3545 = vmatmul.msk.bf16.vlgmr.msra.gmra.mxu3 %vm1501_vm11, %v2542_v52 }
 0x8a0   : > { %v2269_v54 = vpop.permute.xlu0 %2268 }
 0x8a1   : > { %v2274_v55 = vsel %vm1574_vm12, %v2269_v54, 0  ;;  %3546 = vmatmul.msk.bf16.vlgmr.msra.gmra.mxu0 %vm1501_vm11, %v2565_v53 }
 0x8a2   : > { %2283 = vmatpush.bf16.msrb.mxu2 %v2274_v55 }
 0x8fc   : > { %v2313_v56 = vpop.f32.mrf.mxu3  ;;  %v2219_v57 = vpop.xlane.xlu0 %2218 }
 0x8fd   : > { %v2314_v59 = vadd.f32 %v5296_v36, %v2313_v56  ;;  %v2223_v60 = vsub.f32 %v2195_v39, %v2219_v57 }
 0x8fe   : > { %v2222_v61 = vpop.xlane.xlu1 %2221  ;;  %v2339_v62 = vpop.f32.mrf.mxu0 }
 0x8ff   : > { %v2225_v63 = vmul.f32 1.442695, %v2223_v60  ;;  %v2224_v0 = vsub.f32 %v2214_v42, %v2222_v61  ;;  %v2340_v1 = vadd.f32 %v5299_v37, %v2339_v62  ;;  %v2343_v2 = vsel %vm1501_vm11, %v2314_v59, -inf }
 0x900   : > { %2344 = vmax.xlane.f32.xlu1 %v2343_v2 }
 0x901   : > { %3858 = vpow2.f32 %v2225_v63  ;;  %v2227_v13 = vmul.f32 1.442695, %v2224_v0  ;;  %v2346_v5 = vsel %vm1501_vm11, %v2340_v1, -inf }
 0x902   : > { %2347 = vmax.xlane.f32.xlu2 %v2346_v5 }
 0x903   : > { %3860 = vpow2.f32 %v2227_v13 }
 0x904   : > { %v2315_v3 = vpop.f32.mrf.mxu3 }
 0x906   : > { %v2341_v6 = vpop.f32.mrf.mxu0 }
 0x907   : > { %v5316_v4 = vpop.eup %3858 }
 0x908   : > { %v2229_v7 = vsel %vm1501_vm11, %v5316_v4, 0.0 }
 0x909   : > { %v3861_v9 = vpop.eup %3860  ;;  %2230 = vadd.xlane.f32.xlu1 %v2229_v7 }
 0x90a   : > { %v2232_v11 = vsel %vm1501_vm11, %v3861_v9, 0.0 }
 0x90b   : > { %2233 = vadd.xlane.f32.xlu0 %v2232_v11 }
 0x90c   : > { %v2438_v14 = vpop.f32.mrf.mxu3 }
 0x90d   : > { %v2439_v16 = vadd.f32 %v5296_v36, %v2438_v14 }
 0x90e   : > { %v2461_v17 = vpop.f32.mrf.mxu0 }
 0x90f   : > { %v2462_v18 = vadd.f32 %v5299_v37, %v2461_v17  ;;  %v2465_v10 = vsel %vm1501_vm11, %v2439_v16, -inf }
 0x910   : > { %2466 = vmax.xlane.f32.xlu2 %v2465_v10 }
 0x911   : > { %v2468_v19 = vsel %vm1501_vm11, %v2462_v18, -inf }
 0x913   : > { %2469 = vmax.xlane.f32.xlu0 %v2468_v19 }
 0x914   : > { %v2440_v21 = vpop.f32.mrf.mxu3 }
 0x916   : > { %v2463_v12 = vpop.f32.mrf.mxu0 }
 0x91c   : > { %v2560_v22 = vpop.f32.mrf.mxu3 }
 0x91d   : > { %v2561_v23 = vadd.f32 %v5296_v36, %v2560_v22 }
 0x91e   : > { %v2583_v24 = vpop.f32.mrf.mxu0 }
 0x91f   : > { %v2587_v25 = vsel %vm1501_vm11, %v2561_v23, -inf  ;;  %v5336_v28 = vadd.f32 %v5299_v37, %v2583_v24 }
 0x920   : > { %2588 = vmax.xlane.f32.xlu2 %v2587_v25 }
 0x921   : > { %v2590_v29 = vsel %vm1501_vm11, %v5336_v28, -inf }
 0x922   : > { %2367 = vrot.lane.b32.xlu1 %v5257_v46, %s4522_s13 }
 0x924   : > { %v2562_v26 = vpop.f32.mrf.mxu3 }
 0x926   : > { %v2585_v27 = vpop.f32.mrf.mxu0 }
 0x927   : > { %2388 = vrot.lane.b32.xlu0 %v5262_v58, %s4522_s13  ;;  %s5671_s13 = smov %s5670_s3 }
 0x92a   : > { %2510 = vrot.lane.b32.xlu1 %v5262_v58, %s4524_s4 }
 0x938   : > { %2244 = vrot.lane.b32.xlu2 %v5257_v46, %s4523_s14  ;;  %s5672_s14 = scalar_lea.vmem [#allocation22], %s4985_s6 }
 0x954   : > { %2591 = vmax.xlane.f32.xlu1 %v2590_v29 }
 0x973   : > { %v2345_v30 = vpop.xlane.xlu1 %2344 }
 0x974   : > { %v2349_v31 = vsub.f32 %v2314_v59, %v2345_v30 }
 0x975   : > { %v2348_v32 = vpop.xlane.xlu2 %2347 }
 0x976   : > { %v2351_v33 = vmul.f32 1.442695, %v2349_v31  ;;  %v2350_v34 = vsub.f32 %v2340_v1, %v2348_v32 }
 0x978   : > { %3862 = vpow2.f32 %v2351_v33  ;;  %v2353_v35 = vmul.f32 1.442695, %v2350_v34 }
 0x97a   : > { %3864 = vpow2.f32 %v2353_v35 }
 0x97c   : > { %v2231_v51 = vpop.xlane.xlu1 %2230 }
 0x97e   : > { %v5340_v36 = vpop.eup %3862  ;;  %v2234_v38 = vpop.xlane.xlu0 %2233 }
 0x97f   : > { %3866 = vrcp.f32 %v2234_v38  ;;  %v2355_v37 = vsel %vm1501_vm11, %v5340_v36, 0.0 }
 0x980   : > { %2356 = vadd.xlane.f32.xlu1 %v2355_v37  ;;  %v5344_v40 = vpop.eup %3864 }
 0x981   : > { %v2358_v48 = vsel %vm1501_vm11, %v5344_v40, 0.0 }
 0x983   : > { %v2467_v39 = vpop.xlane.xlu2 %2466 }
 0x984   : > { %v2471_v41 = vsub.f32 %v2439_v16, %v2467_v39 }
 0x985   : > { %v3867_v42 = vpop.eup %3866 }
 0x986   : > { %v2238_v43 = vmul.f32 %v3867_v42, %v3861_v9  ;;  %v2473_v44 = vmul.f32 1.442695, %v2471_v41  ;;  %v2470_v45 = vpop.xlane.xlu0 %2469 }
 0x987   : > { %v2472_v47 = vsub.f32 %v2462_v18, %v2470_v45 }
 0x988   : > { %v2240_v49 = vpack.c.bf16 %v2238_v43, %v2238_v43  ;;  %3868 = vpow2.f32 %v2473_v44  ;;  %2359 = vadd.xlane.f32.xlu1 %v2358_v48 }
 0x989   : > { %v2475_v50 = vmul.f32 1.442695, %v2472_v47 }
 0x98a   : > { %3536 = vmatmul.msk.bf16.vlgmr.msrb.gmra.mxu2 %vm1501_vm11, %v2240_v49 }
 0x98b   : > { %3870 = vpow2.f32 %v2475_v50 }
 0x98c   : > { %3872 = vrcp.f32 %v2231_v51 }
 0x98e   : > { %v3869_v52 = vpop.eup %3868 }
 0x98f   : > { %v2477_v53 = vsel %vm1501_vm11, %v3869_v52, 0.0 }
 0x990   : > { %2478 = vadd.xlane.f32.xlu2 %v2477_v53 }
 0x991   : > { %v3871_v54 = vpop.eup %3870 }
 0x992   : > { %v2480_v55 = vsel %vm1501_vm11, %v3871_v54, 0.0  ;;  %v3873_v61 = vpop.eup %3872 }
 0x993   : > { %2481 = vadd.xlane.f32.xlu0 %v2480_v55  ;;  %v2589_v56 = vpop.xlane.xlu2 %2588  ;;  %v2237_v63 = vmul.f32 %v3873_v61, %v5316_v4 }
 0x994   : > { %v2593_v57 = vsub.f32 %v2561_v23, %v2589_v56  ;;  %v2368_v59 = vpop.permute.xlu1 %2367 }
 0x995   : > { %v2373_v5 = vsel %vm1574_vm12, %v2368_v59, 0  ;;  %v2239_v7 = vpack.c.bf16 %v2237_v63, %v2237_v63 }
 0x996   : > { %v2595_v60 = vmul.f32 1.442695, %v2593_v57 }
 0x998   : > { %3874 = vpow2.f32 %v2595_v60 }
 0x999   : > { %v2389_v62 = vpop.permute.xlu0 %2388 }
 0x99a   : > { %v2394_v0 = vsel %vm1574_vm12, %v2389_v62, 0 }
 0x99b   : > { %2403 = vmatpush.bf16.msra.mxu2 %v2394_v0  ;;  %v2245_v1 = vpop.permute.xlu2 %2244 }
 0x99c   : > { %v2250_v2 = vsel %vm1574_vm12, %v2245_v1, 0  ;;  %v2511_v13 = vpop.permute.xlu1 %2510  ;;  %v3620_v1 = vld [vmem:[%s5670_s3 + $0x8] sm:$0xff] }
 0x99d   : > { %v2516_v3 = vsel %vm1574_vm12, %v2511_v13, 0  ;;  %2259 = vmatpush.bf16.msrb.mxu1 %v2250_v2  ;;  %2695 = vmatpush.bf16.msrb.mxu3 %v3620_v1 }
 0x99e   : > { %v3875_v6 = vpop.eup %3874 }
 0x99f   : > { %2525 = vmatpush.bf16.msrb.mxu2 %v2516_v3  ;;  %v2599_v9 = vsel %vm1501_vm11, %v3875_v6, 0.0 }
 0x9a0   : > { %2600 = vadd.xlane.f32.xlu2 %v2599_v9  ;;  %3535 = vmatmul.msk.bf16.vlgmr.msrb.gmra.mxu1 %vm1501_vm11, %v2239_v7 }
 0x9a1   : > { %2382 = vmatpush.bf16.msra.mxu1 %v2373_v5  ;;  %2489 = vrot.lane.b32.xlu1 %v5257_v46, %s4524_s4  ;;  %v3619_v5 = vld [vmem:[%s5671_s13] sm:$0xff]  ;;  %s5673_s4 = scalar_lea.vmem [#allocation23], %s4996_s19  ;;  %s5675_s19 = scalar_lea.vmem [#allocation25], %s4985_s6 }
 0x9a2   : > { %2696 = vmatpush.bf16.msrb.mxu3 %v3619_v5  ;;  %s5674_s18 = smov %s5673_s4 }
 0x9a7   : > { %2632 = vrot.lane.b32.xlu0 %v5262_v58, %s4526_s23 }
 0x9b8   : > { %2611 = vrot.lane.b32.xlu2 %v5257_v46, %s4526_s23 }
 0x9c7   : > { %v2592_v4 = vpop.xlane.xlu1 %2591 }
 0x9c8   : > { %v2594_v11 = vsub.f32 %v5336_v28, %v2592_v4 }
 0x9ca   : > { %v2597_v14 = vmul.f32 1.442695, %v2594_v11  ;;  %v3811_v11 = vld [vmem:[%s5672_s14] ss:$0 sm:$0xff] }
 0x9cc   : > { %3876 = vpow2.f32 %v2597_v14 }
 0x9d2   : > { %v3877_v16 = vpop.eup %3876 }
 0x9d3   : > { %v2602_v17 = vsel %vm1501_vm11, %v3877_v16, 0.0 }
 0x9d4   : > { %2603 = vadd.xlane.f32.xlu1 %v2602_v17 }
 0x9f3   : > { %v2357_v18 = vpop.xlane.xlu1 %2356 }
 0x9f4   : > { %3878 = vrcp.f32 %v2357_v18 }
 0x9fa   : > { %v3879_v10 = vpop.eup %3878 }
 0x9fb   : > { %v2363_v19 = vmul.f32 %v3879_v10, %v5340_v36  ;;  %v2360_v21 = vpop.xlane.xlu1 %2359 }
 0x9fc   : > { %3880 = vrcp.f32 %v2360_v21 }
 0x9fd   : > { %v2365_v58 = vpack.c.bf16 %v2363_v19, %v2363_v19 }
 0x9ff   : > { %3539 = vmatmul.msk.bf16.vlgmr.msra.gmra.mxu1 %vm1501_vm11, %v2365_v58 }
 0xa02   : > { %v3881_v46 = vpop.eup %3880 }
 0xa03   : > { %v2364_v12 = vmul.f32 %v3881_v46, %v5344_v40  ;;  %v2479_v23 = vpop.xlane.xlu2 %2478 }
 0xa05   : > { %v2366_v22 = vpack.c.bf16 %v2364_v12, %v2364_v12 }
 0xa06   : > { %v2482_v24 = vpop.xlane.xlu0 %2481 }
 0xa07   : > { %3540 = vmatmul.msk.bf16.vlgmr.msra.gmra.mxu2 %vm1501_vm11, %v2366_v22  ;;  %3882 = vrcp.f32 %v2482_v24 }
 0xa08   : > { %3884 = vrcp.f32 %v2479_v23 }
 0xa0d   : > { %v2285_v25 = vpop.f32.mrf.mxu2  ;;  %v3883_v26 = vpop.eup %3882 }
 0xa0e   : > { %2290 = vst.msk [vmem:[#allocation3 + $0x8] sm:$0xff] %vm1501_vm11, %v2285_v25  ;;  %v3885_v27 = vpop.eup %3884  ;;  %v2486_v28 = vmul.f32 %v3883_v26, %v3871_v54 }
 0xa0f   : > { %v2485_v29 = vmul.f32 %v3885_v27, %v3869_v52 }
 0xa10   : > { %v2488_v33 = vpack.c.bf16 %v2486_v28, %v2486_v28  ;;  %v3622_v28 = vld [vmem:[%s5673_s4 + $0x8] sm:$0xff] }
 0xa11   : > { %v2487_v35 = vpack.c.bf16 %v2485_v29, %v2485_v29  ;;  %2787 = vmatpush.bf16.msrb.mxu0 %v3622_v28 }
 0xa13   : > { %v2490_v30 = vpop.permute.xlu1 %2489  ;;  %v2601_v31 = vpop.xlane.xlu2 %2600 }
 0xa14   : > { %v2495_v32 = vsel %vm1574_vm12, %v2490_v30, 0  ;;  %3886 = vrcp.f32 %v2601_v31 }
 0xa15   : > { %v2287_v34 = vpop.f32.mrf.mxu2  ;;  %2504 = vmatpush.bf16.msrb.mxu1 %v2495_v32  ;;  %v3621_v32 = vld [vmem:[%s5674_s18] sm:$0xff] }
 0xa16   : > { %2788 = vmatpush.bf16.msrb.mxu0 %v3621_v32 }
 0xa17   : > { %3544 = vmatmul.msk.bf16.vlgmr.msrb.gmra.mxu2 %vm1501_vm11, %v2488_v33  ;;  %v3626_v33 = vld [vmem:[%s5057_s15 + $0x18] sm:$0xff] }
 0xa18   : > { %3543 = vmatmul.msk.bf16.vlgmr.msrb.gmra.mxu1 %vm1501_vm11, %v2487_v35 }
 0xa19   : > { %v2633_v36 = vpop.permute.xlu0 %2632 }
 0xa1a   : > { %v2638_v38 = vsel %vm1574_vm12, %v2633_v36, 0  ;;  %v3887_v41 = vpop.eup %3886 }
 0xa1b   : > { %2647 = vmatpush.bf16.msra.mxu2 %v2638_v38  ;;  %v2612_v37 = vpop.permute.xlu2 %2611  ;;  %v2607_v42 = vmul.f32 %v3887_v41, %v3875_v6 }
 0xa1c   : > { %v2617_v39 = vsel %vm1574_vm12, %v2612_v37, 0 }
 0xa1d   : > { %v2261_v40 = vpop.f32.mrf.mxu1  ;;  %2626 = vmatpush.bf16.msra.mxu1 %v2617_v39  ;;  %v2609_v44 = vpack.c.bf16 %v2607_v42, %v2607_v42 }
 0xa1e   : > { %2289 = vst.msk [vmem:[#allocation3] sm:$0xff] %vm1501_vm11, %v2261_v40 }
 0xa21   : > { %2842 = vmatpush.bf16.msrb.mxu1 %v3626_v33 }
 0xa25   : > { %v2263_v43 = vpop.f32.mrf.mxu1 }
 0xa28   : > { %3547 = vmatmul.msk.bf16.vlgmr.msra.gmra.mxu1 %vm1501_vm11, %v2609_v44 }
 0xa47   : > { %v2604_v45 = vpop.xlane.xlu1 %2603 }
 0xa48   : > { %3888 = vrcp.f32 %v2604_v45 }
 0xa4e   : > { %v3889_v47 = vpop.eup %3888 }
 0xa4f   : > { %v2608_v48 = vmul.f32 %v3889_v47, %v3877_v16 }
 0xa51   : > { %v2610_v49 = vpack.c.bf16 %v2608_v48, %v2608_v48 }
 0xa53   : > { %3548 = vmatmul.msk.bf16.vlgmr.msra.gmra.mxu2 %vm1501_vm11, %v2610_v49 }
 0xa7c   : > { %v2384_v50 = vpop.f32.mrf.mxu1 }
 0xa7d   : > { %2411 = vrot.lane.b32.xlu0 %v2384_v50, %s4533_s24  ;;  %v3812_v50 = vld [vmem:[%s5062_s26 + $0x2] ss:$0 sm:$0xff] }
 0xa84   : > { %v2386_v51 = vpop.f32.mrf.mxu1 }
 0xa8a   : > { %v2405_v52 = vpop.f32.mrf.mxu2 }
 0xa8b   : > { %2413 = vrot.lane.b32.xlu0 %v2405_v52, %s4533_s24 }
 0xa92   : > { %v2407_v53 = vpop.f32.mrf.mxu2 }
 0xa95   : > { %v2506_v54 = vpop.f32.mrf.mxu1 }
 0xa96   : > { %2533 = vrot.lane.b32.xlu2 %v2506_v54, %s4534_s2  ;;  %v3813_v54 = vld [vmem:[%s5067_s17 + $0x2] ss:$0 sm:$0xff]  ;;  %s5676_s17 = scalar_lea.vmem [#allocation26], %s4985_s6 }
 0xa9a   : > { %v2527_v55 = vpop.f32.mrf.mxu2 }
 0xa9b   : > { %2535 = vrot.lane.b32.xlu0 %v2527_v55, %s4534_s2 }
 0xa9d   : > { %v2508_v56 = vpop.f32.mrf.mxu1 }
 0xaa2   : > { %v2529_v57 = vpop.f32.mrf.mxu2 }
 0xaa5   : > { %v2628_v59 = vpop.f32.mrf.mxu1 }
 0xaa6   : > { %2655 = vrot.lane.b32.xlu1 %v2628_v59, %s4535_s0 }
 0xaad   : > { %v2630_v60 = vpop.f32.mrf.mxu1 }
 0xad6   : > { %v2649_v61 = vpop.f32.mrf.mxu2 }
 0xad7   : > { %2657 = vrot.lane.b32.xlu2 %v2649_v61, %s4535_s0 }
 0xade   : > { %v2651_v62 = vpop.f32.mrf.mxu2 }
 0xadf   : > { %v3625_v62 = vld [vmem:[%s5057_s15 + $0x10] sm:$0xff] }
 0xae0   : > { %2843 = vmatpush.bf16.msrb.mxu1 %v3625_v62 }
 0xaef   : > { %v2412_v63 = vpop.permute.xlu0 %2411 }
 0xaf0   : > { %2417 = vst.msk [vmem:[#allocation3] sm:$0xff] %vm1740_vm13, %v2412_v63  ;;  %v2534_v0 = vpop.permute.xlu2 %2533  ;;  %v3624_v63 = vld [vmem:[%s5057_s15 + $0x8] sm:$0xff] }
 0xaf1   : > { %2539 = vst.msk [vmem:[#allocation3] sm:$0xff] %vm1863_vm14, %v2534_v0  ;;  %2844 = vmatpush.bf16.msrb.mxu1 %v3624_v63  ;;  %v3623_v0 = vld [vmem:[%s5057_s15] sm:$0xff]  ;;  %s5677_s15 = sld [smem:[#allocation48_spill]] }
 0xaf5   : > { %2845 = vmatpush.bf16.msrb.mxu1 %v3623_v0 }
 0xaf7   : > { %p3584_p13 = scmp.ne.s32.totalorder %s5677_s15, 1 }
 0xaf8   : > { %s5678_s23 = sld [smem:[#allocation79_spill]] (!%p3584_p13) }
 0xaf9   : > { %s5679_s1 = sld [smem:[#allocation80_spill]] (!%p3584_p13) }
 0xafd   : > { %v2414_v2 = vpop.permute.xlu0 %2413 }
 0xafe   : > { %2418 = vst.msk [vmem:[#allocation3 + $0x8] sm:$0xff] %vm1740_vm13, %v2414_v2  ;;  %v3814_v2 = vld [vmem:[%s5675_s19] ss:$0 sm:$0xff]  ;;  %vm2834_vm13 = vcmask 523264  }
 0xb0d   : > { %v2536_v13 = vpop.permute.xlu0 %2535 }
 0xb0e   : > { %2540 = vst.msk [vmem:[#allocation3 + $0x8] sm:$0xff] %vm1863_vm14, %v2536_v13 }
 0xb18   : > { %v2656_v3 = vpop.permute.xlu1 %2655 }
 0xb19   : > { %2661 = vst.msk [vmem:[#allocation3] sm:$0xff] %vm1986_vm15, %v2656_v3 }
 0xb20   : > { %v2663_v7 = vld [vmem:[#allocation3] sm:$0xff] }
 0xb31   : > { %v2658_v6 = vpop.permute.xlu2 %2657 }
 0xb32   : > { %2662 = vst.msk [vmem:[#allocation3 + $0x8] sm:$0xff] %vm1986_vm15, %v2658_v6 }
 0xb39   : > { %v2664_v9 = vld [vmem:[#allocation3 + $0x8] sm:$0xff] }
 0xb3a   : > { %v2665_v4 = vpack.c.bf16 %v2664_v9, %v2663_v7 }
 0xb3c   : > { %3557 = vmatmul.msk.bf16.vlgmr.msrb.gmra.mxu3 %vm1393_vm3, %v2665_v4  ;;  %v3815_v4 = vld [vmem:[%s5676_s17] ss:$0 sm:$0xff] }
 0xbbf   : > { %v2698_v14 = vpop.f32.mrf.mxu3 }
 0xbc0   : > { %v2699_v16 = vadd.f32 %v3811_v11, %v2698_v14 }
 0xbc2   : > { %v5399_v17 = vadd.f32 %v2699_v16, %v5227_v8 }
 0xbc4   : > { %v2707_v18 = vsel %vm1393_vm3, %v5399_v17, 0.0 }
 0xbc5   : > { %2708 = vadd.xlane.f32.xlu0 %v2707_v18 }
 0xbc7   : > { %v2700_v10 = vpop.f32.mrf.mxu3 }
 0xbc8   : > { %v2701_v19 = vadd.f32 %v3811_v11, %v2700_v10 }
 0xbca   : > { %v5404_v21 = vadd.f32 %v2701_v19, %v5232_v15 }
 0xbcc   : > { %v2710_v58 = vsel %vm1393_vm3, %v5404_v21, 0.0 }
 0xbcd   : > { %2711 = vadd.xlane.f32.xlu2 %v2710_v58 }
 0xc38   : > { %v2709_v46 = vpop.xlane.xlu0 %2708 }
 0xc39   : > { %v2713_v12 = vmul.f32 %v2709_v46, %v5082_v20 }
 0xc3b   : > { %v2715_v8 = vsub.f32 %v5399_v17, %v2713_v12 }
 0xc3d   : > { %v2717_v22 = vmul.f32 %v2715_v8, %v2715_v8 }
 0xc3f   : > { %v2719_v23 = vsel %vm1393_vm3, %v2717_v22, 0.0 }
 0xc40   : > { %v2712_v24 = vpop.xlane.xlu2 %2711  ;;  %2720 = vadd.xlane.f32.xlu1 %v2719_v23 }
 0xc41   : > { %v2714_v25 = vmul.f32 %v2712_v24, %v5082_v20 }
 0xc43   : > { %v2716_v15 = vsub.f32 %v5404_v21, %v2714_v25 }
 0xc45   : > { %v2718_v26 = vmul.f32 %v2716_v15, %v2716_v15 }
 0xc47   : > { %v2722_v27 = vsel %vm1393_vm3, %v2718_v26, 0.0 }
 0xc48   : > { %2723 = vadd.xlane.f32.xlu0 %v2722_v27 }
 0xcb3   : > { %v2721_v29 = vpop.xlane.xlu1 %2720 }
 0xcb4   : > { %v2725_v30 = vmul.f32 %v2721_v29, %v5082_v20 }
 0xcb6   : > { %v2727_v31 = vadd.f32 1e-06, %v2725_v30 }
 0xcb8   : > { %3890 = vrsqrt.f32 %v2727_v31  ;;  %vm2735_vm8 = vweird.f32 %v2727_v31 }
 0xcbb   : > { %v2724_v34 = vpop.xlane.xlu0 %2723 }
 0xcbc   : > { %v2726_v35 = vmul.f32 %v2724_v34, %v5082_v20 }
 0xcbe   : > { %v3891_v36 = vpop.eup %3890  ;;  %v2728_v38 = vadd.f32 1e-06, %v2726_v35 }
 0xcbf   : > { %v2730_v37 = vmul.f32 %v3891_v36, %v2727_v31  ;;  %vm2736_vm7 = vweird.f32 %v3891_v36 }
 0xcc0   : > { %3892 = vrsqrt.f32 %v2728_v38  ;;  %vm2737_vm9 = vmor %vm2735_vm8, %vm2736_vm7  ;;  %vm2745_vm11 = vweird.f32 %v2728_v38 }
 0xcc1   : > { %v2731_v39 = vmul.f32 %v3891_v36, %v2730_v37 }
 0xcc3   : > { %v2732_v40 = vmul.f32 0.5, %v2731_v39 }
 0xcc5   : > { %v2733_v41 = vsub.f32 1.5, %v2732_v40 }
 0xcc6   : > { %v3893_v42 = vpop.eup %3892 }
 0xcc7   : > { %v2734_v43 = vmul.f32 %v3891_v36, %v2733_v41  ;;  %v2740_v44 = vmul.f32 %v3893_v42, %v2728_v38  ;;  %vm2746_vm10 = vweird.f32 %v3893_v42 }
 0xcc8   : > { %vm2747_vm12 = vmor %vm2745_vm11, %vm2746_vm10 }
 0xcc9   : > { %v2741_v45 = vmul.f32 %v3893_v42, %v2740_v44  ;;  %v2738_v47 = vsel %vm2737_vm9, %v3891_v36, %v2734_v43 }
 0xcca   : > { %v2749_v51 = vmul.f32 %v2738_v47, %v2715_v8 }
 0xccb   : > { %v2742_v48 = vmul.f32 0.5, %v2741_v45 }
 0xccc   : > { %v2752_v55 = vmul.f32 %v3812_v50, %v2749_v51 }
 0xccd   : > { %v2743_v49 = vsub.f32 1.5, %v2742_v48 }
 0xcce   : > { %v2755_v59 = vadd.f32 %v3813_v54, %v2752_v55 }
 0xccf   : > { %v2744_v52 = vmul.f32 %v3893_v42, %v2743_v49 }
 0xcd1   : > { %v2748_v53 = vsel %vm2747_vm12, %v3893_v42, %v2744_v52 }
 0xcd2   : > { %v2750_v56 = vmul.f32 %v2748_v53, %v2716_v15 }
 0xcd4   : > { %v2753_v57 = vmul.f32 %v3812_v50, %v2750_v56 }
 0xcd6   : > { %v2756_v60 = vadd.f32 %v3813_v54, %v2753_v57 }
 0xcd8   : > { %v2757_v61 = vpack.c.bf16 %v2756_v60, %v2755_v59 }
 0xcda   : > { %3566 = vmatmul.msk.bf16.vlgmr.msrb.gmra.mxu0 %vm1393_vm3, %v2757_v61 }
 0xd57   : > { %v2790_v1 = vpop.f32.mrf.mxu0 }
 0xd58   : > { %v2791_v13 = vadd.f32 %v3814_v2, %v2790_v1 }
 0xd5a   : > { %v2795_v6 = vmax.f32 %v2791_v13, 0.0 }
 0xd5f   : > { %v2792_v5 = vpop.f32.mrf.mxu0 }
 0xd60   : > { %v2793_v3 = vadd.f32 %v3814_v2, %v2792_v5 }
 0xd62   : > { %v2796_v7 = vmax.f32 %v2793_v3, 0.0 }
 0xd64   : > { %v2797_v9 = vpack.c.bf16 %v2796_v7, %v2795_v6 }
 0xd66   : > { %3583 = vmatmul.msk.bf16.vlgmr.msrb.gmra.mxu1 %vm2834_vm13, %v2797_v9 }
 0xde3   : > { %v2847_v11 = vpop.f32.mrf.mxu1 }
 0xde4   : > { %v2848_v14 = vadd.f32 %v3815_v4, %v2847_v11 }
 0xde6   : > { %v2852_v16 = vadd.f32 %v2848_v14, %v5399_v17 }
 0xde8   : > { %2854 = vst.msk [vmem:[#allocation2] sm:$0xff] %vm1393_vm3, %v2852_v16 }
 0xdeb   : > { %v2849_v18 = vpop.f32.mrf.mxu1 }
 0xdec   : > { %v2850_v10 = vadd.f32 %v3815_v4, %v2849_v18  ;;  %2859 = sbr.rel (%p3584_p13) target bundleno = 3982 (0xf8e), region = 180 }
 0xdee   : > { %v2853_v19 = vadd.f32 %v2850_v10, %v5404_v21 }
 0xdf0   : > { %2855 = vst.msk [vmem:[#allocation2 + $0x8] sm:$0xff] %vm1393_vm3, %v2853_v19 }
 0xdf1   : > { %v2862_v58 = vsel %vm1393_vm3, %v2852_v16, 0.0  ;;  %v2865_v46 = vsel %vm1393_vm3, %v2853_v19, 0.0  ;;  %v3628_v27 = vld [vmem:[#allocation28 + $0x8] sm:$0xff]  ;;  %v3627_v29 = vld [vmem:[#allocation28] sm:$0xff] }
 0xdf2   : > { %2863 = vadd.xlane.f32.xlu0 %v2862_v58  ;;  %2944 = vmatpush.bf16.msra.mxu0 %v3628_v27  ;;  %v3894_v43 = vld [vmem:[%s5678_s23] ss:$0 sm:$0xff] }
 0xdf3   : > { %v3895_v47 = vld [vmem:[%s5679_s1] ss:$0 sm:$0xff] }
 0xdf6   : > { %2945 = vmatpush.bf16.msra.mxu0 %v3627_v29 }
 0xdfa   : > { %2866 = vadd.xlane.f32.xlu0 %v2865_v46 }
 0xe65   : > { %v2864_v12 = vpop.xlane.xlu0 %2863 }
 0xe66   : > { %v2868_v17 = vmul.f32 %v2864_v12, %v5082_v20 }
 0xe68   : > { %v2870_v8 = vsub.f32 %v2852_v16, %v2868_v17 }
 0xe6a   : > { %v2872_v22 = vmul.f32 %v2870_v8, %v2870_v8 }
 0xe6c   : > { %v2874_v23 = vsel %vm1393_vm3, %v2872_v22, 0.0 }
 0xe6d   : > { %2875 = vadd.xlane.f32.xlu1 %v2874_v23  ;;  %v2867_v21 = vpop.xlane.xlu0 %2866 }
 0xe6e   : > { %v2869_v24 = vmul.f32 %v2867_v21, %v5082_v20 }
 0xe70   : > { %v2871_v25 = vsub.f32 %v2853_v19, %v2869_v24 }
 0xe72   : > { %v2873_v15 = vmul.f32 %v2871_v25, %v2871_v25 }
 0xe74   : > { %v2877_v26 = vsel %vm1393_vm3, %v2873_v15, 0.0 }
 0xe75   : > { %2878 = vadd.xlane.f32.xlu1 %v2877_v26 }
 0xee0   : > { %v2876_v28 = vpop.xlane.xlu1 %2875 }
 0xee1   : > { %v2880_v30 = vmul.f32 %v2876_v28, %v5082_v20 }
 0xee3   : > { %v2882_v31 = vadd.f32 1e-06, %v2880_v30 }
 0xee5   : > { %3896 = vrsqrt.f32 %v2882_v31  ;;  %vm2890_vm15 = vweird.f32 %v2882_v31 }
 0xee8   : > { %v2879_v32 = vpop.xlane.xlu1 %2878 }
 0xee9   : > { %v2881_v33 = vmul.f32 %v2879_v32, %v5082_v20 }
 0xeeb   : > { %v3897_v34 = vpop.eup %3896  ;;  %v2883_v35 = vadd.f32 1e-06, %v2881_v33 }
 0xeec   : > { %v2885_v36 = vmul.f32 %v3897_v34, %v2882_v31  ;;  %vm2891_vm14 = vweird.f32 %v3897_v34 }
 0xeed   : > { %3898 = vrsqrt.f32 %v2883_v35  ;;  %vm2892_vm0 = vmor %vm2890_vm15, %vm2891_vm14  ;;  %vm2900_vm2 = vweird.f32 %v2883_v35 }
 0xeee   : > { %v2886_v38 = vmul.f32 %v3897_v34, %v2885_v36 }
 0xef0   : > { %v2887_v37 = vmul.f32 0.5, %v2886_v38 }
 0xef2   : > { %v2888_v39 = vsub.f32 1.5, %v2887_v37 }
 0xef3   : > { %v3899_v40 = vpop.eup %3898 }
 0xef4   : > { %v2889_v41 = vmul.f32 %v3897_v34, %v2888_v39  ;;  %v2895_v42 = vmul.f32 %v3899_v40, %v2883_v35  ;;  %vm2901_vm1 = vweird.f32 %v3899_v40 }
 0xef5   : > { %vm2902_vm4 = vmor %vm2900_vm2, %vm2901_vm1 }
 0xef6   : > { %v2896_v44 = vmul.f32 %v3899_v40, %v2895_v42  ;;  %v2893_v20 = vsel %vm2892_vm0, %v3897_v34, %v2889_v41 }
 0xef7   : > { %v2904_v45 = vmul.f32 %v2893_v20, %v2870_v8 }
 0xef8   : > { %v2897_v48 = vmul.f32 0.5, %v2896_v44 }
 0xef9   : > { %v2909_v49 = vmul.f32 %v3894_v43, %v2904_v45 }
 0xefa   : > { %v2898_v50 = vsub.f32 1.5, %v2897_v48 }
 0xefb   : > { %v2914_v51 = vadd.f32 %v3895_v47, %v2909_v49 }
 0xefc   : > { %v2899_v52 = vmul.f32 %v3899_v40, %v2898_v50 }
 0xefd   : > { %2916 = vst.msk [vmem:[%s5071_s28] sm:$0xff] %vm1393_vm3, %v2914_v51 }
 0xefe   : > { %v2903_v53 = vsel %vm2902_vm4, %v3899_v40, %v2899_v52 }
 0xeff   : > { %v2905_v54 = vmul.f32 %v2903_v53, %v2871_v25 }
 0xf01   : > { %v2910_v55 = vmul.f32 %v3894_v43, %v2905_v54 }
 0xf03   : > { %v2915_v56 = vadd.f32 %v3895_v47, %v2910_v55 }
 0xf05   : > { %2917 = vst.msk [vmem:[%s5071_s28 + $0x8] sm:$0xff] %vm1393_vm3, %v2915_v56  ;;  %v2918_v57 = vpack.c.bf16 %v2915_v56, %v2914_v51 }
 0xf07   : > { %3593 = vmatmul.msk.bf16.vlgmr.msra.gmra.mxu0 %vm1393_vm3, %v2918_v57 }
 0xf84   : > { %v2947_v59 = vpop.f32.mrf.mxu0 }
 0xf85   : > { %2952 = vst [vmem:[%s5069_s27] sm:$0xff] %v2947_v59 }
 0xf8c   : > { %v2949_v60 = vpop.f32.mrf.mxu0 }
 0xf8d   : > { %2953 = vst [vmem:[%s5069_s27 + $0x8] sm:$0xff] %v2949_v60 }
 0xf8e PF: > { %s5680_s22 = sld [smem:[#allocation49_spill]]  ;;  %s2972_s12 = sshll.u32 %s5069_s27, 4  ;;  %s2973_s12 = int_to_ptr.vmem [resolvable:$true] %s2972_s12 }
 0xf8f   : > { %s5682_s9 = sld [smem:[#allocation82_spill]]  ;;  %s2955_s11 = scalar_lea.sflag [#allocation7], %s4973_s5 }
 0xf94   : > { %s3629_s2 = sshll.u32 %s5680_s22, 4 }
 0xf95   : > { %s2971_s20 = scalar_lea.hbm %s5682_s9, %s3629_s2  ;;  %s4344_s4 = scalar_lea.hbm %s5682_s9, 32 }
 0xf96   : > { %s2974_s25 = sshll.u32 %s2971_s20, 4  ;;  %s2975_s25 = int_to_ptr.hbm [resolvable:$true] %s2974_s25 }
 0xf97   : > { %s4338_s16 = sshra.s32 %s2975_s25, 4  ;;  %s4339_s16 = int_to_ptr.hbm [resolvable:$true] %s4338_s16 }
 0xf98   : > { %s4340_s3 = scalar_lea.hbm %s4339_s16, 16  ;;  %p4345_p9 = scmp.lt.s32.totalorder %s4339_s16, %s5682_s9 }
 0xf99   : > { %p4341_p0 = scmp.ne.s32.totalorder %s4339_s16, %s4340_s3  ;;  %p4346_p11 = scmp.lt.s32.totalorder %s4344_s4, %s4340_s3 }
 0xf9b   : > { %p4342_p5 = pnand %p4341_p0, %p4786_p8  ;;  %p4347_p1 = por %p4346_p11, %p4345_p9 }
 0xf9d   : > { %p4343_p10 = pneg %p4342_p5 }
 0xf9f   : > { %p4348_p4 = pnand %p4347_p1, %p4343_p10 }
 0xfa1   : > { %4351 = shalt.err (!%p4348_p4)
}
 0xfa2   : > { %s4536_s27 = smov 128   ;;  %s5683_s6 = sld [smem:[#allocation83_spill]] }
 0xfa3   : > { %3665 = dma.vmem_to_hbm [thread:$0]  (%p4786_p8), %s2973_s12, 256, %s2975_s25, %s2955_s11, %s4536_s27, %s4536_s27, %s4533_s24  }
 0xfa4   : > { %s2989_s29 = sshll.u32 %s5071_s28, 4  ;;  %s2960_s1 = scalar_lea.sflag [#allocation31], %s4973_s5  ;;  %s2990_s29 = int_to_ptr.vmem [resolvable:$true] %s2989_s29 }
 0xfa8   : > { %s5684_s23 = smov %s5683_s6  ;;  %s2988_s26 = scalar_lea.hbm %s5683_s6, %s3629_s2 }
 0xfa9   : > { %s2991_s10 = sshll.u32 %s2988_s26, 4  ;;  %s4372_s12 = scalar_lea.hbm %s5684_s23, 32  ;;  %s2992_s10 = int_to_ptr.hbm [resolvable:$true] %s2991_s10 }
 0xfaa   : > { %s4366_s22 = sshra.s32 %s2992_s10, 4  ;;  %s4367_s22 = int_to_ptr.hbm [resolvable:$true] %s4366_s22 }
 0xfab   : > { %s4368_s0 = scalar_lea.hbm %s4367_s22, 16  ;;  %p4373_p6 = scmp.lt.s32.totalorder %s4367_s22, %s5684_s23 }
 0xfac   : > { %p4369_p3 = scmp.ne.s32.totalorder %s4367_s22, %s4368_s0  ;;  %p4374_p13 = scmp.lt.s32.totalorder %s4372_s12, %s4368_s0 }
 0xfae   : > { %p4370_p7 = pnand %p4369_p3, %p4786_p8  ;;  %p4375_p0 = por %p4374_p13, %p4373_p6 }
 0xfb0   : > { %p4371_p12 = pneg %p4370_p7 }
 0xfb2   : > { %p4376_p5 = pnand %p4375_p0, %p4371_p12 }
 0xfb4   : > { %4379 = shalt.err (!%p4376_p5)
}
 0xfb5   : > { %3666 = dma.vmem_to_hbm [thread:$0]  (%p4786_p8), %s2990_s29, 256, %s2992_s10, %s2960_s1, %s4536_s27, %s4536_s27, %s4533_s24  }
 0xfb6 PF: > { %s5685_s5 = sld [smem:[#allocation50_spill]] }
 0xfb7   : > { %s5686_s28 = sld [smem:[#allocation45_spill]] }
 0xfbc   : > { %p3687_p10 = scmp.ge.s32.totalorder %s5685_s5, 2 }
 0xfbd   : > { %s3006_s16 = sand.u32 1, %s5686_s28  }
 0xfbe   : > { %p3677_p9 = pnand %p3687_p10, %p4793_p2  ;;  %s3007_s3 = scalar_lea.sflag [#allocation7], %s3006_s16 }
 0xfc0   : > { %p3678_p11 = pneg %p3677_p9 }
 0xfc2   : > { %4461 = dma.done.wait (%p3678_p11), %s3007_s3, 256  }
 0xfc3   : > { %4463 = vsyncadd (%p3678_p11), %s3007_s3, 4294967040  ;;  %s3017_s13 = scalar_lea.sflag [#allocation31], %s3006_s16 }
 0xfc4   : > { %4465 = dma.done.wait (%p3678_p11), %s3017_s13, 256  }
 0xfc5   : > { %4467 = vsyncadd (%p3678_p11), %s3017_s13, 4294967040  ;;  %s63_s3 = sadd.s32 1, %s5685_s5   ;;  %s5688_s5 = sld [smem:[#allocation43_spill]] }
 0xfc6   : > { %p60_p1 = scmp.ge.s32.totalorder %s63_s3, 6   ;;  %s5689_s26 = sld [smem:[#allocation44_spill]] }
 0xfc7   : > { %s5690_s27 = sld [smem:[#allocation54_spill]]  ;;  %s5696_s29 = smov %s4502_s7 }
 0xfc8   : > { %s5691_s28 = sld [smem:[#allocation46_spill]]  ;;  %s5697_s0 = smov %s4506_s30 }
 0xfc9   : > { %s5692_s6 = sld [smem:[#allocation47_spill]] }
 0xfca   : > { %s5693_s2 = sld [smem:[#allocation55_spill]] }
 0xfcb   : > { %s5694_s24 = sld [smem:[#allocation51_spill]] }
 0xfcc   : > { %s5695_s21 = sld [smem:[#allocation52_spill]] }
 0xfce   :  { %62 = sbr.rel (!%p60_p1) target bundleno = 50 (0x32), region = 353 }
 0xfd1   : > { %s5698_s7 = smov %s5694_s24 }
 0xfd2   : > { %s5699_s30 = smov %s5695_s21 }
 0xfd3   :  { %3023 = vsyncpa [#allocation6], 1 }
 0xfd4   :  { %3025 = vsyncpa [#allocation6 + $0x1], 1 }
 0xfd5   :  { %3026 = vsyncpa [#allocation9], 1 }
 0xfd6   :  { %3028 = vsyncpa [#allocation9 + $0x1], 1 }
 0xfd7   :  { %3029 = vsyncpa [#allocation12], 1 }
 0xfd8   :  { %3031 = vsyncpa [#allocation12 + $0x1], 1 }
 0xfd9   :  { %3032 = vsyncpa [#allocation15], 1 }
 0xfda   :  { %3034 = vsyncpa [#allocation15 + $0x1], 1 }
 0xfdb   :  { %3035 = vsyncpa [#allocation18], 1 }
 0xfdc   :  { %3037 = vsyncpa [#allocation18 + $0x1], 1 }
 0xfdd   :  { %3038 = vsyncpa [#allocation21], 1 }
 0xfde   :  { %3040 = vsyncpa [#allocation21 + $0x1], 1 }
 0xfdf   :  { %3041 = vsyncpa [#allocation24], 1 }
 0xfe0   :  { %3043 = vsyncpa [#allocation24 + $0x1], 1 }
 0xfe1   :  { %3044 = vsyncpa [#allocation27], 1 }
 0xfe2   :  { %3046 = vsyncpa [#allocation27 + $0x1], 1 }
 0xfe3   :  { %3047 = vsyncpa [#allocation7], 1 }
 0xfe4   :  { %3049 = vsyncpa [#allocation7 + $0x1], 1 }
 0xfe5   :  { %3050 = vsyncpa [#allocation31], 1 }
 0xfe6   :  { %3052 = vsyncpa [#allocation31 + $0x1], 1 }

</bundles_post_ra>
